<compile_context>
chip_gen: v7x
topology: tpu7x:2x2x1
jax: 0.10.0
libtpu: 0.0.40
codegen_flags: <defaults>
</compile_context>

<pallas_src>
import functools

import jax
import jax.numpy as jnp
from jax.experimental import pallas as pl
from jax.experimental.pallas import tpu as pltpu


# ----------------------------------------------------------------------------
# Layer definitions (shapes from DaveOrig.__init__)
# ----------------------------------------------------------------------------
CONV_DEFS = [  # (name, cin, cout, ksize, stride)
    ("conv1", 3, 24, 5, 2),
    ("conv2", 24, 36, 5, 2),
    ("conv3", 36, 48, 5, 2),
    ("conv4", 48, 64, 3, 1),
    ("conv5", 64, 64, 3, 1),
]
FC_DEFS = [  # (name, fin, fout)
    ("fc1", 64 * 2 * 2, 1164),
    ("fc2", 1164, 100),
    ("fc3", 100, 50),
    ("fc4", 50, 10),
    ("fc5", 10, 1),
]

VMEM_LIMIT = 8 * 1024 * 1024  # actual per-call use < 3 MiB; leave headroom


def _round_up(x, m):
    return ((x + m - 1) // m) * m


# ----------------------------------------------------------------------------
# Pallas kernel 1: tiled fused matmul + bias + ReLU (conv hot path)
#   x tile: (TM, K) bf16, w: (K, Np) bf16, b: (1, Np) f32, out: (TM, Np) bf16
# ----------------------------------------------------------------------------
def _matmul_bias_act_kernel(x_ref, w_ref, b_ref, o_ref, *, act):
    acc = jnp.dot(x_ref[...], w_ref[...], preferred_element_type=jnp.float32)
    acc = acc + b_ref[...]                     # f32 bias, (TM, Np) + (1, Np)
    if act == "relu":
        acc = jnp.maximum(acc, 0.0)
    o_ref[...] = acc.astype(o_ref.dtype)       # cast-at-store (bf16 output)


def matmul_bias_act_tiled(x_bf16, w_bf16, b_f32, act="relu", tm_max=512):
    """x_bf16: (M, K) bf16; w_bf16: (K, Np) bf16 (N padded to 128); b: (1, Np) f32.

    Returns (M, Np) bf16 (caller slices off the N padding)."""
    M, K = x_bf16.shape
    Kw, Np = w_bf16.shape
    assert Kw == K and Np % 128 == 0, (Kw, K, Np)

    TM = min(tm_max, _round_up(M, 16))         # bf16 packs 16 rows / sublane grp
    Mp = _round_up(M, TM)
    xp = x_bf16 if Mp == M else jnp.pad(x_bf16, ((0, Mp - M), (0, 0)))

    kernel = functools.partial(_matmul_bias_act_kernel, act=act)
    out = pl.pallas_call(
        kernel,
        out_shape=jax.ShapeDtypeStruct((Mp, Np), jnp.bfloat16),
        grid=(Mp // TM,),
        in_specs=[
            pl.BlockSpec((TM, K), lambda i: (i, 0)),    # row tiles stream
            pl.BlockSpec((K, Np), lambda i: (0, 0)),    # weight resident
            pl.BlockSpec((1, Np), lambda i: (0, 0)),    # bias resident
        ],
        out_specs=pl.BlockSpec((TM, Np), lambda i: (i, 0)),
        compiler_params=pltpu.CompilerParams(
            dimension_semantics=("parallel",),
            vmem_limit_bytes=VMEM_LIMIT,
        ),
        cost_estimate=pl.CostEstimate(
            flops=2 * Mp * K * Np,
            transcendentals=0,
            bytes_accessed=Mp * K * 2 + K * Np * 2 + Np * 4 + Mp * Np * 2,
        ),
    )(xp, w_bf16, b_f32)
    return out[:M]


# ----------------------------------------------------------------------------
# Pallas kernel 2: fused fc1..fc5 chain (bf16 matmuls, f32 bias/ReLU), M-tiled
# ----------------------------------------------------------------------------
def _fused_fc_kernel(x_ref, w1_ref, b1_ref, w2_ref, b2_ref, w3_ref, b3_ref,
                     w4_ref, b4_ref, w5_ref, b5_ref, o_ref):
    def layer(h, w_ref, b_ref, relu):
        acc = jnp.dot(h, w_ref[...], preferred_element_type=jnp.float32)
        acc = acc + b_ref[...]
        if relu:
            acc = jnp.maximum(acc, 0.0)
        return acc

    h = x_ref[...]                                  # already bf16
    h = layer(h, w1_ref, b1_ref, True).astype(jnp.bfloat16)
    h = layer(h, w2_ref, b2_ref, True).astype(jnp.bfloat16)
    h = layer(h, w3_ref, b3_ref, True).astype(jnp.bfloat16)
    h = layer(h, w4_ref, b4_ref, True).astype(jnp.bfloat16)
    o_ref[...] = layer(h, w5_ref, b5_ref, False)    # final logits kept f32


def fused_fc(x_bf16, params, tm_max=256):
    """x_bf16: (B, 256) bf16 NHWC-flattened -> (B, 1) f32 pre-atan logits."""
    B, K = x_bf16.shape
    Mp = _round_up(B, 16)
    TM = min(tm_max, Mp)
    xp = x_bf16 if Mp == B else jnp.pad(x_bf16, ((0, Mp - B), (0, 0)))

    wb = []
    for name, _, _ in FC_DEFS:
        wb.append(params[name + "_w"])
        wb.append(params[name + "_b"])
    n_out_p = params["fc5_w"].shape[1]              # 128 (padded)

    flops = 0
    for name, _, _ in FC_DEFS:
        kp, np_ = params[name + "_w"].shape
        flops += 2 * Mp * kp * np_
    bytes_acc = (xp.size * 2 + Mp * n_out_p * 4
                 + sum(int(a.size) * a.dtype.itemsize for a in wb))

    out = pl.pallas_call(
        _fused_fc_kernel,
        out_shape=jax.ShapeDtypeStruct((Mp, n_out_p), jnp.float32),
        grid=(Mp // TM,),
        in_specs=[pl.BlockSpec((TM, K), lambda i: (i, 0))]
        + [pl.BlockSpec(a.shape, lambda i: (0, 0)) for a in wb],
        out_specs=pl.BlockSpec((TM, n_out_p), lambda i: (i, 0)),
        compiler_params=pltpu.CompilerParams(
            dimension_semantics=("parallel",),
            vmem_limit_bytes=VMEM_LIMIT,
        ),
        cost_estimate=pl.CostEstimate(
            flops=flops, transcendentals=0, bytes_accessed=bytes_acc),
    )(xp, *wb)
    return out[:B, :1]


# ----------------------------------------------------------------------------
# Plain-JAX glue: im2col patch extraction (data movement only, no FLOPs)
# ----------------------------------------------------------------------------
def im2col(x, kh, kw, stride):
    """x: (B, H, W, C) bf16 -> ((B*OH*OW, KH*KW*C) bf16, OH, OW)."""
    B, H, W, C = x.shape
    oh = (H - kh) // stride + 1
    ow = (W - kw) // stride + 1
    cols = []
    for i in range(kh):
        for j in range(kw):
            cols.append(
                jax.lax.slice(
                    x,
                    (0, i, j, 0),
                    (B, i + stride * (oh - 1) + 1, j + stride * (ow - 1) + 1, C),
                    (1, stride, stride, 1),
                )
            )
    patches = jnp.stack(cols, axis=3)           # (B, OH, OW, KH*KW, C)
    return patches.reshape(B * oh * ow, kh * kw * C), oh, ow


def conv2d_relu(x, w_p, b_p, kh, kw, stride, cout):
    """x: (B, H, W, Cin) NHWC bf16; w_p: (K, Np) bf16; valid padding."""
    B = x.shape[0]
    cols, oh, ow = im2col(x, kh, kw, stride)
    y = matmul_bias_act_tiled(cols, w_p, b_p, act="relu")    # Pallas hot path
    y = y[:, :cout]                                          # drop lane padding
    return y.reshape(B, oh, ow, cout)


# ----------------------------------------------------------------------------
# Deterministic parameter init (PyTorch-default-style uniform) + weight prep
# ----------------------------------------------------------------------------
def init_params(key):
    def uniform(k, shape, fan_in):
        bound = 1.0 / float(fan_in) ** 0.5
        return jax.random.uniform(k, shape, jnp.float32, -bound, bound)

    keys = jax.random.split(key, 2 * (len(CONV_DEFS) + len(FC_DEFS)))
    params, k = {}, 0
    for name, cin, cout, ks, _stride in CONV_DEFS:
        fan = cin * ks * ks
        params[name + "_w"] = uniform(keys[k], (ks, ks, cin, cout), fan); k += 1
        params[name + "_b"] = uniform(keys[k], (cout,), fan); k += 1
    for name, fin, fout in FC_DEFS:
        params[name + "_w"] = uniform(keys[k], (fin, fout), fin); k += 1
        params[name + "_b"] = uniform(keys[k], (fout,), fin); k += 1
    return params


def prepare_params(params):
    """One-time prep: flatten conv weights to im2col order, zero-pad N to a
    multiple of 128, cast weights to bf16, keep biases f32 as (1, Np), and fold
    the NHWC-flatten permutation into fc1's rows (replaces the runtime
    transpose before the FC chain)."""
    prepped = {}
    for name, cin, cout, ks, _stride in CONV_DEFS:
        w = params[name + "_w"].reshape(ks * ks * cin, cout)   # (K, Cout)
        K, N = w.shape
        Np = _round_up(N, 128)
        prepped[name + "_w"] = (
            jnp.zeros((K, Np), jnp.bfloat16).at[:, :N].set(w.astype(jnp.bfloat16)))
        prepped[name + "_b"] = (
            jnp.zeros((1, Np), jnp.float32).at[0, :N].set(params[name + "_b"]))

    # fc1 rows are in torch flatten order (c, h, w); permute them so the kernel
    # can consume the NHWC-flattened (h, w, c) activation directly.
    C, H, W = 64, 2, 2
    perm = jnp.arange(C * H * W).reshape(C, H, W).transpose(1, 2, 0).reshape(-1)

    # Layer i's padded K equals the previous layer's padded N so the fused FC
    # kernel chains activations without re-slicing (padded cols are exact zeros).
    kp_prev = C * H * W   # 256, exact flatten width
    for name, fin, fout in FC_DEFS:
        w = params[name + "_w"]
        if name == "fc1":
            w = w[perm, :]
        Kp, Np = kp_prev, _round_up(fout, 128)
        prepped[name + "_w"] = (
            jnp.zeros((Kp, Np), jnp.bfloat16).at[:fin, :fout].set(w.astype(jnp.bfloat16)))
        prepped[name + "_b"] = (
            jnp.zeros((1, Np), jnp.float32).at[0, :fout].set(params[name + "_b"]))
        kp_prev = Np
    return prepped


# ----------------------------------------------------------------------------
# Forward pass (mirrors DaveOrig.forward)
# ----------------------------------------------------------------------------
def dave_forward(prepped, x_nchw):
    x = jnp.transpose(x_nchw, (0, 2, 3, 1)).astype(jnp.bfloat16)   # NCHW -> NHWC bf16
    for name, _cin, cout, ks, stride in CONV_DEFS:
        x = conv2d_relu(x, prepped[name + "_w"], prepped[name + "_b"],
                        ks, ks, stride, cout)
    B = x.shape[0]
    # NHWC flatten; the (h, w, c) -> torch (c, h, w) permutation lives in fc1_w.
    x = x.reshape(B, -1)                              # (B, 256) bf16
    y = fused_fc(x, prepped)                          # fc1..fc5 in one kernel
    # TODO(synk): arctan has no guaranteed Mosaic lowering; applied in plain JAX
    # on the tiny (B, 1) output (not a hot path).
    return jnp.arctan(y) * 2.0


if __name__ == "__main__":
    key = jax.random.PRNGKey(0)
    pkey, xkey = jax.random.split(key)
    params = init_params(pkey)
    prepped = prepare_params(params)
    # Input 70x70 is the smallest square input giving 2x2 after conv5
    # (matching fc1 = Linear(64*2*2, 1164)).
    x = jax.random.normal(xkey, (2, 3, 70, 70), jnp.float32)
    y = jax.jit(dave_forward)(prepped, x)
    jax.block_until_ready(y)
    assert y.shape == (2, 1), y.shape
    print("KERNEL_OK")
</pallas_src>

<mosaic_0001>
module attributes {stable_mosaic.version = 11 : i64} {
  func.func @_matmul_bias_act_kernel(%arg0: i32, %arg1: memref<512x75xbf16, #tpu.memory_space<vmem>>, %arg2: memref<75x128xbf16, #tpu.memory_space<vmem>>, %arg3: memref<1x128xf32, #tpu.memory_space<vmem>>, %arg4: memref<512x128xbf16, #tpu.memory_space<vmem>>) attributes {dimension_semantics = [#tpu.dimension_semantics<parallel>], iteration_bounds = array<i64: 5>, scalar_prefetch = 0 : i64, scratch_operands = 0 : i64, tpu.core_type = #tpu.core_type<tc>, window_params = [{transform_indices = @transform_0, window_bounds = array<i64: 512, 75>}, {pipeline_mode = #tpu.pipeline_mode<synchronous>, transform_indices = @transform_1, window_bounds = array<i64: 75, 128>}, {pipeline_mode = #tpu.pipeline_mode<synchronous>, transform_indices = @transform_2, window_bounds = array<i64: 1, 128>}, {transform_indices = @transform_3, window_bounds = array<i64: 512, 128>}]} {
    %c0 = arith.constant 0 : index
    %c0_0 = arith.constant 0 : index
    %0 = vector.load %arg1[%c0, %c0_0] : memref<512x75xbf16, #tpu.memory_space<vmem>>, vector<512x75xbf16>
    %c0_1 = arith.constant 0 : index
    %c0_2 = arith.constant 0 : index
    %1 = vector.load %arg2[%c0_1, %c0_2] : memref<75x128xbf16, #tpu.memory_space<vmem>>, vector<75x128xbf16>
    %cst = arith.constant dense<0.000000e+00> : vector<512x128xf32>
    %2 = tpu.matmul %0, %1, %cst {dimension_numbers = #tpu.dot_dimension_numbers<[1], [0], [0], [1], [0, 0, 1, 1], [], []>} : vector<512x75xbf16>, vector<75x128xbf16>, vector<512x128xf32> -> vector<512x128xf32>
    %c0_3 = arith.constant 0 : index
    %c0_4 = arith.constant 0 : index
    %3 = vector.load %arg3[%c0_3, %c0_4] : memref<1x128xf32, #tpu.memory_space<vmem>>, vector<1x128xf32>
    %4 = vector.broadcast %3 : vector<1x128xf32> to vector<512x128xf32>
    %5 = arith.addf %2, %4 : vector<512x128xf32>
    %cst_5 = arith.constant 0.000000e+00 : f32
    %6 = vector.broadcast %cst_5 : f32 to vector<512x128xf32>
    %7 = arith.maximumf %5, %6 : vector<512x128xf32>
    %8 = arith.truncf %7 : vector<512x128xf32> to vector<512x128xbf16>
    %c0_6 = arith.constant 0 : index
    %c0_7 = arith.constant 0 : index
    %9 = vector.load %arg4[%c0_6, %c0_7] : memref<512x128xbf16, #tpu.memory_space<vmem>>, vector<512x128xbf16>
    tpu.vector_store %arg4[%c0_6, %c0_7], %8 {strides = array<i32>} : memref<512x128xbf16, #tpu.memory_space<vmem>>, vector<512x128xbf16>,
    return
  }
  func.func @transform_0(%arg0: i32) -> (i32, i32) {
    %c0_i32 = arith.constant 0 : i32
    %c0_i32_0 = arith.constant 0 : i32
    return %arg0, %c0_i32 : i32, i32
  }
  func.func @transform_1(%arg0: i32) -> (i32, i32) {
    %c0_i32 = arith.constant 0 : i32
    %c0_i32_0 = arith.constant 0 : i32
    %c0_i32_1 = arith.constant 0 : i32
    return %c0_i32, %c0_i32_0 : i32, i32
  }
  func.func @transform_2(%arg0: i32) -> (i32, i32) {
    %c0_i32 = arith.constant 0 : i32
    %c0_i32_0 = arith.constant 0 : i32
    %c0_i32_1 = arith.constant 0 : i32
    return %c0_i32, %c0_i32_0 : i32, i32
  }
  func.func @transform_3(%arg0: i32) -> (i32, i32) {
    %c0_i32 = arith.constant 0 : i32
    %c0_i32_0 = arith.constant 0 : i32
    return %arg0, %c0_i32 : i32, i32
  }
}

module attributes {stable_mosaic.version = 11 : i64} {
  func.func @_matmul_bias_act_kernel(%arg0: i32, %arg1: memref<464x600xbf16, #tpu.memory_space<vmem>>, %arg2: memref<600x128xbf16, #tpu.memory_space<vmem>>, %arg3: memref<1x128xf32, #tpu.memory_space<vmem>>, %arg4: memref<464x128xbf16, #tpu.memory_space<vmem>>) attributes {dimension_semantics = [#tpu.dimension_semantics<parallel>], iteration_bounds = array<i64: 1>, scalar_prefetch = 0 : i64, scratch_operands = 0 : i64, tpu.core_type = #tpu.core_type<tc>, window_params = [{transform_indices = @transform_0, window_bounds = array<i64: 464, 600>}, {pipeline_mode = #tpu.pipeline_mode<synchronous>, transform_indices = @transform_1, window_bounds = array<i64: 600, 128>}, {pipeline_mode = #tpu.pipeline_mode<synchronous>, transform_indices = @transform_2, window_bounds = array<i64: 1, 128>}, {transform_indices = @transform_3, window_bounds = array<i64: 464, 128>}]} {
    %c0 = arith.constant 0 : index
    %c0_0 = arith.constant 0 : index
    %0 = vector.load %arg1[%c0, %c0_0] : memref<464x600xbf16, #tpu.memory_space<vmem>>, vector<464x600xbf16>
    %c0_1 = arith.constant 0 : index
    %c0_2 = arith.constant 0 : index
    %1 = vector.load %arg2[%c0_1, %c0_2] : memref<600x128xbf16, #tpu.memory_space<vmem>>, vector<600x128xbf16>
    %cst = arith.constant dense<0.000000e+00> : vector<464x128xf32>
    %2 = tpu.matmul %0, %1, %cst {dimension_numbers = #tpu.dot_dimension_numbers<[1], [0], [0], [1], [0, 0, 1, 1], [], []>} : vector<464x600xbf16>, vector<600x128xbf16>, vector<464x128xf32> -> vector<464x128xf32>
    %c0_3 = arith.constant 0 : index
    %c0_4 = arith.constant 0 : index
    %3 = vector.load %arg3[%c0_3, %c0_4] : memref<1x128xf32, #tpu.memory_space<vmem>>, vector<1x128xf32>
    %4 = vector.broadcast %3 : vector<1x128xf32> to vector<464x128xf32>
    %5 = arith.addf %2, %4 : vector<464x128xf32>
    %cst_5 = arith.constant 0.000000e+00 : f32
    %6 = vector.broadcast %cst_5 : f32 to vector<464x128xf32>
    %7 = arith.maximumf %5, %6 : vector<464x128xf32>
    %8 = arith.truncf %7 : vector<464x128xf32> to vector<464x128xbf16>
    %c0_6 = arith.constant 0 : index
    %c0_7 = arith.constant 0 : index
    %9 = vector.load %arg4[%c0_6, %c0_7] : memref<464x128xbf16, #tpu.memory_space<vmem>>, vector<464x128xbf16>
    tpu.vector_store %arg4[%c0_6, %c0_7], %8 {strides = array<i32>} : memref<464x128xbf16, #tpu.memory_space<vmem>>, vector<464x128xbf16>,
    return
  }
  func.func @transform_0(%arg0: i32) -> (i32, i32) {
    %c0_i32 = arith.constant 0 : i32
    %c0_i32_0 = arith.constant 0 : i32
    return %arg0, %c0_i32 : i32, i32
  }
  func.func @transform_1(%arg0: i32) -> (i32, i32) {
    %c0_i32 = arith.constant 0 : i32
    %c0_i32_0 = arith.constant 0 : i32
    %c0_i32_1 = arith.constant 0 : i32
    return %c0_i32, %c0_i32_0 : i32, i32
  }
  func.func @transform_2(%arg0: i32) -> (i32, i32) {
    %c0_i32 = arith.constant 0 : i32
    %c0_i32_0 = arith.constant 0 : i32
    %c0_i32_1 = arith.constant 0 : i32
    return %c0_i32, %c0_i32_0 : i32, i32
  }
  func.func @transform_3(%arg0: i32) -> (i32, i32) {
    %c0_i32 = arith.constant 0 : i32
    %c0_i32_0 = arith.constant 0 : i32
    return %arg0, %c0_i32 : i32, i32
  }
}

module attributes {stable_mosaic.version = 11 : i64} {
  func.func @_matmul_bias_act_kernel(%arg0: i32, %arg1: memref<80x900xbf16, #tpu.memory_space<vmem>>, %arg2: memref<900x128xbf16, #tpu.memory_space<vmem>>, %arg3: memref<1x128xf32, #tpu.memory_space<vmem>>, %arg4: memref<80x128xbf16, #tpu.memory_space<vmem>>) attributes {dimension_semantics = [#tpu.dimension_semantics<parallel>], iteration_bounds = array<i64: 1>, scalar_prefetch = 0 : i64, scratch_operands = 0 : i64, tpu.core_type = #tpu.core_type<tc>, window_params = [{transform_indices = @transform_0, window_bounds = array<i64: 80, 900>}, {pipeline_mode = #tpu.pipeline_mode<synchronous>, transform_indices = @transform_1, window_bounds = array<i64: 900, 128>}, {pipeline_mode = #tpu.pipeline_mode<synchronous>, transform_indices = @transform_2, window_bounds = array<i64: 1, 128>}, {transform_indices = @transform_3, window_bounds = array<i64: 80, 128>}]} {
    %c0 = arith.constant 0 : index
    %c0_0 = arith.constant 0 : index
    %0 = vector.load %arg1[%c0, %c0_0] : memref<80x900xbf16, #tpu.memory_space<vmem>>, vector<80x900xbf16>
    %c0_1 = arith.constant 0 : index
    %c0_2 = arith.constant 0 : index
    %1 = vector.load %arg2[%c0_1, %c0_2] : memref<900x128xbf16, #tpu.memory_space<vmem>>, vector<900x128xbf16>
    %cst = arith.constant dense<0.000000e+00> : vector<80x128xf32>
    %2 = tpu.matmul %0, %1, %cst {dimension_numbers = #tpu.dot_dimension_numbers<[1], [0], [0], [1], [0, 0, 1, 1], [], []>} : vector<80x900xbf16>, vector<900x128xbf16>, vector<80x128xf32> -> vector<80x128xf32>
    %c0_3 = arith.constant 0 : index
    %c0_4 = arith.constant 0 : index
    %3 = vector.load %arg3[%c0_3, %c0_4] : memref<1x128xf32, #tpu.memory_space<vmem>>, vector<1x128xf32>
    %4 = vector.broadcast %3 : vector<1x128xf32> to vector<80x128xf32>
    %5 = arith.addf %2, %4 : vector<80x128xf32>
    %cst_5 = arith.constant 0.000000e+00 : f32
    %6 = vector.broadcast %cst_5 : f32 to vector<80x128xf32>
    %7 = arith.maximumf %5, %6 : vector<80x128xf32>
    %8 = arith.truncf %7 : vector<80x128xf32> to vector<80x128xbf16>
    %c0_6 = arith.constant 0 : index
    %c0_7 = arith.constant 0 : index
    %9 = vector.load %arg4[%c0_6, %c0_7] : memref<80x128xbf16, #tpu.memory_space<vmem>>, vector<80x128xbf16>
    tpu.vector_store %arg4[%c0_6, %c0_7], %8 {strides = array<i32>} : memref<80x128xbf16, #tpu.memory_space<vmem>>, vector<80x128xbf16>,
    return
  }
  func.func @transform_0(%arg0: i32) -> (i32, i32) {
    %c0_i32 = arith.constant 0 : i32
    %c0_i32_0 = arith.constant 0 : i32
    return %arg0, %c0_i32 : i32, i32
  }
  func.func @transform_1(%arg0: i32) -> (i32, i32) {
    %c0_i32 = arith.constant 0 : i32
    %c0_i32_0 = arith.constant 0 : i32
    %c0_i32_1 = arith.constant 0 : i32
    return %c0_i32, %c0_i32_0 : i32, i32
  }
  func.func @transform_2(%arg0: i32) -> (i32, i32) {
    %c0_i32 = arith.constant 0 : i32
    %c0_i32_0 = arith.constant 0 : i32
    %c0_i32_1 = arith.constant 0 : i32
    return %c0_i32, %c0_i32_0 : i32, i32
  }
  func.func @transform_3(%arg0: i32) -> (i32, i32) {
    %c0_i32 = arith.constant 0 : i32
    %c0_i32_0 = arith.constant 0 : i32
    return %arg0, %c0_i32 : i32, i32
  }
}

module attributes {stable_mosaic.version = 11 : i64} {
  func.func @_matmul_bias_act_kernel(%arg0: i32, %arg1: memref<32x432xbf16, #tpu.memory_space<vmem>>, %arg2: memref<432x128xbf16, #tpu.memory_space<vmem>>, %arg3: memref<1x128xf32, #tpu.memory_space<vmem>>, %arg4: memref<32x128xbf16, #tpu.memory_space<vmem>>) attributes {dimension_semantics = [#tpu.dimension_semantics<parallel>], iteration_bounds = array<i64: 1>, scalar_prefetch = 0 : i64, scratch_operands = 0 : i64, tpu.core_type = #tpu.core_type<tc>, window_params = [{transform_indices = @transform_0, window_bounds = array<i64: 32, 432>}, {pipeline_mode = #tpu.pipeline_mode<synchronous>, transform_indices = @transform_1, window_bounds = array<i64: 432, 128>}, {pipeline_mode = #tpu.pipeline_mode<synchronous>, transform_indices = @transform_2, window_bounds = array<i64: 1, 128>}, {transform_indices = @transform_3, window_bounds = array<i64: 32, 128>}]} {
    %c0 = arith.constant 0 : index
    %c0_0 = arith.constant 0 : index
    %0 = vector.load %arg1[%c0, %c0_0] : memref<32x432xbf16, #tpu.memory_space<vmem>>, vector<32x432xbf16>
    %c0_1 = arith.constant 0 : index
    %c0_2 = arith.constant 0 : index
    %1 = vector.load %arg2[%c0_1, %c0_2] : memref<432x128xbf16, #tpu.memory_space<vmem>>, vector<432x128xbf16>
    %cst = arith.constant dense<0.000000e+00> : vector<32x128xf32>
    %2 = tpu.matmul %0, %1, %cst {dimension_numbers = #tpu.dot_dimension_numbers<[1], [0], [0], [1], [0, 0, 1, 1], [], []>} : vector<32x432xbf16>, vector<432x128xbf16>, vector<32x128xf32> -> vector<32x128xf32>
    %c0_3 = arith.constant 0 : index
    %c0_4 = arith.constant 0 : index
    %3 = vector.load %arg3[%c0_3, %c0_4] : memref<1x128xf32, #tpu.memory_space<vmem>>, vector<1x128xf32>
    %4 = vector.broadcast %3 : vector<1x128xf32> to vector<32x128xf32>
    %5 = arith.addf %2, %4 : vector<32x128xf32>
    %cst_5 = arith.constant 0.000000e+00 : f32
    %6 = vector.broadcast %cst_5 : f32 to vector<32x128xf32>
    %7 = arith.maximumf %5, %6 : vector<32x128xf32>
    %8 = arith.truncf %7 : vector<32x128xf32> to vector<32x128xbf16>
    %c0_6 = arith.constant 0 : index
    %c0_7 = arith.constant 0 : index
    %9 = vector.load %arg4[%c0_6, %c0_7] : memref<32x128xbf16, #tpu.memory_space<vmem>>, vector<32x128xbf16>
    tpu.vector_store %arg4[%c0_6, %c0_7], %8 {strides = array<i32>} : memref<32x128xbf16, #tpu.memory_space<vmem>>, vector<32x128xbf16>,
    return
  }
  func.func @transform_0(%arg0: i32) -> (i32, i32) {
    %c0_i32 = arith.constant 0 : i32
    %c0_i32_0 = arith.constant 0 : i32
    return %arg0, %c0_i32 : i32, i32
  }
  func.func @transform_1(%arg0: i32) -> (i32, i32) {
    %c0_i32 = arith.constant 0 : i32
    %c0_i32_0 = arith.constant 0 : i32
    %c0_i32_1 = arith.constant 0 : i32
    return %c0_i32, %c0_i32_0 : i32, i32
  }
  func.func @transform_2(%arg0: i32) -> (i32, i32) {
    %c0_i32 = arith.constant 0 : i32
    %c0_i32_0 = arith.constant 0 : i32
    %c0_i32_1 = arith.constant 0 : i32
    return %c0_i32, %c0_i32_0 : i32, i32
  }
  func.func @transform_3(%arg0: i32) -> (i32, i32) {
    %c0_i32 = arith.constant 0 : i32
    %c0_i32_0 = arith.constant 0 : i32
    return %arg0, %c0_i32 : i32, i32
  }
}

module attributes {stable_mosaic.version = 11 : i64} {
  func.func @_matmul_bias_act_kernel(%arg0: i32, %arg1: memref<16x576xbf16, #tpu.memory_space<vmem>>, %arg2: memref<576x128xbf16, #tpu.memory_space<vmem>>, %arg3: memref<1x128xf32, #tpu.memory_space<vmem>>, %arg4: memref<16x128xbf16, #tpu.memory_space<vmem>>) attributes {dimension_semantics = [#tpu.dimension_semantics<parallel>], iteration_bounds = array<i64: 1>, scalar_prefetch = 0 : i64, scratch_operands = 0 : i64, tpu.core_type = #tpu.core_type<tc>, window_params = [{transform_indices = @transform_0, window_bounds = array<i64: 16, 576>}, {pipeline_mode = #tpu.pipeline_mode<synchronous>, transform_indices = @transform_1, window_bounds = array<i64: 576, 128>}, {pipeline_mode = #tpu.pipeline_mode<synchronous>, transform_indices = @transform_2, window_bounds = array<i64: 1, 128>}, {transform_indices = @transform_3, window_bounds = array<i64: 16, 128>}]} {
    %c0 = arith.constant 0 : index
    %c0_0 = arith.constant 0 : index
    %0 = vector.load %arg1[%c0, %c0_0] : memref<16x576xbf16, #tpu.memory_space<vmem>>, vector<16x576xbf16>
    %c0_1 = arith.constant 0 : index
    %c0_2 = arith.constant 0 : index
    %1 = vector.load %arg2[%c0_1, %c0_2] : memref<576x128xbf16, #tpu.memory_space<vmem>>, vector<576x128xbf16>
    %cst = arith.constant dense<0.000000e+00> : vector<16x128xf32>
    %2 = tpu.matmul %0, %1, %cst {dimension_numbers = #tpu.dot_dimension_numbers<[1], [0], [0], [1], [0, 0, 1, 1], [], []>} : vector<16x576xbf16>, vector<576x128xbf16>, vector<16x128xf32> -> vector<16x128xf32>
    %c0_3 = arith.constant 0 : index
    %c0_4 = arith.constant 0 : index
    %3 = vector.load %arg3[%c0_3, %c0_4] : memref<1x128xf32, #tpu.memory_space<vmem>>, vector<1x128xf32>
    %4 = vector.broadcast %3 : vector<1x128xf32> to vector<16x128xf32>
    %5 = arith.addf %2, %4 : vector<16x128xf32>
    %cst_5 = arith.constant 0.000000e+00 : f32
    %6 = vector.broadcast %cst_5 : f32 to vector<16x128xf32>
    %7 = arith.maximumf %5, %6 : vector<16x128xf32>
    %8 = arith.truncf %7 : vector<16x128xf32> to vector<16x128xbf16>
    %c0_6 = arith.constant 0 : index
    %c0_7 = arith.constant 0 : index
    %9 = vector.load %arg4[%c0_6, %c0_7] : memref<16x128xbf16, #tpu.memory_space<vmem>>, vector<16x128xbf16>
    tpu.vector_store %arg4[%c0_6, %c0_7], %8 {strides = array<i32>} : memref<16x128xbf16, #tpu.memory_space<vmem>>, vector<16x128xbf16>,
    return
  }
  func.func @transform_0(%arg0: i32) -> (i32, i32) {
    %c0_i32 = arith.constant 0 : i32
    %c0_i32_0 = arith.constant 0 : i32
    return %arg0, %c0_i32 : i32, i32
  }
  func.func @transform_1(%arg0: i32) -> (i32, i32) {
    %c0_i32 = arith.constant 0 : i32
    %c0_i32_0 = arith.constant 0 : i32
    %c0_i32_1 = arith.constant 0 : i32
    return %c0_i32, %c0_i32_0 : i32, i32
  }
  func.func @transform_2(%arg0: i32) -> (i32, i32) {
    %c0_i32 = arith.constant 0 : i32
    %c0_i32_0 = arith.constant 0 : i32
    %c0_i32_1 = arith.constant 0 : i32
    return %c0_i32, %c0_i32_0 : i32, i32
  }
  func.func @transform_3(%arg0: i32) -> (i32, i32) {
    %c0_i32 = arith.constant 0 : i32
    %c0_i32_0 = arith.constant 0 : i32
    return %arg0, %c0_i32 : i32, i32
  }
}

module attributes {stable_mosaic.version = 11 : i64} {
  func.func @_fused_fc_kernel(%arg0: i32, %arg1: memref<16x256xbf16, #tpu.memory_space<vmem>>, %arg2: memref<256x1280xbf16, #tpu.memory_space<vmem>>, %arg3: memref<1x1280xf32, #tpu.memory_space<vmem>>, %arg4: memref<1280x128xbf16, #tpu.memory_space<vmem>>, %arg5: memref<1x128xf32, #tpu.memory_space<vmem>>, %arg6: memref<128x128xbf16, #tpu.memory_space<vmem>>, %arg7: memref<1x128xf32, #tpu.memory_space<vmem>>, %arg8: memref<128x128xbf16, #tpu.memory_space<vmem>>, %arg9: memref<1x128xf32, #tpu.memory_space<vmem>>, %arg10: memref<128x128xbf16, #tpu.memory_space<vmem>>, %arg11: memref<1x128xf32, #tpu.memory_space<vmem>>, %arg12: memref<16x128xf32, #tpu.memory_space<vmem>>) attributes {dimension_semantics = [#tpu.dimension_semantics<parallel>], iteration_bounds = array<i64: 1>, scalar_prefetch = 0 : i64, scratch_operands = 0 : i64, tpu.core_type = #tpu.core_type<tc>, window_params = [{transform_indices = @transform_0, window_bounds = array<i64: 16, 256>}, {pipeline_mode = #tpu.pipeline_mode<synchronous>, transform_indices = @transform_1, window_bounds = array<i64: 256, 1280>}, {pipeline_mode = #tpu.pipeline_mode<synchronous>, transform_indices = @transform_2, window_bounds = array<i64: 1, 1280>}, {pipeline_mode = #tpu.pipeline_mode<synchronous>, transform_indices = @transform_3, window_bounds = array<i64: 1280, 128>}, {pipeline_mode = #tpu.pipeline_mode<synchronous>, transform_indices = @transform_4, window_bounds = array<i64: 1, 128>}, {pipeline_mode = #tpu.pipeline_mode<synchronous>, transform_indices = @transform_5, window_bounds = array<i64: 128, 128>}, {pipeline_mode = #tpu.pipeline_mode<synchronous>, transform_indices = @transform_6, window_bounds = array<i64: 1, 128>}, {pipeline_mode = #tpu.pipeline_mode<synchronous>, transform_indices = @transform_7, window_bounds = array<i64: 128, 128>}, {pipeline_mode = #tpu.pipeline_mode<synchronous>, transform_indices = @transform_8, window_bounds = array<i64: 1, 128>}, {pipeline_mode = #tpu.pipeline_mode<synchronous>, transform_indices = @transform_9, window_bounds = array<i64: 128, 128>}, {pipeline_mode = #tpu.pipeline_mode<synchronous>, transform_indices = @transform_10, window_bounds = array<i64: 1, 128>}, {transform_indices = @transform_11, window_bounds = array<i64: 16, 128>}]} {
    %c0 = arith.constant 0 : index
    %c0_0 = arith.constant 0 : index
    %0 = vector.load %arg1[%c0, %c0_0] : memref<16x256xbf16, #tpu.memory_space<vmem>>, vector<16x256xbf16>
    %c0_1 = arith.constant 0 : index
    %c0_2 = arith.constant 0 : index
    %1 = vector.load %arg2[%c0_1, %c0_2] : memref<256x1280xbf16, #tpu.memory_space<vmem>>, vector<256x1280xbf16>
    %cst = arith.constant dense<0.000000e+00> : vector<16x1280xf32>
    %2 = tpu.matmul %0, %1, %cst {dimension_numbers = #tpu.dot_dimension_numbers<[1], [0], [0], [1], [0, 0, 1, 1], [], []>} : vector<16x256xbf16>, vector<256x1280xbf16>, vector<16x1280xf32> -> vector<16x1280xf32>
    %c0_3 = arith.constant 0 : index
    %c0_4 = arith.constant 0 : index
    %3 = vector.load %arg3[%c0_3, %c0_4] : memref<1x1280xf32, #tpu.memory_space<vmem>>, vector<1x1280xf32>
    %4 = vector.broadcast %3 : vector<1x1280xf32> to vector<16x1280xf32>
    %5 = arith.addf %2, %4 : vector<16x1280xf32>
    %cst_5 = arith.constant 0.000000e+00 : f32
    %6 = vector.broadcast %cst_5 : f32 to vector<16x1280xf32>
    %7 = arith.maximumf %5, %6 : vector<16x1280xf32>
    %8 = arith.truncf %7 : vector<16x1280xf32> to vector<16x1280xbf16>
    %c0_6 = arith.constant 0 : index
    %c0_7 = arith.constant 0 : index
    %9 = vector.load %arg4[%c0_6, %c0_7] : memref<1280x128xbf16, #tpu.memory_space<vmem>>, vector<1280x128xbf16>
    %cst_8 = arith.constant dense<0.000000e+00> : vector<16x128xf32>
    %10 = tpu.matmul %8, %9, %cst_8 {dimension_numbers = #tpu.dot_dimension_numbers<[1], [0], [0], [1], [0, 0, 1, 1], [], []>} : vector<16x1280xbf16>, vector<1280x128xbf16>, vector<16x128xf32> -> vector<16x128xf32>
    %c0_9 = arith.constant 0 : index
    %c0_10 = arith.constant 0 : index
    %11 = vector.load %arg5[%c0_9, %c0_10] : memref<1x128xf32, #tpu.memory_space<vmem>>, vector<1x128xf32>
    %12 = vector.broadcast %11 : vector<1x128xf32> to vector<16x128xf32>
    %13 = arith.addf %10, %12 : vector<16x128xf32>
    %cst_11 = arith.constant 0.000000e+00 : f32
    %14 = vector.broadcast %cst_11 : f32 to vector<16x128xf32>
    %15 = arith.maximumf %13, %14 : vector<16x128xf32>
    %16 = arith.truncf %15 : vector<16x128xf32> to vector<16x128xbf16>
    %c0_12 = arith.constant 0 : index
    %c0_13 = arith.constant 0 : index
    %17 = vector.load %arg6[%c0_12, %c0_13] : memref<128x128xbf16, #tpu.memory_space<vmem>>, vector<128x128xbf16>
    %cst_14 = arith.constant dense<0.000000e+00> : vector<16x128xf32>
    %18 = tpu.matmul %16, %17, %cst_14 {dimension_numbers = #tpu.dot_dimension_numbers<[1], [0], [0], [1], [0, 0, 1, 1], [], []>} : vector<16x128xbf16>, vector<128x128xbf16>, vector<16x128xf32> -> vector<16x128xf32>
    %c0_15 = arith.constant 0 : index
    %c0_16 = arith.constant 0 : index
    %19 = vector.load %arg7[%c0_15, %c0_16] : memref<1x128xf32, #tpu.memory_space<vmem>>, vector<1x128xf32>
    %20 = vector.broadcast %19 : vector<1x128xf32> to vector<16x128xf32>
    %21 = arith.addf %18, %20 : vector<16x128xf32>
    %cst_17 = arith.constant 0.000000e+00 : f32
    %22 = vector.broadcast %cst_17 : f32 to vector<16x128xf32>
    %23 = arith.maximumf %21, %22 : vector<16x128xf32>
    %24 = arith.truncf %23 : vector<16x128xf32> to vector<16x128xbf16>
    %c0_18 = arith.constant 0 : index
    %c0_19 = arith.constant 0 : index
    %25 = vector.load %arg8[%c0_18, %c0_19] : memref<128x128xbf16, #tpu.memory_space<vmem>>, vector<128x128xbf16>
    %cst_20 = arith.constant dense<0.000000e+00> : vector<16x128xf32>
    %26 = tpu.matmul %24, %25, %cst_20 {dimension_numbers = #tpu.dot_dimension_numbers<[1], [0], [0], [1], [0, 0, 1, 1], [], []>} : vector<16x128xbf16>, vector<128x128xbf16>, vector<16x128xf32> -> vector<16x128xf32>
    %c0_21 = arith.constant 0 : index
    %c0_22 = arith.constant 0 : index
    %27 = vector.load %arg9[%c0_21, %c0_22] : memref<1x128xf32, #tpu.memory_space<vmem>>, vector<1x128xf32>
    %28 = vector.broadcast %27 : vector<1x128xf32> to vector<16x128xf32>
    %29 = arith.addf %26, %28 : vector<16x128xf32>
    %cst_23 = arith.constant 0.000000e+00 : f32
    %30 = vector.broadcast %cst_23 : f32 to vector<16x128xf32>
    %31 = arith.maximumf %29, %30 : vector<16x128xf32>
    %32 = arith.truncf %31 : vector<16x128xf32> to vector<16x128xbf16>
    %c0_24 = arith.constant 0 : index
    %c0_25 = arith.constant 0 : index
    %33 = vector.load %arg10[%c0_24, %c0_25] : memref<128x128xbf16, #tpu.memory_space<vmem>>, vector<128x128xbf16>
    %cst_26 = arith.constant dense<0.000000e+00> : vector<16x128xf32>
    %34 = tpu.matmul %32, %33, %cst_26 {dimension_numbers = #tpu.dot_dimension_numbers<[1], [0], [0], [1], [0, 0, 1, 1], [], []>} : vector<16x128xbf16>, vector<128x128xbf16>, vector<16x128xf32> -> vector<16x128xf32>
    %c0_27 = arith.constant 0 : index
    %c0_28 = arith.constant 0 : index
    %35 = vector.load %arg11[%c0_27, %c0_28] : memref<1x128xf32, #tpu.memory_space<vmem>>, vector<1x128xf32>
    %36 = vector.broadcast %35 : vector<1x128xf32> to vector<16x128xf32>
    %37 = arith.addf %34, %36 : vector<16x128xf32>
    %c0_29 = arith.constant 0 : index
    %c0_30 = arith.constant 0 : index
    %38 = vector.load %arg12[%c0_29, %c0_30] : memref<16x128xf32, #tpu.memory_space<vmem>>, vector<16x128xf32>
    tpu.vector_store %arg12[%c0_29, %c0_30], %37 {strides = array<i32>} : memref<16x128xf32, #tpu.memory_space<vmem>>, vector<16x128xf32>,
    return
  }
  func.func @transform_0(%arg0: i32) -> (i32, i32) {
    %c0_i32 = arith.constant 0 : i32
    %c0_i32_0 = arith.constant 0 : i32
    return %arg0, %c0_i32 : i32, i32
  }
  func.func @transform_1(%arg0: i32) -> (i32, i32) {
    %c0_i32 = arith.constant 0 : i32
    %c0_i32_0 = arith.constant 0 : i32
    %c0_i32_1 = arith.constant 0 : i32
    return %c0_i32, %c0_i32_0 : i32, i32
  }
  func.func @transform_2(%arg0: i32) -> (i32, i32) {
    %c0_i32 = arith.constant 0 : i32
    %c0_i32_0 = arith.constant 0 : i32
    %c0_i32_1 = arith.constant 0 : i32
    return %c0_i32, %c0_i32_0 : i32, i32
  }
  func.func @transform_3(%arg0: i32) -> (i32, i32) {
    %c0_i32 = arith.constant 0 : i32
    %c0_i32_0 = arith.constant 0 : i32
    %c0_i32_1 = arith.constant 0 : i32
    return %c0_i32, %c0_i32_0 : i32, i32
  }
  func.func @transform_4(%arg0: i32) -> (i32, i32) {
    %c0_i32 = arith.constant 0 : i32
    %c0_i32_0 = arith.constant 0 : i32
    %c0_i32_1 = arith.constant 0 : i32
    return %c0_i32, %c0_i32_0 : i32, i32
  }
  func.func @transform_5(%arg0: i32) -> (i32, i32) {
    %c0_i32 = arith.constant 0 : i32
    %c0_i32_0 = arith.constant 0 : i32
    %c0_i32_1 = arith.constant 0 : i32
    return %c0_i32, %c0_i32_0 : i32, i32
  }
  func.func @transform_6(%arg0: i32) -> (i32, i32) {
    %c0_i32 = arith.constant 0 : i32
    %c0_i32_0 = arith.constant 0 : i32
    %c0_i32_1 = arith.constant 0 : i32
    return %c0_i32, %c0_i32_0 : i32, i32
  }
  func.func @transform_7(%arg0: i32) -> (i32, i32) {
    %c0_i32 = arith.constant 0 : i32
    %c0_i32_0 = arith.constant 0 : i32
    %c0_i32_1 = arith.constant 0 : i32
    return %c0_i32, %c0_i32_0 : i32, i32
  }
  func.func @transform_8(%arg0: i32) -> (i32, i32) {
    %c0_i32 = arith.constant 0 : i32
    %c0_i32_0 = arith.constant 0 : i32
    %c0_i32_1 = arith.constant 0 : i32
    return %c0_i32, %c0_i32_0 : i32, i32
  }
  func.func @transform_9(%arg0: i32) -> (i32, i32) {
    %c0_i32 = arith.constant 0 : i32
    %c0_i32_0 = arith.constant 0 : i32
    %c0_i32_1 = arith.constant 0 : i32
    return %c0_i32, %c0_i32_0 : i32, i32
  }
  func.func @transform_10(%arg0: i32) -> (i32, i32) {
    %c0_i32 = arith.constant 0 : i32
    %c0_i32_0 = arith.constant 0 : i32
    %c0_i32_1 = arith.constant 0 : i32
    return %c0_i32, %c0_i32_0 : i32, i32
  }
  func.func @transform_11(%arg0: i32) -> (i32, i32) {
    %c0_i32 = arith.constant 0 : i32
    %c0_i32_0 = arith.constant 0 : i32
    return %arg0, %c0_i32 : i32, i32
  }
}

</mosaic_0001>

<bundles_post_ra>
// kernel: dave_forward.6
= control target key start
LH: loop header
LB: loop body
LE: loop exit
PB: predicated region body
PF: predicated region fallthrough
CT: control target
= control target key end

     0   :  { %s1874_s12 = smov 0   ;;  %s2082_s0 = inlined_call_operand.vmem [shape: bf16[2560,75], index: 0, kind: input, shape index: {}]   ;;  %s2083_s1 = inlined_call_operand.vmem [shape: bf16[75,128], index: 1, kind: input, shape index: {}]   ;;  %s2084_s2 = inlined_call_operand.vmem [shape: f32[1,128], index: 2, kind: input, shape index: {}]   ;;  %s2085_s3 = inlined_call_operand.vmem [shape: bf16[2560,128], index: 3, kind: output, shape index: {}]  }
   0x1 LB: > { %s1278_s13 = sadd.s32 4294967295, %s1851_s12   ;;  %p1282_p0 = scmp.ge.s32.totalorder %s1851_s12, 1  ;;  %s1851_s12 = sphi %s1874_s12, %s13_s12  }
   0x2   : > { %p138_p1 = scmp.lt.s32.totalorder %s1851_s12, 6 }
   0x4   : > { %p139_p2 = pnand %p1282_p0, %p138_p1 }
   0x5   : > { %v1808_v0 = vld [vmem:[%s2083_s1] sm:$0xff] (!%p139_p2)   ;;  %v1809_v1 = vld [vmem:[%s2083_s1 + $0x8] sm:$0xff] (!%p139_p2)   ;;  %vm542_vm0 = vcmask (!%p139_p2), 1044480   ;;  %v1810_v2 = vld [vmem:[%s2083_s1 + $0x10] sm:$0xff] (!%p139_p2)   ;;  %s1283_s20 = sshll.u32 (!%p139_p2), %s1278_s13, 6  ;;  %vm543_vm1 = vcmask (!%p139_p2), 1045504  }
   0x6   : > { %142 = sbr.rel (%p139_p2) target bundleno = 304 (0x130), region = 32  ;;  %1715 = vmatprep.subr.bf16.mxu0 (!%p139_p2), %v1808_v0  ;;  %1789 = vmatprep.subr.bf16.mxu1 (!%p139_p2), %v1808_v0  ;;  %v1853_v3 = vmov (!%p139_p2), 65535   ;;  %p163_p3 = scmp.lt.s32.totalorder (!%p139_p2), %s1283_s20, 319  ;;  %v1811_v5 = vld [vmem:[%s2083_s1 + $0x18] sm:$0xff] (!%p139_p2)   ;;  %v1812_v6 = vld [vmem:[%s2083_s1 + $0x20] sm:$0x3f] (!%p139_p2)  }
   0x7   : > { %1716 = vmatpush3.bf16.msra.mxu0 (!%p139_p2), %v1808_v0  ;;  %1794 = vmatpush3.bf16.msra.mxu1 (!%p139_p2), %v1808_v0  ;;  %v544_v4 = vsel (!%p139_p2), %vm542_vm0, 4294967295, %v1853_v3  ;;  %vm445_vm2 = vcmask (!%p139_p2), 613376   ;;  %v1974_v41 = vld [vmem:[%s2084_s2] ss:$0 sm:$0xff] (!%p139_p2) }
   0x8   : > { %1717 = vmatprep.subr.bf16.mxu0 (!%p139_p2), %v1809_v1  ;;  %1790 = vmatprep.subr.bf16.mxu1 (!%p139_p2), %v1809_v1  ;;  %v545_v7 = vsel (!%p139_p2), %vm543_vm1, %v544_v4, 0 }
   0x9   : > { %v547_v8 = vand.u32 (!%p139_p2), %v1812_v6, %v545_v7 }
   0xb   : > { %1718 = vmatpush3.bf16.msra.mxu0 (!%p139_p2), %v1809_v1  ;;  %1795 = vmatpush3.bf16.msra.mxu1 (!%p139_p2), %v1809_v1 }
   0xc   : > { %1719 = vmatprep.subr.bf16.mxu0 (!%p139_p2), %v1810_v2  ;;  %1791 = vmatprep.subr.bf16.mxu1 (!%p139_p2), %v1810_v2 }
   0xd   : > { %s2087_s20 = smov (!%p163_p3, %s1283_s20), 319 }
   0xe   : > { %s1284_s25 = sshll.u32 %s2087_s20, 2 }
   0xf   : > { %1720 = vmatpush3.bf16.msra.mxu0 %v1810_v2  ;;  %1796 = vmatpush3.bf16.msra.mxu1 %v1810_v2  ;;  %s1905_s28 = scalar_lea.vmem %s2082_s0, %s1284_s25  ;;  %s1989_s6 = scalar_lea.vmem %s2085_s3, %s1284_s25 }
  0x10   : > { %1721 = vmatprep.subr.bf16.mxu0 %v1811_v5  ;;  %1792 = vmatprep.subr.bf16.mxu1 %v1811_v5  ;;  %v1813_v9 = vld [vmem:[%s1905_s28] sm:$0xff]   ;;  %v1815_v11 = vld [vmem:[%s1905_s28 + $0x8] sm:$0xff]   ;;  %v1817_v13 = vld [vmem:[%s1905_s28 + $0x10] sm:$0xff]  }
  0x11   : > { %v1814_v10 = vld [vmem:[%s1905_s28 + $0x80] sm:$0xff]   ;;  %1725 = vmatprep.mubr.msk.bf16.mxu0 %vm445_vm2, %v1813_v9  ;;  %v1816_v12 = vld [vmem:[%s1905_s28 + $0x88] sm:$0xff]   ;;  %v1818_v14 = vld [vmem:[%s1905_s28 + $0x90] sm:$0xff]  }
  0x12   : > { %1757 = vmatprep.mubr.msk.bf16.mxu1 %vm445_vm2, %v1814_v10  ;;  %v1819_v15 = vld [vmem:[%s1905_s28 + $0x18] sm:$0xff]   ;;  %v1821_v17 = vld [vmem:[%s1905_s28 + $0x20] sm:$0xff]   ;;  %v1823_v19 = vld [vmem:[%s1905_s28 + $0x28] sm:$0xff]  }
  0x13   : > { %1722 = vmatpush3.bf16.msra.mxu0 %v1811_v5  ;;  %1797 = vmatpush3.bf16.msra.mxu1 %v1811_v5  ;;  %v1820_v16 = vld [vmem:[%s1905_s28 + $0x98] sm:$0xff]   ;;  %v1822_v18 = vld [vmem:[%s1905_s28 + $0xa0] sm:$0xff]   ;;  %v1824_v20 = vld [vmem:[%s1905_s28 + $0xa8] sm:$0xff]  }
  0x14   : > { %1723 = vmatprep.subr.bf16.mxu0 %v547_v8  ;;  %1793 = vmatprep.subr.bf16.mxu1 %v547_v8  ;;  %v1825_v21 = vld [vmem:[%s1905_s28 + $0x30] sm:$0xff]   ;;  %v1827_v23 = vld [vmem:[%s1905_s28 + $0x38] sm:$0xff]   ;;  %v1829_v25 = vld [vmem:[%s1905_s28 + $0x40] sm:$0xff]  }
  0x15   : > { %v1826_v22 = vld [vmem:[%s1905_s28 + $0xb0] sm:$0xff]   ;;  %v1828_v24 = vld [vmem:[%s1905_s28 + $0xb8] sm:$0xff]   ;;  %v1830_v26 = vld [vmem:[%s1905_s28 + $0xc0] sm:$0xff]  }
  0x16   : > { %v1831_v27 = vld [vmem:[%s1905_s28 + $0x48] sm:$0xff]   ;;  %v1833_v29 = vld [vmem:[%s1905_s28 + $0x50] sm:$0xff]   ;;  %v1835_v31 = vld [vmem:[%s1905_s28 + $0x58] sm:$0xff]  }
  0x17   : > { %1724 = vmatpush3.bf16.msra.mxu0 %v547_v8  ;;  %1798 = vmatpush3.bf16.msra.mxu1 %v547_v8  ;;  %v1832_v28 = vld [vmem:[%s1905_s28 + $0xc8] sm:$0xff]   ;;  %v1834_v30 = vld [vmem:[%s1905_s28 + $0xd0] sm:$0xff]   ;;  %v1836_v32 = vld [vmem:[%s1905_s28 + $0xd8] sm:$0xff]  }
  0x18   : > { %v1837_v33 = vld [vmem:[%s1905_s28 + $0x60] sm:$0xff]   ;;  %v1839_v35 = vld [vmem:[%s1905_s28 + $0x68] sm:$0xff]   ;;  %v1841_v37 = vld [vmem:[%s1905_s28 + $0x70] sm:$0xff]  }
  0x19   : > { %v1838_v34 = vld [vmem:[%s1905_s28 + $0xe0] sm:$0xff]   ;;  %v1840_v36 = vld [vmem:[%s1905_s28 + $0xe8] sm:$0xff]   ;;  %v1842_v38 = vld [vmem:[%s1905_s28 + $0xf0] sm:$0xff]  }
  0x1a   : > { %1726 = vmatmul.mubr.msk.bf16.vlgmr.msra.gmra.mrb[0].mxu0 %vm445_vm2, %v1815_v11  ;;  %1758 = vmatmul.mubr.msk.bf16.vlgmr.msra.gmra.mrb[0].mxu1 %vm445_vm2, %v1816_v12  ;;  %v1843_v39 = vld [vmem:[%s1905_s28 + $0x78] sm:$0xff]  }
  0x1b   : > { %1729 = vmatprep.mubr.msk.bf16.mxu0 %vm445_vm2, %v1817_v13  ;;  %1761 = vmatprep.mubr.msk.bf16.mxu1 %vm445_vm2, %v1818_v14  ;;  %v1844_v40 = vld [vmem:[%s1905_s28 + $0xf8] sm:$0xff]  }
  0x22   : > { %1730 = vmatmul.mubr.msk.bf16.gmra.mrb[4].mxu0 %vm445_vm2, %v1819_v15  ;;  %1762 = vmatmul.mubr.msk.bf16.gmra.mrb[4].mxu1 %vm445_vm2, %v1820_v16 }
  0x23   : > { %1733 = vmatprep.mubr.msk.bf16.mxu0 %vm445_vm2, %v1821_v17  ;;  %1765 = vmatprep.mubr.msk.bf16.mxu1 %vm445_vm2, %v1822_v18 }
  0x2a   : > { %1734 = vmatmul.mubr.msk.bf16.gmra.mrb[8].mxu0 %vm445_vm2, %v1823_v19  ;;  %1766 = vmatmul.mubr.msk.bf16.gmra.mrb[8].mxu1 %vm445_vm2, %v1824_v20 }
  0x2b   : > { %1737 = vmatprep.mubr.msk.bf16.mxu0 %vm445_vm2, %v1825_v21  ;;  %1769 = vmatprep.mubr.msk.bf16.mxu1 %vm445_vm2, %v1826_v22 }
  0x32   : > { %1738 = vmatmul.mubr.msk.bf16.gmra.mrb[12].mxu0 %vm445_vm2, %v1827_v23  ;;  %1770 = vmatmul.mubr.msk.bf16.gmra.mrb[12].mxu1 %vm445_vm2, %v1828_v24 }
  0x33   : > { %1741 = vmatprep.mubr.msk.bf16.mxu0 %vm445_vm2, %v1829_v25  ;;  %1773 = vmatprep.mubr.msk.bf16.mxu1 %vm445_vm2, %v1830_v26 }
  0x3a   : > { %1742 = vmatmul.mubr.msk.bf16.gmra.mrb[16].mxu0 %vm445_vm2, %v1831_v27  ;;  %1774 = vmatmul.mubr.msk.bf16.gmra.mrb[16].mxu1 %vm445_vm2, %v1832_v28 }
  0x3b   : > { %1745 = vmatprep.mubr.msk.bf16.mxu0 %vm445_vm2, %v1833_v29  ;;  %1777 = vmatprep.mubr.msk.bf16.mxu1 %vm445_vm2, %v1834_v30 }
  0x42   : > { %1746 = vmatmul.mubr.msk.bf16.gmra.mrb[20].mxu0 %vm445_vm2, %v1835_v31  ;;  %1778 = vmatmul.mubr.msk.bf16.gmra.mrb[20].mxu1 %vm445_vm2, %v1836_v32 }
  0x43   : > { %1749 = vmatprep.mubr.msk.bf16.mxu0 %vm445_vm2, %v1837_v33  ;;  %1781 = vmatprep.mubr.msk.bf16.mxu1 %vm445_vm2, %v1838_v34 }
  0x4a   : > { %1750 = vmatmul.mubr.msk.bf16.gmra.mrb[24].mxu0 %vm445_vm2, %v1839_v35  ;;  %1782 = vmatmul.mubr.msk.bf16.gmra.mrb[24].mxu1 %vm445_vm2, %v1840_v36 }
  0x4b   : > { %1753 = vmatprep.mubr.msk.bf16.mxu0 %vm445_vm2, %v1841_v37  ;;  %1785 = vmatprep.mubr.msk.bf16.mxu1 %vm445_vm2, %v1842_v38 }
  0x52   : > { %1754 = vmatmul.mubr.msk.bf16.gmra.mrb[28].mxu0 %vm445_vm2, %v1843_v39  ;;  %1786 = vmatmul.mubr.msk.bf16.gmra.mrb[28].mxu1 %vm445_vm2, %v1844_v40 }
  0xed   : > { %v1727_v42 = vpop.f32.mrb[0].mxu0  ;;  %v1759_v43 = vpop.f32.mrb[0].mxu1 }
  0xee   : > { %v592_v44 = vadd.f32 %v1727_v42, %v1974_v41  ;;  %v720_v45 = vadd.f32 %v1759_v43, %v1974_v41  ;;  %v583_v46 = vpop.f32.mrb[1].mxu0  ;;  %v711_v47 = vpop.f32.mrb[1].mxu1 }
  0xef   : > { %v584_v48 = vadd.f32 %v1974_v41, %v583_v46  ;;  %v712_v49 = vadd.f32 %v1974_v41, %v711_v47  ;;  %v1728_v50 = vpop.f32.mrb[2].mxu0  ;;  %v1760_v51 = vpop.f32.mrb[2].mxu1 }
  0xf0   : > { %v595_v52 = vadd.f32 %v1728_v50, %v1974_v41  ;;  %v723_v53 = vadd.f32 %v1760_v51, %v1974_v41  ;;  %v586_v54 = vpop.f32.mrb[3].mxu0  ;;  %v714_v55 = vpop.f32.mrb[3].mxu1  ;;  %v840_v58 = vmax.f32 %v592_v44, 0.0  ;;  %v872_v59 = vmax.f32 %v720_v45, 0.0 }
  0xf1   : > { %v587_v56 = vadd.f32 %v1974_v41, %v586_v54  ;;  %v715_v57 = vadd.f32 %v1974_v41, %v714_v55  ;;  %v838_v62 = vmax.f32 %v584_v48, 0.0  ;;  %v870_v63 = vmax.f32 %v712_v49, 0.0 }
  0xf2   : > { %v841_v60 = vmax.f32 %v595_v52, 0.0  ;;  %v873_v61 = vmax.f32 %v723_v53, 0.0 }
  0xf3   : > { %v839_v0 = vmax.f32 %v587_v56, 0.0  ;;  %v871_v1 = vmax.f32 %v715_v57, 0.0 }
  0xf4   : > { %v1495_v2 = vpack.c.bf16 %v841_v60, %v840_v58  ;;  %v1575_v3 = vpack.c.bf16 %v873_v61, %v872_v59 }
  0xf5   : > { %v1490_v4 = vpack.c.bf16 %v839_v0, %v838_v62  ;;  %v1570_v5 = vpack.c.bf16 %v871_v1, %v870_v63  ;;  %v1731_v6 = vpop.f32.mrb[4].mxu0  ;;  %v1763_v7 = vpop.f32.mrb[4].mxu1 }
  0xf6   : > { %1647 = vst [vmem:[%s1989_s6 + $0x8] sm:$0xff] %v1495_v2   ;;  %1663 = vst [vmem:[%s1989_s6 + $0x88] sm:$0xff] %v1575_v3   ;;  %v608_v8 = vadd.f32 %v1731_v6, %v1974_v41  ;;  %v736_v9 = vadd.f32 %v1763_v7, %v1974_v41  ;;  %v599_v10 = vpop.f32.mrb[5].mxu0  ;;  %v727_v11 = vpop.f32.mrb[5].mxu1 }
  0xf7   : > { %1491 = vst [vmem:[%s1989_s6] sm:$0xff] %v1490_v4   ;;  %1662 = vst [vmem:[%s1989_s6 + $0x80] sm:$0xff] %v1570_v5   ;;  %v600_v12 = vadd.f32 %v1974_v41, %v599_v10  ;;  %v728_v13 = vadd.f32 %v1974_v41, %v727_v11  ;;  %v1732_v14 = vpop.f32.mrb[6].mxu0  ;;  %v1764_v15 = vpop.f32.mrb[6].mxu1 }
  0xf8   : > { %v611_v16 = vadd.f32 %v1732_v14, %v1974_v41  ;;  %v739_v17 = vadd.f32 %v1764_v15, %v1974_v41  ;;  %v602_v18 = vpop.f32.mrb[7].mxu0  ;;  %v730_v19 = vpop.f32.mrb[7].mxu1  ;;  %v844_v22 = vmax.f32 %v608_v8, 0.0  ;;  %v876_v23 = vmax.f32 %v736_v9, 0.0 }
  0xf9   : > { %v603_v20 = vadd.f32 %v1974_v41, %v602_v18  ;;  %v731_v21 = vadd.f32 %v1974_v41, %v730_v19  ;;  %v842_v26 = vmax.f32 %v600_v12, 0.0  ;;  %v874_v27 = vmax.f32 %v728_v13, 0.0 }
  0xfa   : > { %v845_v24 = vmax.f32 %v611_v16, 0.0  ;;  %v877_v25 = vmax.f32 %v739_v17, 0.0 }
  0xfb   : > { %v843_v28 = vmax.f32 %v603_v20, 0.0  ;;  %v875_v29 = vmax.f32 %v731_v21, 0.0 }
  0xfc   : > { %v1505_v30 = vpack.c.bf16 %v845_v24, %v844_v22  ;;  %v1585_v31 = vpack.c.bf16 %v877_v25, %v876_v23 }
  0xfd   : > { %v1500_v32 = vpack.c.bf16 %v843_v28, %v842_v26  ;;  %v1580_v33 = vpack.c.bf16 %v875_v29, %v874_v27  ;;  %v1735_v34 = vpop.f32.mrb[8].mxu0  ;;  %v1767_v35 = vpop.f32.mrb[8].mxu1 }
  0xfe   : > { %1649 = vst [vmem:[%s1989_s6 + $0x18] sm:$0xff] %v1505_v30   ;;  %1665 = vst [vmem:[%s1989_s6 + $0x98] sm:$0xff] %v1585_v31   ;;  %v624_v36 = vadd.f32 %v1735_v34, %v1974_v41  ;;  %v752_v37 = vadd.f32 %v1767_v35, %v1974_v41  ;;  %v615_v38 = vpop.f32.mrb[9].mxu0  ;;  %v743_v39 = vpop.f32.mrb[9].mxu1 }
  0xff   : > { %1648 = vst [vmem:[%s1989_s6 + $0x10] sm:$0xff] %v1500_v32   ;;  %1664 = vst [vmem:[%s1989_s6 + $0x90] sm:$0xff] %v1580_v33   ;;  %v616_v40 = vadd.f32 %v1974_v41, %v615_v38  ;;  %v744_v42 = vadd.f32 %v1974_v41, %v743_v39  ;;  %v1736_v43 = vpop.f32.mrb[10].mxu0  ;;  %v1768_v44 = vpop.f32.mrb[10].mxu1 }
 0x100   : > { %v627_v45 = vadd.f32 %v1736_v43, %v1974_v41  ;;  %v755_v46 = vadd.f32 %v1768_v44, %v1974_v41  ;;  %v618_v47 = vpop.f32.mrb[11].mxu0  ;;  %v746_v48 = vpop.f32.mrb[11].mxu1  ;;  %v848_v51 = vmax.f32 %v624_v36, 0.0  ;;  %v880_v52 = vmax.f32 %v752_v37, 0.0 }
 0x101   : > { %v619_v49 = vadd.f32 %v1974_v41, %v618_v47  ;;  %v747_v50 = vadd.f32 %v1974_v41, %v746_v48  ;;  %v846_v55 = vmax.f32 %v616_v40, 0.0  ;;  %v878_v56 = vmax.f32 %v744_v42, 0.0 }
 0x102   : > { %v849_v53 = vmax.f32 %v627_v45, 0.0  ;;  %v881_v54 = vmax.f32 %v755_v46, 0.0 }
 0x103   : > { %v847_v57 = vmax.f32 %v619_v49, 0.0  ;;  %v879_v58 = vmax.f32 %v747_v50, 0.0 }
 0x104   : > { %v1515_v59 = vpack.c.bf16 %v849_v53, %v848_v51  ;;  %v1595_v60 = vpack.c.bf16 %v881_v54, %v880_v52 }
 0x105   : > { %v1510_v61 = vpack.c.bf16 %v847_v57, %v846_v55  ;;  %v1590_v62 = vpack.c.bf16 %v879_v58, %v878_v56  ;;  %v1739_v63 = vpop.f32.mrb[12].mxu0  ;;  %v1771_v0 = vpop.f32.mrb[12].mxu1 }
 0x106   : > { %1651 = vst [vmem:[%s1989_s6 + $0x28] sm:$0xff] %v1515_v59   ;;  %1667 = vst [vmem:[%s1989_s6 + $0xa8] sm:$0xff] %v1595_v60   ;;  %v640_v1 = vadd.f32 %v1739_v63, %v1974_v41  ;;  %v768_v2 = vadd.f32 %v1771_v0, %v1974_v41  ;;  %v631_v3 = vpop.f32.mrb[13].mxu0  ;;  %v759_v4 = vpop.f32.mrb[13].mxu1 }
 0x107   : > { %1650 = vst [vmem:[%s1989_s6 + $0x20] sm:$0xff] %v1510_v61   ;;  %1666 = vst [vmem:[%s1989_s6 + $0xa0] sm:$0xff] %v1590_v62   ;;  %v632_v5 = vadd.f32 %v1974_v41, %v631_v3  ;;  %v760_v6 = vadd.f32 %v1974_v41, %v759_v4  ;;  %v1740_v7 = vpop.f32.mrb[14].mxu0  ;;  %v1772_v8 = vpop.f32.mrb[14].mxu1 }
 0x108   : > { %v643_v9 = vadd.f32 %v1740_v7, %v1974_v41  ;;  %v771_v10 = vadd.f32 %v1772_v8, %v1974_v41  ;;  %v634_v11 = vpop.f32.mrb[15].mxu0  ;;  %v762_v12 = vpop.f32.mrb[15].mxu1  ;;  %v852_v15 = vmax.f32 %v640_v1, 0.0  ;;  %v884_v16 = vmax.f32 %v768_v2, 0.0 }
 0x109   : > { %v635_v13 = vadd.f32 %v1974_v41, %v634_v11  ;;  %v763_v14 = vadd.f32 %v1974_v41, %v762_v12  ;;  %v850_v19 = vmax.f32 %v632_v5, 0.0  ;;  %v882_v20 = vmax.f32 %v760_v6, 0.0 }
 0x10a   : > { %v853_v17 = vmax.f32 %v643_v9, 0.0  ;;  %v885_v18 = vmax.f32 %v771_v10, 0.0 }
 0x10b   : > { %v851_v21 = vmax.f32 %v635_v13, 0.0  ;;  %v883_v22 = vmax.f32 %v763_v14, 0.0 }
 0x10c   : > { %v1525_v23 = vpack.c.bf16 %v853_v17, %v852_v15  ;;  %v1605_v24 = vpack.c.bf16 %v885_v18, %v884_v16 }
 0x10d   : > { %v1520_v25 = vpack.c.bf16 %v851_v21, %v850_v19  ;;  %v1600_v26 = vpack.c.bf16 %v883_v22, %v882_v20  ;;  %v1743_v27 = vpop.f32.mrb[16].mxu0  ;;  %v1775_v28 = vpop.f32.mrb[16].mxu1 }
 0x10e   : > { %1653 = vst [vmem:[%s1989_s6 + $0x38] sm:$0xff] %v1525_v23   ;;  %1669 = vst [vmem:[%s1989_s6 + $0xb8] sm:$0xff] %v1605_v24   ;;  %v656_v29 = vadd.f32 %v1743_v27, %v1974_v41  ;;  %v784_v30 = vadd.f32 %v1775_v28, %v1974_v41  ;;  %v647_v31 = vpop.f32.mrb[17].mxu0  ;;  %v775_v32 = vpop.f32.mrb[17].mxu1 }
 0x10f   : > { %1652 = vst [vmem:[%s1989_s6 + $0x30] sm:$0xff] %v1520_v25   ;;  %1668 = vst [vmem:[%s1989_s6 + $0xb0] sm:$0xff] %v1600_v26   ;;  %v648_v33 = vadd.f32 %v1974_v41, %v647_v31  ;;  %v776_v34 = vadd.f32 %v1974_v41, %v775_v32  ;;  %v1744_v35 = vpop.f32.mrb[18].mxu0  ;;  %v1776_v36 = vpop.f32.mrb[18].mxu1 }
 0x110   : > { %v659_v37 = vadd.f32 %v1744_v35, %v1974_v41  ;;  %v787_v38 = vadd.f32 %v1776_v36, %v1974_v41  ;;  %v650_v39 = vpop.f32.mrb[19].mxu0  ;;  %v778_v40 = vpop.f32.mrb[19].mxu1  ;;  %v856_v44 = vmax.f32 %v656_v29, 0.0  ;;  %v888_v45 = vmax.f32 %v784_v30, 0.0 }
 0x111   : > { %v651_v42 = vadd.f32 %v1974_v41, %v650_v39  ;;  %v779_v43 = vadd.f32 %v1974_v41, %v778_v40  ;;  %v854_v48 = vmax.f32 %v648_v33, 0.0  ;;  %v886_v49 = vmax.f32 %v776_v34, 0.0 }
 0x112   : > { %v857_v46 = vmax.f32 %v659_v37, 0.0  ;;  %v889_v47 = vmax.f32 %v787_v38, 0.0 }
 0x113   : > { %v855_v50 = vmax.f32 %v651_v42, 0.0  ;;  %v887_v51 = vmax.f32 %v779_v43, 0.0 }
 0x114   : > { %v1535_v52 = vpack.c.bf16 %v857_v46, %v856_v44  ;;  %v1615_v53 = vpack.c.bf16 %v889_v47, %v888_v45 }
 0x115   : > { %v1530_v54 = vpack.c.bf16 %v855_v50, %v854_v48  ;;  %v1610_v55 = vpack.c.bf16 %v887_v51, %v886_v49  ;;  %v1747_v56 = vpop.f32.mrb[20].mxu0  ;;  %v1779_v57 = vpop.f32.mrb[20].mxu1 }
 0x116   : > { %1655 = vst [vmem:[%s1989_s6 + $0x48] sm:$0xff] %v1535_v52   ;;  %1671 = vst [vmem:[%s1989_s6 + $0xc8] sm:$0xff] %v1615_v53   ;;  %v672_v58 = vadd.f32 %v1747_v56, %v1974_v41  ;;  %v800_v59 = vadd.f32 %v1779_v57, %v1974_v41  ;;  %v663_v60 = vpop.f32.mrb[21].mxu0  ;;  %v791_v61 = vpop.f32.mrb[21].mxu1 }
 0x117   : > { %1654 = vst [vmem:[%s1989_s6 + $0x40] sm:$0xff] %v1530_v54   ;;  %1670 = vst [vmem:[%s1989_s6 + $0xc0] sm:$0xff] %v1610_v55   ;;  %v664_v62 = vadd.f32 %v1974_v41, %v663_v60  ;;  %v792_v63 = vadd.f32 %v1974_v41, %v791_v61  ;;  %v1748_v0 = vpop.f32.mrb[22].mxu0  ;;  %v1780_v1 = vpop.f32.mrb[22].mxu1 }
 0x118   : > { %v675_v2 = vadd.f32 %v1748_v0, %v1974_v41  ;;  %v803_v3 = vadd.f32 %v1780_v1, %v1974_v41  ;;  %v666_v4 = vpop.f32.mrb[23].mxu0  ;;  %v794_v5 = vpop.f32.mrb[23].mxu1  ;;  %v860_v8 = vmax.f32 %v672_v58, 0.0  ;;  %v892_v9 = vmax.f32 %v800_v59, 0.0 }
 0x119   : > { %v667_v6 = vadd.f32 %v1974_v41, %v666_v4  ;;  %v795_v7 = vadd.f32 %v1974_v41, %v794_v5  ;;  %v858_v12 = vmax.f32 %v664_v62, 0.0  ;;  %v890_v13 = vmax.f32 %v792_v63, 0.0 }
 0x11a   : > { %v861_v10 = vmax.f32 %v675_v2, 0.0  ;;  %v893_v11 = vmax.f32 %v803_v3, 0.0 }
 0x11b   : > { %v859_v14 = vmax.f32 %v667_v6, 0.0  ;;  %v891_v15 = vmax.f32 %v795_v7, 0.0 }
 0x11c   : > { %v1545_v16 = vpack.c.bf16 %v861_v10, %v860_v8  ;;  %v1625_v17 = vpack.c.bf16 %v893_v11, %v892_v9 }
 0x11d   : > { %v1540_v18 = vpack.c.bf16 %v859_v14, %v858_v12  ;;  %v1620_v19 = vpack.c.bf16 %v891_v15, %v890_v13  ;;  %v1751_v20 = vpop.f32.mrb[24].mxu0  ;;  %v1783_v21 = vpop.f32.mrb[24].mxu1 }
 0x11e   : > { %1657 = vst [vmem:[%s1989_s6 + $0x58] sm:$0xff] %v1545_v16   ;;  %1673 = vst [vmem:[%s1989_s6 + $0xd8] sm:$0xff] %v1625_v17   ;;  %v688_v22 = vadd.f32 %v1751_v20, %v1974_v41  ;;  %v816_v23 = vadd.f32 %v1783_v21, %v1974_v41  ;;  %v679_v24 = vpop.f32.mrb[25].mxu0  ;;  %v807_v25 = vpop.f32.mrb[25].mxu1 }
 0x11f   : > { %1656 = vst [vmem:[%s1989_s6 + $0x50] sm:$0xff] %v1540_v18   ;;  %1672 = vst [vmem:[%s1989_s6 + $0xd0] sm:$0xff] %v1620_v19   ;;  %v680_v26 = vadd.f32 %v1974_v41, %v679_v24  ;;  %v808_v27 = vadd.f32 %v1974_v41, %v807_v25  ;;  %v1752_v28 = vpop.f32.mrb[26].mxu0  ;;  %v1784_v29 = vpop.f32.mrb[26].mxu1 }
 0x120   : > { %v691_v30 = vadd.f32 %v1752_v28, %v1974_v41  ;;  %v819_v31 = vadd.f32 %v1784_v29, %v1974_v41  ;;  %v682_v32 = vpop.f32.mrb[27].mxu0  ;;  %v810_v33 = vpop.f32.mrb[27].mxu1  ;;  %v864_v36 = vmax.f32 %v688_v22, 0.0  ;;  %v896_v37 = vmax.f32 %v816_v23, 0.0 }
 0x121   : > { %v683_v34 = vadd.f32 %v1974_v41, %v682_v32  ;;  %v811_v35 = vadd.f32 %v1974_v41, %v810_v33  ;;  %v862_v40 = vmax.f32 %v680_v26, 0.0  ;;  %v894_v42 = vmax.f32 %v808_v27, 0.0 }
 0x122   : > { %v865_v38 = vmax.f32 %v691_v30, 0.0  ;;  %v897_v39 = vmax.f32 %v819_v31, 0.0 }
 0x123   : > { %v863_v43 = vmax.f32 %v683_v34, 0.0  ;;  %v895_v44 = vmax.f32 %v811_v35, 0.0 }
 0x124   : > { %v1555_v45 = vpack.c.bf16 %v865_v38, %v864_v36  ;;  %v1635_v46 = vpack.c.bf16 %v897_v39, %v896_v37 }
 0x125   : > { %v1550_v47 = vpack.c.bf16 %v863_v43, %v862_v40  ;;  %v1630_v48 = vpack.c.bf16 %v895_v44, %v894_v42  ;;  %v1755_v49 = vpop.f32.mrb[28].mxu0  ;;  %v1787_v50 = vpop.f32.mrb[28].mxu1 }
 0x126   : > { %1659 = vst [vmem:[%s1989_s6 + $0x68] sm:$0xff] %v1555_v45   ;;  %1675 = vst [vmem:[%s1989_s6 + $0xe8] sm:$0xff] %v1635_v46   ;;  %v704_v51 = vadd.f32 %v1755_v49, %v1974_v41  ;;  %v832_v52 = vadd.f32 %v1787_v50, %v1974_v41  ;;  %v695_v53 = vpop.f32.mrb[29].mxu0  ;;  %v823_v54 = vpop.f32.mrb[29].mxu1 }
 0x127   : > { %1658 = vst [vmem:[%s1989_s6 + $0x60] sm:$0xff] %v1550_v47   ;;  %1674 = vst [vmem:[%s1989_s6 + $0xe0] sm:$0xff] %v1630_v48   ;;  %v696_v55 = vadd.f32 %v1974_v41, %v695_v53  ;;  %v824_v56 = vadd.f32 %v1974_v41, %v823_v54  ;;  %v1756_v57 = vpop.f32.mrb[30].mxu0  ;;  %v1788_v58 = vpop.f32.mrb[30].mxu1 }
 0x128   : > { %v707_v59 = vadd.f32 %v1756_v57, %v1974_v41  ;;  %v835_v60 = vadd.f32 %v1788_v58, %v1974_v41  ;;  %v698_v61 = vpop.f32.mrb[31].mxu0  ;;  %v826_v62 = vpop.f32.mrb[31].mxu1  ;;  %v868_v1 = vmax.f32 %v704_v51, 0.0  ;;  %v900_v2 = vmax.f32 %v832_v52, 0.0 }
 0x129   : > { %v699_v63 = vadd.f32 %v1974_v41, %v698_v61  ;;  %v827_v0 = vadd.f32 %v1974_v41, %v826_v62  ;;  %v866_v5 = vmax.f32 %v696_v55, 0.0  ;;  %v898_v6 = vmax.f32 %v824_v56, 0.0 }
 0x12a   : > { %v869_v3 = vmax.f32 %v707_v59, 0.0  ;;  %v901_v4 = vmax.f32 %v835_v60, 0.0 }
 0x12b   : > { %v867_v7 = vmax.f32 %v699_v63, 0.0  ;;  %v899_v8 = vmax.f32 %v827_v0, 0.0 }
 0x12c   : > { %v1565_v9 = vpack.c.bf16 %v869_v3, %v868_v1  ;;  %v1645_v10 = vpack.c.bf16 %v901_v4, %v900_v2 }
 0x12d   : > { %v1560_v11 = vpack.c.bf16 %v867_v7, %v866_v5  ;;  %v1640_v12 = vpack.c.bf16 %v899_v8, %v898_v6 }
 0x12e   : > { %1661 = vst [vmem:[%s1989_s6 + $0x78] sm:$0xff] %v1565_v9   ;;  %1677 = vst [vmem:[%s1989_s6 + $0xf8] sm:$0xff] %v1645_v10  }
 0x12f   : > { %1660 = vst [vmem:[%s1989_s6 + $0x70] sm:$0xff] %v1560_v11   ;;  %1676 = vst [vmem:[%s1989_s6 + $0xf0] sm:$0xff] %v1640_v12  }
 0x130 PF: > { %s13_s12 = sadd.s32 1, %s1851_s12  }
 0x131   : > { %p10_p4 = scmp.ge.s32.totalorder %s13_s12, 7  }
 0x133   :  { %12 = sbr.rel (!%p10_p4) target bundleno = 1 (0x1), region = 62 }

// kernel: dave_forward.7
= control target key start
LH: loop header
LB: loop body
LE: loop exit
PB: predicated region body
PF: predicated region fallthrough
CT: control target
= control target key end

     0   :  { %v3633_v0 = vmov 0   ;;  %v3634_v39 = vmov 0.0   ;;  %vm1309_vm0 = vcmask 1043456   ;;  %vm3635_vm1 = vmmov 0   ;;  %s4650_s1 = inlined_call_operand.vmem [shape: bf16[600,128], index: 1, kind: input, shape index: {}]   ;;  %s4651_s0 = inlined_call_operand.vmem [shape: bf16[464,600], index: 0, kind: input, shape index: {}]   ;;  %s4652_s2 = inlined_call_operand.vmem [shape: f32[1,128], index: 2, kind: input, shape index: {}]   ;;  %s4653_s3 = inlined_call_operand.vmem [shape: bf16[464,128], index: 3, kind: output, shape index: {}]  }
   0x1   :  { %1313 = vmatprep.subr.bf16.mxu1 %v3633_v0  ;;  %1578 = vmatprep.subr.bf16.mxu0 %v3633_v0  ;;  %v3392_v1 = vld [vmem:[%s4650_s1] sm:$0xff]   ;;  %v3394_v3 = vld [vmem:[%s4650_s1 + $0x8] sm:$0xff]   ;;  %v3396_v5 = vld [vmem:[%s4650_s1 + $0x10] sm:$0xff]   ;;  %vm1221_vm2 = vcmask 719872  }
   0x2   :  { %v3664_v2 = vld [vmem:[%s4650_s1 + $0x80] sm:$0xff]   ;;  %1314 = vmatpush1.bf16.msra.mxu1 %v3392_v1  ;;  %v3674_v4 = vld [vmem:[%s4650_s1 + $0x88] sm:$0xff]   ;;  %v3685_v6 = vld [vmem:[%s4650_s1 + $0x90] sm:$0xff]  }
   0x3   :  { %1579 = vmatpush1.bf16.msra.mxu0 %v3664_v2  ;;  %1315 = vmatprep.subr.bf16.mxu1 %v3633_v0  ;;  %v3398_v7 = vld [vmem:[%s4650_s1 + $0x18] sm:$0xff]   ;;  %v3400_v9 = vld [vmem:[%s4650_s1 + $0x20] sm:$0xff]   ;;  %v3402_v11 = vld [vmem:[%s4650_s1 + $0x28] sm:$0xff]  }
   0x4   :  { %1580 = vmatprep.subr.bf16.mxu0 %v3633_v0  ;;  %v3696_v8 = vld [vmem:[%s4650_s1 + $0x98] sm:$0xff]   ;;  %v3707_v10 = vld [vmem:[%s4650_s1 + $0xa0] sm:$0xff]   ;;  %v3718_v12 = vld [vmem:[%s4650_s1 + $0xa8] sm:$0xff]  }
   0x5   :  { %v3404_v13 = vld [vmem:[%s4650_s1 + $0x30] sm:$0xff]   ;;  %v3406_v15 = vld [vmem:[%s4650_s1 + $0x38] sm:$0xff]   ;;  %v3408_v17 = vld [vmem:[%s4650_s1 + $0x40] sm:$0xff]  }
   0x6   :  { %1316 = vmatpush1.bf16.msra.mxu1 %v3394_v3  ;;  %v3729_v14 = vld [vmem:[%s4650_s1 + $0xb0] sm:$0xff]   ;;  %v3740_v16 = vld [vmem:[%s4650_s1 + $0xb8] sm:$0xff]   ;;  %v3751_v18 = vld [vmem:[%s4650_s1 + $0xc0] sm:$0xff]  }
   0x7   :  { %1581 = vmatpush1.bf16.msra.mxu0 %v3674_v4  ;;  %1317 = vmatprep.subr.bf16.mxu1 %v3633_v0  ;;  %v3426_v19 = vld [vmem:[%s4651_s0 + $0x4] ss:$20 sps:$4 sm:$0xff]   ;;  %v3410_v20 = vld [vmem:[%s4650_s1 + $0x48] sm:$0xff]   ;;  %v3412_v23 = vld [vmem:[%s4650_s1 + $0x50] sm:$0xff]  }
   0x8   :  { %1582 = vmatprep.subr.bf16.mxu0 %v3633_v0  ;;  %v3429_v21 = vld [vmem:[%s4651_s0 + $0xc] ss:$20 sps:$4 sm:$0xff]   ;;  %1345 = vmatprep.mubr.bf16.mxu1 %v3426_v19  ;;  %v3779_v24 = vld [vmem:[%s4650_s1 + $0xd0] sm:$0xff]   ;;  %v3414_v25 = vld [vmem:[%s4650_s1 + $0x58] sm:$0xff]  }
   0x9   :  { %v3768_v22 = vld [vmem:[%s4650_s1 + $0xc8] sm:$0xff]   ;;  %1610 = vmatprep.mubr.bf16.mxu0 %v3429_v21  ;;  %v3790_v26 = vld [vmem:[%s4650_s1 + $0xd8] sm:$0xff]   ;;  %v3416_v27 = vld [vmem:[%s4650_s1 + $0x60] sm:$0xff]  }
   0xa   :  { %1318 = vmatpush1.bf16.msra.mxu1 %v3396_v5  ;;  %v3801_v28 = vld [vmem:[%s4650_s1 + $0xe0] sm:$0xff]   ;;  %v3418_v29 = vld [vmem:[%s4650_s1 + $0x68] sm:$0xff]   ;;  %v3420_v31 = vld [vmem:[%s4650_s1 + $0x70] sm:$0xff]  }
   0xb   :  { %1583 = vmatpush1.bf16.msra.mxu0 %v3685_v6  ;;  %1319 = vmatprep.subr.bf16.mxu1 %v3633_v0  ;;  %v3812_v30 = vld [vmem:[%s4650_s1 + $0xe8] sm:$0xff]   ;;  %v3823_v32 = vld [vmem:[%s4650_s1 + $0xf0] sm:$0xff]   ;;  %v3422_v33 = vld [vmem:[%s4650_s1 + $0x78] sm:$0xff]  }
   0xc   :  { %1584 = vmatprep.subr.bf16.mxu0 %v3633_v0  ;;  %v3834_v34 = vld [vmem:[%s4650_s1 + $0xf8] sm:$0xff]   ;;  %v3424_v35 = vld [vmem:[%s4651_s0] ss:$20 sps:$4 sm:$0xff]   ;;  %v3443_v41 = vld [vmem:[%s4650_s1 + $0x108] sm:$0xff]  }
   0xd   :  { %v3427_v36 = vld [vmem:[%s4651_s0 + $0x8] ss:$20 sps:$4 sm:$0xff]   ;;  %v3431_v37 = vld [vmem:[%s4651_s0 + $0x2c] ss:$20 sps:$4 sm:$0xff]   ;;  %v3436_v43 = vld [vmem:[%s4651_s0 + $0x30] ss:$20 sps:$4 sm:$0xff]  }
   0xe   :  { %1320 = vmatpush1.bf16.msra.mxu1 %v3398_v7  ;;  %v3430_v38 = vld [vmem:[%s4650_s1 + $0x100] sm:$0xff]   ;;  %v3433_v40 = vld [vmem:[%s4651_s0 + $0x34] ss:$20 sps:$4 sm:$0xff]   ;;  %v3439_v45 = vld [vmem:[%s4651_s0 + $0x5c] ss:$20 sps:$4 sm:$0xff]  }
   0xf   :  { %1585 = vmatpush1.bf16.msra.mxu0 %v3696_v8  ;;  %1321 = vmatprep.subr.bf16.mxu1 %v3633_v0  ;;  %v3435_v42 = vld [vmem:[%s4651_s0 + $0x28] ss:$20 sps:$4 sm:$0xff]   ;;  %v3462_v46 = vld [vmem:[%s4650_s1 + $0x110] sm:$0xff]   ;;  %v3442_v49 = vld [vmem:[%s4651_s0 + $0x58] ss:$20 sps:$4 sm:$0xff]  }
  0x10   :  { %1586 = vmatprep.subr.bf16.mxu0 %v3633_v0  ;;  %v3437_v44 = vld [vmem:[%s4651_s0 + $0x54] ss:$20 sps:$4 sm:$0xff]   ;;  %v3475_v47 = vld [vmem:[%s4650_s1 + $0x118] sm:$0xff]   ;;  %v3441_v48 = vld [vmem:[%s4651_s0 + $0x50] ss:$20 sps:$4 sm:$0xff]  }
  0x11   :  { %v3444_v50 = vld [vmem:[%s4651_s0 + $0x7c] ss:$20 sps:$4 sm:$0xff]   ;;  %v3446_v51 = vld [vmem:[%s4651_s0 + $0x84] ss:$20 sps:$4 sm:$0xff]   ;;  %v3507_v53 = vld [vmem:[%s4650_s1 + $0x128] ss:$0 sps:$4 sm:$0xff]  }
  0x12   :  { %1322 = vmatpush1.bf16.msra.mxu1 %v3400_v9  ;;  %v3494_v52 = vld [vmem:[%s4650_s1 + $0x120] sm:$0xff]   ;;  %v3448_v54 = vld [vmem:[%s4651_s0 + $0x78] ss:$20 sps:$4 sm:$0xff]   ;;  %v1311_v56 = vsel %vm1309_vm0, %v3507_v53, 0  ;;  %v3455_v60 = vld [vmem:[%s4651_s0 + $0xa8] ss:$20 sps:$4 sm:$0xff]  }
  0x13   :  { %1587 = vmatpush1.bf16.msra.mxu0 %v3707_v10  ;;  %1323 = vmatprep.subr.bf16.mxu1 %v3633_v0  ;;  %v3449_v55 = vld [vmem:[%s4651_s0 + $0x80] ss:$20 sps:$4 sm:$0xff]   ;;  %v3450_v57 = vld [vmem:[%s4651_s0 + $0xa4] ss:$20 sps:$4 sm:$0xff]   ;;  %v3460_v63 = vld [vmem:[%s4651_s0 + $0xc8] ss:$20 sps:$4 sm:$0xff]  }
  0x14   :  { %1588 = vmatprep.subr.bf16.mxu0 %v3633_v0  ;;  %v3452_v58 = vld [vmem:[%s4651_s0 + $0xac] ss:$20 sps:$4 sm:$0xff]   ;;  %v3458_v62 = vld [vmem:[%s4651_s0 + $0xd4] ss:$20 sps:$4 sm:$0xff]   ;;  %v3461_v1 = vld [vmem:[%s4651_s0 + $0xd0] ss:$20 sps:$4 sm:$0xff]  }
  0x15   :  { %v3454_v59 = vld [vmem:[%s4651_s0 + $0xa0] ss:$20 sps:$4 sm:$0xff]   ;;  %v3465_v3 = vld [vmem:[%s4651_s0 + $0xfc] ss:$20 sps:$4 sm:$0xff]   ;;  %v3468_v5 = vld [vmem:[%s4651_s0 + $0xf8] ss:$20 sps:$4 sm:$0xff]  }
  0x16   :  { %1324 = vmatpush1.bf16.msra.mxu1 %v3402_v11  ;;  %v3456_v61 = vld [vmem:[%s4651_s0 + $0xcc] ss:$20 sps:$4 sm:$0xff]   ;;  %v3471_v7 = vld [vmem:[%s4651_s0 + $0x124] ss:$20 sps:$4 sm:$0xff]   ;;  %v3495_v21 = vld [vmem:[%s4651_s0 + $0x1bc] ss:$20 sps:$4 sm:$0xff]  }
  0x17   :  { %1589 = vmatpush1.bf16.msra.mxu0 %v3718_v12  ;;  %1325 = vmatprep.subr.bf16.mxu1 %v3633_v0  ;;  %v3474_v9 = vld [vmem:[%s4651_s0 + $0x120] ss:$20 sps:$4 sm:$0xff]   ;;  %v3492_v19 = vld [vmem:[%s4651_s0 + $0x190] ss:$20 sps:$4 sm:$0xff]  }
  0x18   :  { %1590 = vmatprep.subr.bf16.mxu0 %v3633_v0  ;;  %v3478_v11 = vld [vmem:[%s4651_s0 + $0x14c] ss:$20 sps:$4 sm:$0xff]   ;;  %v3540_v53 = vld [vmem:[%s4651_s0 + $0x324] ss:$20 sps:$4 sm:$0xff]  }
  0x1a   :  { %1326 = vmatpush1.bf16.msra.mxu1 %v3404_v13  ;;  %v3481_v13 = vld [vmem:[%s4651_s0 + $0x148] ss:$20 sps:$4 sm:$0xff]  }
  0x1b   :  { %1591 = vmatpush1.bf16.msra.mxu0 %v3729_v14  ;;  %1327 = vmatprep.subr.bf16.mxu1 %v3633_v0 }
  0x1c   :  { %1592 = vmatprep.subr.bf16.mxu0 %v3633_v0 }
  0x1e   :  { %1328 = vmatpush1.bf16.msra.mxu1 %v3406_v15  ;;  %v3484_v15 = vld [vmem:[%s4651_s0 + $0x174] ss:$20 sps:$4 sm:$0xff]  }
  0x1f   :  { %1593 = vmatpush1.bf16.msra.mxu0 %v3740_v16  ;;  %1329 = vmatprep.subr.bf16.mxu1 %v3633_v0 }
  0x20   :  { %1594 = vmatprep.subr.bf16.mxu0 %v3633_v0 }
  0x22   :  { %1330 = vmatpush1.bf16.msra.mxu1 %v3408_v17  ;;  %v3488_v17 = vld [vmem:[%s4651_s0 + $0x194] ss:$20 sps:$4 sm:$0xff]  }
  0x23   :  { %1595 = vmatpush1.bf16.msra.mxu0 %v3751_v18  ;;  %1331 = vmatprep.subr.bf16.mxu1 %v3633_v0 }
  0x24   :  { %1596 = vmatprep.subr.bf16.mxu0 %v3633_v0 }
  0x26   :  { %1332 = vmatpush1.bf16.msra.mxu1 %v3410_v20  ;;  %v3493_v20 = vld [vmem:[%s4651_s0 + $0x198] ss:$20 sps:$4 sm:$0xff]  }
  0x27   :  { %1597 = vmatpush1.bf16.msra.mxu0 %v3768_v22  ;;  %1333 = vmatprep.subr.bf16.mxu1 %v3633_v0 }
  0x28   :  { %1598 = vmatprep.subr.bf16.mxu0 %v3633_v0 }
  0x2a   :  { %1334 = vmatpush1.bf16.msra.mxu1 %v3412_v23  ;;  %v3499_v23 = vld [vmem:[%s4651_s0 + $0x1b8] ss:$20 sps:$4 sm:$0xff]  }
  0x2b   :  { %1599 = vmatpush1.bf16.msra.mxu0 %v3779_v24  ;;  %1335 = vmatprep.subr.bf16.mxu1 %v3633_v0 }
  0x2c   :  { %1600 = vmatprep.subr.bf16.mxu0 %v3633_v0 }
  0x2e   :  { %1336 = vmatpush1.bf16.msra.mxu1 %v3414_v25  ;;  %v3501_v25 = vld [vmem:[%s4651_s0 + $0x1e4] ss:$20 sps:$4 sm:$0xff]  }
  0x2f   :  { %1601 = vmatpush1.bf16.msra.mxu0 %v3790_v26  ;;  %1337 = vmatprep.subr.bf16.mxu1 %v3633_v0 }
  0x30   :  { %1602 = vmatprep.subr.bf16.mxu0 %v3633_v0 }
  0x32   :  { %1338 = vmatpush1.bf16.msra.mxu1 %v3416_v27  ;;  %v3505_v27 = vld [vmem:[%s4651_s0 + $0x1e0] ss:$20 sps:$4 sm:$0xff]  }
  0x33   :  { %1603 = vmatpush1.bf16.msra.mxu0 %v3801_v28  ;;  %1339 = vmatprep.subr.bf16.mxu1 %v3633_v0 }
  0x34   :  { %1604 = vmatprep.subr.bf16.mxu0 %v3633_v0 }
  0x36   :  { %1340 = vmatpush1.bf16.msra.mxu1 %v3418_v29  ;;  %v3508_v29 = vld [vmem:[%s4651_s0 + $0x20c] ss:$20 sps:$4 sm:$0xff]  }
  0x37   :  { %1605 = vmatpush1.bf16.msra.mxu0 %v3812_v30  ;;  %1341 = vmatprep.subr.bf16.mxu1 %v3633_v0 }
  0x38   :  { %1606 = vmatprep.subr.bf16.mxu0 %v3633_v0 }
  0x3a   :  { %1342 = vmatpush1.bf16.msra.mxu1 %v3420_v31  ;;  %v3512_v31 = vld [vmem:[%s4651_s0 + $0x208] ss:$20 sps:$4 sm:$0xff]  }
  0x3b   :  { %1607 = vmatpush1.bf16.msra.mxu0 %v3823_v32  ;;  %1343 = vmatprep.subr.bf16.mxu1 %v3633_v0 }
  0x3c   :  { %1608 = vmatprep.subr.bf16.mxu0 %v3633_v0 }
  0x3e   :  { %1344 = vmatpush1.bf16.msra.mxu1 %v3422_v33  ;;  %v3514_v33 = vld [vmem:[%s4651_s0 + $0x234] ss:$20 sps:$4 sm:$0xff]  }
  0x3f   :  { %1609 = vmatpush1.bf16.msra.mxu0 %v3834_v34  ;;  %3125 = vmatprep.subr.bf16.mxu1 %v3633_v0 }
  0x40   :  { %2997 = vmatprep.subr.bf16.mxu0 %v3634_v39 }
  0x41   :  { %1346 = vmatmul.mubr.bf16.vlgmr.msra.gmra.mrb[0].mxu1 %v3424_v35  ;;  %v3518_v35 = vld [vmem:[%s4651_s0 + $0x230] ss:$20 sps:$4 sm:$0xff]  }
  0x42   :  { %1611 = vmatmul.mubr.bf16.vlgmr.msra.gmra.mrb[0].mxu0 %v3427_v36  ;;  %1353 = vmatprep.mubr.bf16.mxu1 %v3431_v37  ;;  %v3519_v36 = vld [vmem:[%s4651_s0 + $0x238] ss:$20 sps:$4 sm:$0xff]   ;;  %v3520_v37 = vld [vmem:[%s4651_s0 + $0x25c] ss:$20 sps:$4 sm:$0xff]  }
  0x43   :  { %2998 = vmatpush3.bf16.msra.mxu0 %v3430_v38  ;;  %3141 = vmatpush1.bf16.msra.mxu1 %v3664_v2  ;;  %v3463_v2 = vld [vmem:[%s4651_s0 + $0xf4] ss:$20 sps:$4 sm:$0xff]   ;;  %v3522_v38 = vld [vmem:[%s4651_s0 + $0x258] ss:$20 sps:$4 sm:$0xff]  }
  0x44   :  { %1618 = vmatprep.mubr.bf16.mxu0 %v3433_v40  ;;  %2999 = vmatprep.subr.bf16.mxu0 %v3634_v39  ;;  %v3523_v40 = vld [vmem:[%s4651_s0 + $0x10] ss:$20 sps:$4 sm:$0xff]  }
  0x45   :  { %3126 = vmatprep.subr.bf16.mxu1 %v3633_v0 }
  0x47   :  { %3000 = vmatpush3.bf16.msra.mxu0 %v3443_v41  ;;  %3142 = vmatpush1.bf16.msra.mxu1 %v3674_v4  ;;  %v3467_v4 = vld [vmem:[%s4651_s0 + $0xf0] ss:$20 sps:$4 sm:$0xff]  }
  0x48   :  { %3127 = vmatprep.subr.bf16.mxu1 %v3633_v0  ;;  %3001 = vmatprep.subr.bf16.mxu0 %v3634_v39  ;;  %v3524_v41 = vld [vmem:[%s4651_s0 + $0x284] ss:$20 sps:$4 sm:$0xff]  }
  0x49   :  { %1354 = vmatmul.mubr.bf16.gmra.mrb[4].mxu1 %v3435_v42  ;;  %v3526_v42 = vld [vmem:[%s4651_s0 + $0x280] ss:$20 sps:$4 sm:$0xff]  }
  0x4a   :  { %1619 = vmatmul.mubr.bf16.gmra.mrb[4].mxu0 %v3436_v43  ;;  %1361 = vmatprep.mubr.bf16.mxu1 %v3437_v44  ;;  %v3527_v43 = vld [vmem:[%s4651_s0 + $0x38] ss:$20 sps:$4 sm:$0xff]  }
  0x4b   :  { %1626 = vmatprep.mubr.bf16.mxu0 %v3439_v45  ;;  %3143 = vmatpush1.bf16.msra.mxu1 %v3685_v6  ;;  %v3469_v6 = vld [vmem:[%s4651_s0 + $0x11c] ss:$20 sps:$4 sm:$0xff]   ;;  %v3528_v44 = vld [vmem:[%s4651_s0 + $0x2ac] ss:$20 sps:$4 sm:$0xff]  }
  0x4c   :  { %3002 = vmatpush3.bf16.msra.mxu0 %v3462_v46  ;;  %3128 = vmatprep.subr.bf16.mxu1 %v3633_v0  ;;  %v3530_v45 = vld [vmem:[%s4651_s0 + $0x2a8] ss:$20 sps:$4 sm:$0xff]   ;;  %v3531_v46 = vld [vmem:[%s4651_s0 + $0x60] ss:$20 sps:$4 sm:$0xff]  }
  0x4d   :  { %3003 = vmatprep.subr.bf16.mxu0 %v3634_v39 }
  0x4f   :  { %3144 = vmatpush1.bf16.msra.mxu1 %v3696_v8  ;;  %v3473_v8 = vld [vmem:[%s4651_s0 + $0x118] ss:$20 sps:$4 sm:$0xff]  }
  0x50   :  { %3004 = vmatpush3.bf16.msra.mxu0 %v3475_v47  ;;  %3129 = vmatprep.subr.bf16.mxu1 %v3633_v0  ;;  %v3532_v47 = vld [vmem:[%s4651_s0 + $0x2d4] ss:$20 sps:$4 sm:$0xff]  }
  0x51   :  { %1362 = vmatmul.mubr.bf16.gmra.mrb[8].mxu1 %v3441_v48  ;;  %3005 = vmatprep.subr.bf16.mxu0 %v3634_v39  ;;  %v3534_v48 = vld [vmem:[%s4651_s0 + $0x2d0] ss:$20 sps:$4 sm:$0xff]  }
  0x52   :  { %1627 = vmatmul.mubr.bf16.gmra.mrb[8].mxu0 %v3442_v49  ;;  %1369 = vmatprep.mubr.bf16.mxu1 %v3444_v50  ;;  %v3535_v49 = vld [vmem:[%s4651_s0 + $0x88] ss:$20 sps:$4 sm:$0xff]  }
  0x53   :  { %1634 = vmatprep.mubr.bf16.mxu0 %v3446_v51  ;;  %3145 = vmatpush1.bf16.msra.mxu1 %v3707_v10  ;;  %v3476_v10 = vld [vmem:[%s4651_s0 + $0x144] ss:$20 sps:$4 sm:$0xff]   ;;  %v3536_v50 = vld [vmem:[%s4651_s0 + $0x2fc] ss:$20 sps:$4 sm:$0xff]  }
  0x54   :  { %3130 = vmatprep.subr.bf16.mxu1 %v3633_v0  ;;  %3006 = vmatpush3.bf16.msra.mxu0 %v3494_v52  ;;  %v3538_v51 = vld [vmem:[%s4651_s0 + $0x2f8] ss:$20 sps:$4 sm:$0xff]   ;;  %v3539_v52 = vld [vmem:[%s4651_s0 + $0xb0] ss:$20 sps:$4 sm:$0xff]  }
  0x55   :  { %3007 = vmatprep.subr.bf16.mxu0 %v3634_v39 }
  0x57   :  { %3146 = vmatpush1.bf16.msra.mxu1 %v3718_v12  ;;  %v3480_v12 = vld [vmem:[%s4651_s0 + $0x140] ss:$20 sps:$4 sm:$0xff]  }
  0x58   :  { %3131 = vmatprep.subr.bf16.mxu1 %v3633_v0  ;;  %3008 = vmatpush3.bf16.msra.mxu0 %v1311_v56  ;;  %v3544_v56 = vld [vmem:[%s4651_s0 + $0x34c] ss:$20 sps:$4 sm:$0xff]  }
  0x59   :  { %1370 = vmatmul.mubr.bf16.gmra.mrb[12].mxu1 %v3448_v54  ;;  %v3542_v54 = vld [vmem:[%s4651_s0 + $0x320] ss:$20 sps:$4 sm:$0xff]  }
  0x5a   :  { %1635 = vmatmul.mubr.bf16.gmra.mrb[12].mxu0 %v3449_v55  ;;  %1377 = vmatprep.mubr.bf16.mxu1 %v3450_v57  ;;  %v3543_v55 = vld [vmem:[%s4651_s0 + $0xd8] ss:$20 sps:$4 sm:$0xff]   ;;  %v3546_v57 = vld [vmem:[%s4651_s0 + $0x348] ss:$20 sps:$4 sm:$0xff]  }
  0x5b   :  { %1642 = vmatprep.mubr.bf16.mxu0 %v3452_v58  ;;  %3147 = vmatpush1.bf16.msra.mxu1 %v3729_v14  ;;  %v3482_v14 = vld [vmem:[%s4651_s0 + $0x16c] ss:$20 sps:$4 sm:$0xff]  }
  0x5c   :  { %3132 = vmatprep.subr.bf16.mxu1 %v3633_v0  ;;  %v3547_v58 = vld [vmem:[%s4651_s0 + $0x100] ss:$20 sps:$4 sm:$0xff]  }
  0x5f   :  { %3148 = vmatpush1.bf16.msra.mxu1 %v3740_v16  ;;  %v3487_v16 = vld [vmem:[%s4651_s0 + $0x170] ss:$20 sps:$4 sm:$0xff]  }
  0x60   :  { %3133 = vmatprep.subr.bf16.mxu1 %v3633_v0 }
  0x61   :  { %1378 = vmatmul.mubr.bf16.gmra.mrb[16].mxu1 %v3454_v59  ;;  %v3548_v59 = vld [vmem:[%s4651_s0 + $0x374] ss:$20 sps:$4 sm:$0xff]  }
  0x62   :  { %1643 = vmatmul.mubr.bf16.gmra.mrb[16].mxu0 %v3455_v60  ;;  %1385 = vmatprep.mubr.bf16.mxu1 %v3456_v61  ;;  %v3550_v60 = vld [vmem:[%s4651_s0 + $0x370] ss:$20 sps:$4 sm:$0xff]   ;;  %v3551_v61 = vld [vmem:[%s4651_s0 + $0x128] ss:$20 sps:$4 sm:$0xff]  }
  0x63   :  { %1650 = vmatprep.mubr.bf16.mxu0 %v3458_v62  ;;  %3149 = vmatpush1.bf16.msra.mxu1 %v3751_v18  ;;  %v3490_v18 = vld [vmem:[%s4651_s0 + $0x19c] ss:$20 sps:$4 sm:$0xff]  }
  0x64   :  { %3134 = vmatprep.subr.bf16.mxu1 %v3633_v0  ;;  %v3552_v62 = vld [vmem:[%s4651_s0 + $0x39c] ss:$20 sps:$4 sm:$0xff]  }
  0x67   :  { %3150 = vmatpush1.bf16.msra.mxu1 %v3768_v22  ;;  %v3497_v22 = vld [vmem:[%s4651_s0 + $0x1c4] ss:$20 sps:$4 sm:$0xff]  }
  0x68   :  { %3135 = vmatprep.subr.bf16.mxu1 %v3633_v0 }
  0x69   :  { %1386 = vmatmul.mubr.bf16.gmra.mrb[20].mxu1 %v3460_v63  ;;  %v3554_v63 = vld [vmem:[%s4651_s0 + $0x398] ss:$20 sps:$4 sm:$0xff]  }
  0x6a   :  { %1651 = vmatmul.mubr.bf16.gmra.mrb[20].mxu0 %v3461_v1  ;;  %1393 = vmatprep.mubr.bf16.mxu1 %v3463_v2  ;;  %v3555_v1 = vld [vmem:[%s4651_s0 + $0x150] ss:$20 sps:$4 sm:$0xff]  }
  0x6b   :  { %1658 = vmatprep.mubr.bf16.mxu0 %v3465_v3  ;;  %3151 = vmatpush1.bf16.msra.mxu1 %v3779_v24  ;;  %v3500_v24 = vld [vmem:[%s4651_s0 + $0x1c0] ss:$20 sps:$4 sm:$0xff]   ;;  %v3556_v2 = vld [vmem:[%s4651_s0 + $0x3c4] ss:$20 sps:$4 sm:$0xff]  }
  0x6c   :  { %3136 = vmatprep.subr.bf16.mxu1 %v3633_v0  ;;  %v3558_v3 = vld [vmem:[%s4651_s0 + $0x3c0] ss:$20 sps:$4 sm:$0xff]  }
  0x6f   :  { %3152 = vmatpush1.bf16.msra.mxu1 %v3790_v26  ;;  %v3503_v26 = vld [vmem:[%s4651_s0 + $0x1ec] ss:$20 sps:$4 sm:$0xff]  }
  0x70   :  { %3137 = vmatprep.subr.bf16.mxu1 %v3633_v0 }
  0x71   :  { %1394 = vmatmul.mubr.bf16.gmra.mrb[24].mxu1 %v3467_v4  ;;  %v3559_v4 = vld [vmem:[%s4651_s0 + $0x178] ss:$20 sps:$4 sm:$0xff]  }
  0x72   :  { %1659 = vmatmul.mubr.bf16.gmra.mrb[24].mxu0 %v3468_v5  ;;  %1401 = vmatprep.mubr.bf16.mxu1 %v3469_v6  ;;  %v3560_v5 = vld [vmem:[%s4651_s0 + $0x3ec] ss:$20 sps:$4 sm:$0xff]   ;;  %v3562_v6 = vld [vmem:[%s4651_s0 + $0x3e8] ss:$20 sps:$4 sm:$0xff]  }
  0x73   :  { %1666 = vmatprep.mubr.bf16.mxu0 %v3471_v7  ;;  %3153 = vmatpush1.bf16.msra.mxu1 %v3801_v28  ;;  %v3506_v28 = vld [vmem:[%s4651_s0 + $0x1e8] ss:$20 sps:$4 sm:$0xff]   ;;  %v3563_v7 = vld [vmem:[%s4651_s0 + $0x1a0] ss:$20 sps:$4 sm:$0xff]  }
  0x74   :  { %3138 = vmatprep.subr.bf16.mxu1 %v3633_v0 }
  0x77   :  { %3154 = vmatpush1.bf16.msra.mxu1 %v3812_v30  ;;  %v3510_v30 = vld [vmem:[%s4651_s0 + $0x214] ss:$20 sps:$4 sm:$0xff]  }
  0x78   :  { %3139 = vmatprep.subr.bf16.mxu1 %v3633_v0 }
  0x79   :  { %1402 = vmatmul.mubr.bf16.gmra.mrb[28].mxu1 %v3473_v8  ;;  %v3564_v8 = vld [vmem:[%s4651_s0 + $0x414] ss:$20 sps:$4 sm:$0xff]  }
  0x7a   :  { %1667 = vmatmul.mubr.bf16.gmra.mrb[28].mxu0 %v3474_v9  ;;  %1409 = vmatprep.mubr.bf16.mxu1 %v3476_v10  ;;  %v3566_v9 = vld [vmem:[%s4651_s0 + $0x410] ss:$20 sps:$4 sm:$0xff]   ;;  %v3567_v10 = vld [vmem:[%s4651_s0 + $0x1c8] ss:$20 sps:$4 sm:$0xff]  }
  0x7b   :  { %1674 = vmatprep.mubr.bf16.mxu0 %v3478_v11  ;;  %3155 = vmatpush1.bf16.msra.mxu1 %v3823_v32  ;;  %v3513_v32 = vld [vmem:[%s4651_s0 + $0x210] ss:$20 sps:$4 sm:$0xff]  }
  0x7c   :  { %3140 = vmatprep.subr.bf16.mxu1 %v3633_v0  ;;  %v3486_v0 = vld [vmem:[%s4651_s0 + $0x168] ss:$20 sps:$4 sm:$0xff]  }
  0x7d   :  { %v3568_v11 = vld [vmem:[%s4651_s0 + $0x43c] ss:$20 sps:$4 sm:$0xff]  }
  0x7f   :  { %3156 = vmatpush1.bf16.msra.mxu1 %v3834_v34  ;;  %v3516_v34 = vld [vmem:[%s4651_s0 + $0x23c] ss:$20 sps:$4 sm:$0xff]  }
  0x81   :  { %1410 = vmatmul.mubr.bf16.gmra.mrb[32].mxu1 %v3480_v12 }
  0x82   :  { %1675 = vmatmul.mubr.bf16.gmra.mrb[32].mxu0 %v3481_v13  ;;  %1417 = vmatprep.mubr.bf16.mxu1 %v3482_v14  ;;  %v3570_v14 = vld [vmem:[%s4651_s0 + $0x438] ss:$20 sps:$4 sm:$0xff]  }
  0x83   :  { %1682 = vmatprep.mubr.bf16.mxu0 %v3484_v15  ;;  %v3571_v15 = vld [vmem:[%s4651_s0 + $0x1f0] ss:$20 sps:$4 sm:$0xff]  }
  0x89   :  { %1418 = vmatmul.mubr.bf16.gmra.mrb[36].mxu1 %v3486_v0 }
  0x8a   :  { %1683 = vmatmul.mubr.bf16.gmra.mrb[36].mxu0 %v3487_v16  ;;  %1425 = vmatprep.mubr.bf16.mxu1 %v3488_v17  ;;  %v3572_v16 = vld [vmem:[%s4651_s0 + $0x464] ss:$20 sps:$4 sm:$0xff]  }
  0x8b   :  { %1690 = vmatprep.mubr.bf16.mxu0 %v3490_v18 }
  0x91   :  { %1426 = vmatmul.mubr.bf16.gmra.mrb[40].mxu1 %v3492_v19 }
  0x92   :  { %1691 = vmatmul.mubr.bf16.gmra.mrb[40].mxu0 %v3493_v20  ;;  %1433 = vmatprep.mubr.bf16.mxu1 %v3495_v21  ;;  %v3574_v20 = vld [vmem:[%s4651_s0 + $0x460] ss:$20 sps:$4 sm:$0xff]   ;;  %v3575_v21 = vld [vmem:[%s4651_s0 + $0x218] ss:$20 sps:$4 sm:$0xff]  }
  0x93   :  { %1698 = vmatprep.mubr.bf16.mxu0 %v3497_v22 }
  0x99   :  { %1434 = vmatmul.mubr.bf16.gmra.mrb[44].mxu1 %v3499_v23  ;;  %v3578_v23 = vld [vmem:[%s4651_s0 + $0x264] ss:$20 sps:$4 sm:$0xff]  }
  0x9a   :  { %1699 = vmatmul.mubr.bf16.gmra.mrb[44].mxu0 %v3500_v24  ;;  %1441 = vmatprep.mubr.bf16.mxu1 %v3501_v25 }
  0x9b   :  { %1706 = vmatprep.mubr.bf16.mxu0 %v3503_v26  ;;  %v3576_v26 = vld [vmem:[%s4651_s0 + $0x260] ss:$20 sps:$4 sm:$0xff]  }
  0xa1   :  { %1442 = vmatmul.mubr.bf16.gmra.mrb[48].mxu1 %v3505_v27 }
  0xa2   :  { %1707 = vmatmul.mubr.bf16.gmra.mrb[48].mxu0 %v3506_v28  ;;  %1449 = vmatprep.mubr.bf16.mxu1 %v3508_v29  ;;  %v3579_v28 = vld [vmem:[%s4651_s0 + $0x240] ss:$20 sps:$4 sm:$0xff]  }
  0xa3   :  { %1714 = vmatprep.mubr.bf16.mxu0 %v3510_v30  ;;  %v3580_v30 = vld [vmem:[%s4651_s0 + $0x28c] ss:$20 sps:$4 sm:$0xff]  }
  0xa9   :  { %1450 = vmatmul.mubr.bf16.gmra.mrb[52].mxu1 %v3512_v31 }
  0xaa   :  { %1715 = vmatmul.mubr.bf16.gmra.mrb[52].mxu0 %v3513_v32  ;;  %1457 = vmatprep.mubr.bf16.mxu1 %v3514_v33 }
  0xab   :  { %1722 = vmatprep.mubr.bf16.mxu0 %v3516_v34  ;;  %v3582_v34 = vld [vmem:[%s4651_s0 + $0x288] ss:$20 sps:$4 sm:$0xff]  }
  0xb1   :  { %1458 = vmatmul.mubr.bf16.gmra.mrb[56].mxu1 %v3518_v35  ;;  %v3583_v35 = vld [vmem:[%s4651_s0 + $0x268] ss:$20 sps:$4 sm:$0xff]  }
  0xb2   :  { %1723 = vmatmul.mubr.bf16.gmra.mrb[56].mxu0 %v3519_v36  ;;  %1465 = vmatprep.mubr.bf16.mxu1 %v3520_v37  ;;  %v3584_v37 = vld [vmem:[%s4651_s0 + $0x2b4] ss:$20 sps:$4 sm:$0xff]  }
  0xb3   :  { %3009 = vmatprep.mubr.msk.bf16.mxu0 %vm3635_vm1, %v3634_v39 }
  0xb9   :  { %1466 = vmatmul.mubr.bf16.gmra.mrb[60].mxu1 %v3522_v38 }
  0xba   :  { %3010 = vmatmul.mubr.msk.bf16.vlgmr.msra.gmra.mrb[0].mxu0 %vm1221_vm2, %v3523_v40  ;;  %1473 = vmatprep.mubr.bf16.mxu1 %v3524_v41 }
  0xbb   :  { %3013 = vmatprep.mubr.msk.bf16.mxu0 %vm3635_vm1, %v3634_v39 }
  0xc1   :  { %1474 = vmatmul.mubr.bf16.gmra.mrb[64].mxu1 %v3526_v42  ;;  %v3586_v42 = vld [vmem:[%s4651_s0 + $0x2b0] ss:$20 sps:$4 sm:$0xff]  }
  0xc2   :  { %3014 = vmatmul.mubr.msk.bf16.gmra.mrb[4].mxu0 %vm1221_vm2, %v3527_v43  ;;  %1481 = vmatprep.mubr.bf16.mxu1 %v3528_v44  ;;  %v3587_v43 = vld [vmem:[%s4651_s0 + $0x290] ss:$20 sps:$4 sm:$0xff]  }
  0xc3   :  { %3017 = vmatprep.mubr.msk.bf16.mxu0 %vm3635_vm1, %v3634_v39 }
  0xc9   :  { %1482 = vmatmul.mubr.bf16.gmra.mrb[68].mxu1 %v3530_v45  ;;  %v3588_v45 = vld [vmem:[%s4651_s0 + $0x2dc] ss:$20 sps:$4 sm:$0xff]  }
  0xca   :  { %3018 = vmatmul.mubr.msk.bf16.gmra.mrb[8].mxu0 %vm1221_vm2, %v3531_v46  ;;  %1489 = vmatprep.mubr.bf16.mxu1 %v3532_v47 }
  0xcb   :  { %3021 = vmatprep.mubr.msk.bf16.mxu0 %vm3635_vm1, %v3634_v39 }
  0xd1   :  { %1490 = vmatmul.mubr.bf16.gmra.mrb[72].mxu1 %v3534_v48 }
  0xd2   :  { %3022 = vmatmul.mubr.msk.bf16.gmra.mrb[12].mxu0 %vm1221_vm2, %v3535_v49  ;;  %1497 = vmatprep.mubr.bf16.mxu1 %v3536_v50  ;;  %v3590_v49 = vld [vmem:[%s4651_s0 + $0x2d8] ss:$20 sps:$4 sm:$0xff]  }
  0xd3   :  { %3025 = vmatprep.mubr.msk.bf16.mxu0 %vm3635_vm1, %v3634_v39  ;;  %v3591_v50 = vld [vmem:[%s4651_s0 + $0x2b8] ss:$20 sps:$4 sm:$0xff]  }
  0xd9   :  { %1498 = vmatmul.mubr.bf16.gmra.mrb[76].mxu1 %v3538_v51 }
  0xda   :  { %3026 = vmatmul.mubr.msk.bf16.gmra.mrb[16].mxu0 %vm1221_vm2, %v3539_v52  ;;  %1505 = vmatprep.mubr.bf16.mxu1 %v3540_v53  ;;  %v3592_v52 = vld [vmem:[%s4651_s0 + $0x304] ss:$20 sps:$4 sm:$0xff]  }
  0xdb   :  { %3029 = vmatprep.mubr.msk.bf16.mxu0 %vm3635_vm1, %v3634_v39 }
  0xe1   :  { %1506 = vmatmul.mubr.bf16.gmra.mrb[80].mxu1 %v3542_v54 }
  0xe2   :  { %3030 = vmatmul.mubr.msk.bf16.gmra.mrb[20].mxu0 %vm1221_vm2, %v3543_v55  ;;  %1513 = vmatprep.mubr.bf16.mxu1 %v3544_v56  ;;  %v3594_v56 = vld [vmem:[%s4651_s0 + $0x300] ss:$20 sps:$4 sm:$0xff]  }
  0xe3   :  { %3033 = vmatprep.mubr.msk.bf16.mxu0 %vm3635_vm1, %v3634_v39 }
  0xe9   :  { %1514 = vmatmul.mubr.bf16.gmra.mrb[84].mxu1 %v3546_v57  ;;  %v3595_v57 = vld [vmem:[%s4651_s0 + $0x2e0] ss:$20 sps:$4 sm:$0xff]  }
  0xea   :  { %3034 = vmatmul.mubr.msk.bf16.gmra.mrb[24].mxu0 %vm1221_vm2, %v3547_v58  ;;  %1521 = vmatprep.mubr.bf16.mxu1 %v3548_v59  ;;  %v3596_v59 = vld [vmem:[%s4651_s0 + $0x32c] ss:$20 sps:$4 sm:$0xff]  }
  0xeb   :  { %3037 = vmatprep.mubr.msk.bf16.mxu0 %vm3635_vm1, %v3634_v39 }
  0xf1   :  { %1522 = vmatmul.mubr.bf16.gmra.mrb[88].mxu1 %v3550_v60 }
  0xf2   :  { %3038 = vmatmul.mubr.msk.bf16.gmra.mrb[28].mxu0 %vm1221_vm2, %v3551_v61  ;;  %1529 = vmatprep.mubr.bf16.mxu1 %v3552_v62 }
  0xf3   :  { %3041 = vmatprep.mubr.msk.bf16.mxu0 %vm3635_vm1, %v3634_v39 }
  0xf9   :  { %1530 = vmatmul.mubr.bf16.gmra.mrb[92].mxu1 %v3554_v63  ;;  %v3598_v63 = vld [vmem:[%s4651_s0 + $0x328] ss:$20 sps:$4 sm:$0xff]  }
  0xfa   :  { %3042 = vmatmul.mubr.msk.bf16.gmra.mrb[32].mxu0 %vm1221_vm2, %v3555_v1  ;;  %1537 = vmatprep.mubr.bf16.mxu1 %v3556_v2  ;;  %v3599_v1 = vld [vmem:[%s4651_s0 + $0x308] ss:$20 sps:$4 sm:$0xff]  }
  0xfb   :  { %3045 = vmatprep.mubr.msk.bf16.mxu0 %vm3635_vm1, %v3634_v39 }
 0x101   :  { %1538 = vmatmul.mubr.bf16.gmra.mrb[96].mxu1 %v3558_v3  ;;  %v3600_v3 = vld [vmem:[%s4651_s0 + $0x354] ss:$20 sps:$4 sm:$0xff]  }
 0x102   :  { %3046 = vmatmul.mubr.msk.bf16.gmra.mrb[36].mxu0 %vm1221_vm2, %v3559_v4  ;;  %1545 = vmatprep.mubr.bf16.mxu1 %v3560_v5 }
 0x103   :  { %3049 = vmatprep.mubr.msk.bf16.mxu0 %vm3635_vm1, %v3634_v39 }
 0x109   :  { %1546 = vmatmul.mubr.bf16.gmra.mrb[100].mxu1 %v3562_v6 }
 0x10a   :  { %3050 = vmatmul.mubr.msk.bf16.gmra.mrb[40].mxu0 %vm1221_vm2, %v3563_v7  ;;  %1553 = vmatprep.mubr.bf16.mxu1 %v3564_v8  ;;  %v3602_v7 = vld [vmem:[%s4651_s0 + $0x350] ss:$20 sps:$4 sm:$0xff]  }
 0x10b   :  { %3053 = vmatprep.mubr.msk.bf16.mxu0 %vm3635_vm1, %v3634_v39  ;;  %v3603_v8 = vld [vmem:[%s4651_s0 + $0x330] ss:$20 sps:$4 sm:$0xff]  }
 0x111   :  { %1554 = vmatmul.mubr.bf16.gmra.mrb[104].mxu1 %v3566_v9 }
 0x112   :  { %3054 = vmatmul.mubr.msk.bf16.gmra.mrb[44].mxu0 %vm1221_vm2, %v3567_v10  ;;  %1561 = vmatprep.mubr.bf16.mxu1 %v3568_v11  ;;  %v3604_v10 = vld [vmem:[%s4651_s0 + $0x37c] ss:$20 sps:$4 sm:$0xff]  }
 0x113   :  { %3057 = vmatprep.mubr.msk.bf16.mxu0 %vm3635_vm1, %v3634_v39 }
 0x114   :  { %v4217_v12 = vpop.f32.mrb[0].mxu1 }
 0x115   :  { %v1349_v13 = vpop.f32.mrb[1].mxu1 }
 0x116   :  { %v4225_v0 = vpop.f32.mrb[2].mxu1 }
 0x117   :  { %v1352_v17 = vpop.f32.mrb[3].mxu1 }
 0x119   :  { %1562 = vmatmul.mubr.bf16.gmra.mrb[108].mxu1 %v3570_v14 }
 0x11a   :  { %3058 = vmatmul.mubr.msk.bf16.gmra.mrb[48].mxu0 %vm1221_vm2, %v3571_v15  ;;  %1569 = vmatprep.mubr.bf16.mxu1 %v3572_v16  ;;  %v3606_v15 = vld [vmem:[%s4651_s0 + $0x378] ss:$20 sps:$4 sm:$0xff]  }
 0x11b   :  { %3061 = vmatprep.mubr.msk.bf16.mxu0 %vm3635_vm1, %v3634_v39  ;;  %v3607_v16 = vld [vmem:[%s4651_s0 + $0x358] ss:$20 sps:$4 sm:$0xff]  }
 0x11c   :  { %v4233_v18 = vpop.f32.mrb[4].mxu1 }
 0x11d   :  { %v1357_v19 = vpop.f32.mrb[5].mxu1 }
 0x11e   :  { %v4241_v22 = vpop.f32.mrb[6].mxu1  ;;  %v3608_v19 = vld [vmem:[%s4651_s0 + $0x3a4] ss:$20 sps:$4 sm:$0xff]  }
 0x11f   :  { %v1360_v24 = vpop.f32.mrb[7].mxu1 }
 0x120   :  { %v3610_v24 = vld [vmem:[%s4651_s0 + $0x3a0] ss:$20 sps:$4 sm:$0xff]  }
 0x121   :  { %1570 = vmatmul.mubr.bf16.gmra.mrb[112].mxu1 %v3574_v20 }
 0x122   :  { %3062 = vmatmul.mubr.msk.bf16.gmra.mrb[52].mxu0 %vm1221_vm2, %v3575_v21  ;;  %1730 = vmatprep.mubr.bf16.mxu1 %v3578_v23 }
 0x123   :  { %3065 = vmatprep.mubr.msk.bf16.mxu0 %vm3635_vm1, %v3634_v39 }
 0x124   :  { %v4249_v25 = vpop.f32.mrb[8].mxu1 }
 0x125   :  { %v1365_v27 = vpop.f32.mrb[9].mxu1 }
 0x126   :  { %v4257_v29 = vpop.f32.mrb[10].mxu1 }
 0x127   :  { %v1368_v31 = vpop.f32.mrb[11].mxu1 }
 0x129   :  { %1731 = vmatmul.mubr.bf16.vlgmr.msra.gmra.mrb[60].mxu1 %v3576_v26  ;;  %v3611_v26 = vld [vmem:[%s4651_s0 + $0x380] ss:$20 sps:$4 sm:$0xff]  }
 0x12a   :  { %3066 = vmatmul.mubr.msk.bf16.gmra.mrb[56].mxu0 %vm1221_vm2, %v3579_v28  ;;  %1738 = vmatprep.mubr.bf16.mxu1 %v3580_v30  ;;  %v3612_v28 = vld [vmem:[%s4651_s0 + $0x3cc] ss:$20 sps:$4 sm:$0xff]  }
 0x12b   :  { %3069 = vmatprep.mubr.msk.bf16.mxu0 %vm3635_vm1, %v3634_v39 }
 0x12c   :  { %v4265_v32 = vpop.f32.mrb[12].mxu1 }
 0x12d   :  { %v1373_v33 = vpop.f32.mrb[13].mxu1 }
 0x12e   :  { %v4273_v36 = vpop.f32.mrb[14].mxu1 }
 0x12f   :  { %v1376_v38 = vpop.f32.mrb[15].mxu1 }
 0x130   :  { %v3616_v38 = vld [vmem:[%s4651_s0 + $0x3f4] ss:$20 sps:$4 sm:$0xff]  }
 0x131   :  { %1739 = vmatmul.mubr.bf16.gmra.mrb[64].mxu1 %v3582_v34  ;;  %v3614_v34 = vld [vmem:[%s4651_s0 + $0x3c8] ss:$20 sps:$4 sm:$0xff]  }
 0x132   :  { %3070 = vmatmul.mubr.msk.bf16.gmra.mrb[60].mxu0 %vm1221_vm2, %v3583_v35  ;;  %1746 = vmatprep.mubr.bf16.mxu1 %v3584_v37  ;;  %v3615_v35 = vld [vmem:[%s4651_s0 + $0x3a8] ss:$20 sps:$4 sm:$0xff]  }
 0x133   :  { %3073 = vmatprep.mubr.msk.bf16.mxu0 %vm3635_vm1, %v3634_v39 }
 0x134   :  { %v4281_v40 = vpop.f32.mrb[16].mxu1 }
 0x135   :  { %v1381_v41 = vpop.f32.mrb[17].mxu1 }
 0x136   :  { %v4289_v44 = vpop.f32.mrb[18].mxu1 }
 0x137   :  { %v1384_v46 = vpop.f32.mrb[19].mxu1 }
 0x138   :  { %v3619_v46 = vld [vmem:[%s4651_s0 + $0x3d0] ss:$20 sps:$4 sm:$0xff]  }
 0x139   :  { %1747 = vmatmul.mubr.bf16.gmra.mrb[68].mxu1 %v3586_v42 }
 0x13a   :  { %3074 = vmatmul.mubr.msk.bf16.gmra.mrb[64].mxu0 %vm1221_vm2, %v3587_v43  ;;  %1754 = vmatprep.mubr.bf16.mxu1 %v3588_v45  ;;  %v3618_v45 = vld [vmem:[%s4651_s0 + $0x3f0] ss:$20 sps:$4 sm:$0xff]  }
 0x13b   :  { %3077 = vmatprep.mubr.msk.bf16.mxu0 %vm3635_vm1, %v3634_v39 }
 0x13c   :  { %v4297_v47 = vpop.f32.mrb[20].mxu1 }
 0x13d   :  { %v1389_v48 = vpop.f32.mrb[21].mxu1 }
 0x13e   :  { %v4305_v51 = vpop.f32.mrb[22].mxu1 }
 0x13f   :  { %v1392_v53 = vpop.f32.mrb[23].mxu1 }
 0x141   :  { %1755 = vmatmul.mubr.bf16.gmra.mrb[72].mxu1 %v3590_v49  ;;  %v3620_v49 = vld [vmem:[%s4651_s0 + $0x41c] ss:$20 sps:$4 sm:$0xff]  }
 0x142   :  { %3078 = vmatmul.mubr.msk.bf16.gmra.mrb[68].mxu0 %vm1221_vm2, %v3591_v50  ;;  %1762 = vmatprep.mubr.bf16.mxu1 %v3592_v52 }
 0x143   :  { %3081 = vmatprep.mubr.msk.bf16.mxu0 %vm3635_vm1, %v3634_v39 }
 0x144   :  { %v4313_v54 = vpop.f32.mrb[24].mxu1 }
 0x145   :  { %v1397_v55 = vpop.f32.mrb[25].mxu1 }
 0x146   :  { %v4321_v58 = vpop.f32.mrb[26].mxu1  ;;  %v3622_v55 = vld [vmem:[%s4651_s0 + $0x418] ss:$20 sps:$4 sm:$0xff]  }
 0x147   :  { %v1400_v60 = vpop.f32.mrb[27].mxu1 }
 0x149   :  { %1763 = vmatmul.mubr.bf16.gmra.mrb[76].mxu1 %v3594_v56  ;;  %v3623_v56 = vld [vmem:[%s4651_s0 + $0x3f8] ss:$20 sps:$4 sm:$0xff]  }
 0x14a   :  { %3082 = vmatmul.mubr.msk.bf16.gmra.mrb[72].mxu0 %vm1221_vm2, %v3595_v57  ;;  %1770 = vmatprep.mubr.bf16.mxu1 %v3596_v59  ;;  %v3624_v59 = vld [vmem:[%s4651_s0 + $0x444] ss:$20 sps:$4 sm:$0xff]  }
 0x14b   :  { %3085 = vmatprep.mubr.msk.bf16.mxu0 %vm3635_vm1, %v3634_v39 }
 0x14c   :  { %v4329_v61 = vpop.f32.mrb[28].mxu1 }
 0x14d   :  { %v1405_v62 = vpop.f32.mrb[29].mxu1 }
 0x14e   :  { %v4337_v2 = vpop.f32.mrb[30].mxu1 }
 0x14f   :  { %v1408_v4 = vpop.f32.mrb[31].mxu1 }
 0x151   :  { %1771 = vmatmul.mubr.bf16.gmra.mrb[80].mxu1 %v3598_v63 }
 0x152   :  { %3086 = vmatmul.mubr.msk.bf16.gmra.mrb[76].mxu0 %vm1221_vm2, %v3599_v1  ;;  %1778 = vmatprep.mubr.bf16.mxu1 %v3600_v3  ;;  %v3626_v1 = vld [vmem:[%s4651_s0 + $0x440] ss:$20 sps:$4 sm:$0xff]  }
 0x153   :  { %3089 = vmatprep.mubr.msk.bf16.mxu0 %vm3635_vm1, %v3634_v39  ;;  %v3627_v3 = vld [vmem:[%s4651_s0 + $0x420] ss:$20 sps:$4 sm:$0xff]  }
 0x154   :  { %v4345_v5 = vpop.f32.mrb[32].mxu1 }
 0x155   :  { %v1413_v6 = vpop.f32.mrb[33].mxu1 }
 0x156   :  { %v4353_v9 = vpop.f32.mrb[34].mxu1  ;;  %v3628_v6 = vld [vmem:[%s4651_s0 + $0x46c] ss:$20 sps:$4 sm:$0xff]  }
 0x157   :  { %v1416_v11 = vpop.f32.mrb[35].mxu1 }
 0x159   :  { %1779 = vmatmul.mubr.bf16.gmra.mrb[84].mxu1 %v3602_v7 }
 0x15a   :  { %3090 = vmatmul.mubr.msk.bf16.gmra.mrb[80].mxu0 %vm1221_vm2, %v3603_v8  ;;  %1786 = vmatprep.mubr.bf16.mxu1 %v3604_v10  ;;  %v4457_v8 = vld [vmem:[%s4652_s2] ss:$0 sm:$0xff] }
 0x15b   :  { %3093 = vmatprep.mubr.msk.bf16.mxu0 %vm3635_vm1, %v3634_v39  ;;  %v1348_v10 = vadd.f32 %v4457_v8, %v4217_v12 }
 0x15c   :  { %v4361_v13 = vpop.f32.mrb[36].mxu1 }
 0x15d   :  { %v1421_v14 = vpop.f32.mrb[37].mxu1 }
 0x15e   :  { %v4369_v17 = vpop.f32.mrb[38].mxu1  ;;  %v3630_v14 = vld [vmem:[%s4651_s0 + $0x468] ss:$20 sps:$4 sm:$0xff]  }
 0x15f   :  { %v1424_v20 = vpop.f32.mrb[39].mxu1 }
 0x160   :  { %v3631_v20 = vld [vmem:[%s4651_s0 + $0x448] ss:$20 sps:$4 sm:$0xff]  }
 0x161   :  { %1787 = vmatmul.mubr.bf16.gmra.mrb[88].mxu1 %v3606_v15  ;;  %v1351_v15 = vadd.f32 %v4457_v8, %v4225_v0  ;;  %v1356_v0 = vadd.f32 %v4457_v8, %v4233_v18 }
 0x162   :  { %3094 = vmatmul.mubr.msk.bf16.gmra.mrb[84].mxu0 %vm1221_vm2, %v3607_v16  ;;  %1794 = vmatprep.mubr.bf16.mxu1 %v3608_v19 }
 0x163   :  { %3097 = vmatprep.mubr.msk.bf16.mxu0 %vm3635_vm1, %v3634_v39 }
 0x164   :  { %v4377_v21 = vpop.f32.mrb[40].mxu1 }
 0x165   :  { %v1429_v23 = vpop.f32.mrb[41].mxu1 }
 0x166   :  { %v4385_v27 = vpop.f32.mrb[42].mxu1 }
 0x167   :  { %v1432_v30 = vpop.f32.mrb[43].mxu1 }
 0x169   :  { %1795 = vmatmul.mubr.bf16.gmra.mrb[92].mxu1 %v3610_v24 }
 0x16a   :  { %3098 = vmatmul.mubr.msk.bf16.gmra.mrb[88].mxu0 %vm1221_vm2, %v3611_v26  ;;  %1802 = vmatprep.mubr.bf16.mxu1 %v3612_v28 }
 0x16b   :  { %3101 = vmatprep.mubr.msk.bf16.mxu0 %vm3635_vm1, %v3634_v39 }
 0x16c   :  { %v4393_v31 = vpop.f32.mrb[44].mxu1 }
 0x16d   :  { %v1437_v33 = vpop.f32.mrb[45].mxu1 }
 0x16e   :  { %v4401_v37 = vpop.f32.mrb[46].mxu1 }
 0x16f   :  { %v1440_v41 = vpop.f32.mrb[47].mxu1 }
 0x170   :  { %v3632_v41 = vld [vmem:[%s4651_s0 + $0x470] ss:$20 sps:$4 sm:$0xff]  }
 0x171   :  { %1803 = vmatmul.mubr.bf16.gmra.mrb[96].mxu1 %v3614_v34  ;;  %v1359_v34 = vadd.f32 %v4457_v8, %v4241_v22  ;;  %v1364_v22 = vadd.f32 %v4457_v8, %v4249_v25 }
 0x172   :  { %3102 = vmatmul.mubr.msk.bf16.gmra.mrb[92].mxu0 %vm1221_vm2, %v3615_v35  ;;  %1810 = vmatprep.mubr.bf16.mxu1 %v3616_v38 }
 0x173   :  { %3105 = vmatprep.mubr.msk.bf16.mxu0 %vm3635_vm1, %v3634_v39 }
 0x174   :  { %v4409_v42 = vpop.f32.mrb[48].mxu1 }
 0x175   :  { %v1445_v43 = vpop.f32.mrb[49].mxu1 }
 0x176   :  { %v4417_v48 = vpop.f32.mrb[50].mxu1 }
 0x177   :  { %v1448_v50 = vpop.f32.mrb[51].mxu1 }
 0x179   :  { %1811 = vmatmul.mubr.bf16.gmra.mrb[100].mxu1 %v3618_v45 }
 0x17a   :  { %3106 = vmatmul.mubr.msk.bf16.gmra.mrb[96].mxu0 %vm1221_vm2, %v3619_v46  ;;  %1818 = vmatprep.mubr.bf16.mxu1 %v3620_v49 }
 0x17b   :  { %3109 = vmatprep.mubr.msk.bf16.mxu0 %vm3635_vm1, %v3634_v39 }
 0x17c   :  { %v4425_v52 = vpop.f32.mrb[52].mxu1 }
 0x17d   :  { %v1453_v53 = vpop.f32.mrb[53].mxu1 }
 0x17e   :  { %v4433_v57 = vpop.f32.mrb[54].mxu1  ;;  %v1367_v53 = vadd.f32 %v4457_v8, %v4257_v29 }
 0x17f   :  { %v1456_v60 = vpop.f32.mrb[55].mxu1 }
 0x181   :  { %1819 = vmatmul.mubr.bf16.gmra.mrb[104].mxu1 %v3622_v55 }
 0x182   :  { %3110 = vmatmul.mubr.msk.bf16.gmra.mrb[100].mxu0 %vm1221_vm2, %v3623_v56  ;;  %1826 = vmatprep.mubr.bf16.mxu1 %v3624_v59 }
 0x183   :  { %3113 = vmatprep.mubr.msk.bf16.mxu0 %vm3635_vm1, %v3634_v39 }
 0x184   :  { %v4441_v62 = vpop.f32.mrb[56].mxu1 }
 0x185   :  { %v1461_v63 = vpop.f32.mrb[57].mxu1 }
 0x186   :  { %v4449_v4 = vpop.f32.mrb[58].mxu1 }
 0x187   :  { %v1464_v7 = vpop.f32.mrb[59].mxu1 }
 0x189   :  { %1827 = vmatmul.mubr.bf16.gmra.mrb[108].mxu1 %v3626_v1 }
 0x18a   :  { %3114 = vmatmul.mubr.msk.bf16.gmra.mrb[104].mxu0 %vm1221_vm2, %v3627_v3  ;;  %1834 = vmatprep.mubr.bf16.mxu1 %v3628_v6  ;;  %v1372_v6 = vadd.f32 %v4457_v8, %v4265_v32 }
 0x18b   :  { %3117 = vmatprep.mubr.msk.bf16.mxu0 %vm3635_vm1, %v3634_v39 }
 0x18d   :  { %v1877_v11 = vpop.f32.mrb[0].mxu0 }
 0x18e   :  { %v3158_v16 = vadd.f32 %v1877_v11, %v1348_v10  ;;  %v3011_v19 = vpop.f32.mrb[1].mxu0  ;;  %v1375_v10 = vadd.f32 %v4457_v8, %v4273_v36 }
 0x18f   :  { %v1880_v23 = vpop.f32.mrb[2].mxu0 }
 0x190   :  { %v3160_v24 = vadd.f32 %v1880_v23, %v1351_v15  ;;  %v3012_v26 = vpop.f32.mrb[3].mxu0  ;;  %v2108_v28 = vmax.f32 %v3158_v16, 0.0  ;;  %v1380_v23 = vadd.f32 %v4457_v8, %v4281_v40 }
 0x191   :  { %1835 = vmatmul.mubr.bf16.gmra.mrb[112].mxu1 %v3630_v14  ;;  %v1383_v26 = vadd.f32 %v4457_v8, %v4289_v44 }
 0x192   :  { %v2109_v12 = vmax.f32 %v3160_v24, 0.0  ;;  %3118 = vmatmul.mubr.msk.bf16.gmra.mrb[108].mxu0 %vm1221_vm2, %v3631_v20 }
 0x193   :  { %3121 = vmatprep.mubr.msk.bf16.mxu0 %vm3635_vm1, %v3634_v39 }
 0x194   :  { %v2792_v30 = vpack.c.bf16 %v2109_v12, %v2108_v28 }
 0x195   :  { %v1885_v33 = vpop.f32.mrb[4].mxu0 }
 0x196   :  { %2793 = vst [vmem:[%s4653_s3] sm:$0xff] %v2792_v30   ;;  %v3162_v35 = vadd.f32 %v1885_v33, %v1356_v0  ;;  %v3015_v38 = vpop.f32.mrb[5].mxu0 }
 0x197   :  { %v1888_v43 = vpop.f32.mrb[6].mxu0 }
 0x198   :  { %v3164_v39 = vadd.f32 %v1888_v43, %v1359_v34  ;;  %v3016_v45 = vpop.f32.mrb[7].mxu0  ;;  %v2110_v46 = vmax.f32 %v3162_v35, 0.0  ;;  %v1388_v35 = vadd.f32 %v4457_v8, %v4297_v47 }
 0x19a   :  { %v2111_v18 = vmax.f32 %v3164_v39, 0.0  ;;  %3122 = vmatmul.mubr.msk.bf16.gmra.mrb[112].mxu0 %vm1221_vm2, %v3632_v41  ;;  %v1391_v41 = vadd.f32 %v4457_v8, %v4305_v51 }
 0x19c   :  { %v2797_v49 = vpack.c.bf16 %v2111_v18, %v2110_v46 }
 0x19d   :  { %v1893_v50 = vpop.f32.mrb[8].mxu0 }
 0x19e   :  { %2934 = vst [vmem:[%s4653_s3 + $0x8] sm:$0xff] %v2797_v49   ;;  %v3166_v55 = vadd.f32 %v1893_v50, %v1364_v22  ;;  %v3019_v56 = vpop.f32.mrb[9].mxu0  ;;  %v1396_v49 = vadd.f32 %v4457_v8, %v4313_v54 }
 0x19f   :  { %v1896_v59 = vpop.f32.mrb[10].mxu0 }
 0x1a0   :  { %v3168_v60 = vadd.f32 %v1896_v59, %v1367_v53  ;;  %v3020_v63 = vpop.f32.mrb[11].mxu0  ;;  %v2112_v1 = vmax.f32 %v3166_v55, 0.0  ;;  %v1399_v53 = vadd.f32 %v4457_v8, %v4321_v58 }
 0x1a2   :  { %v2113_v3 = vmax.f32 %v3168_v60, 0.0 }
 0x1a4   :  { %v2802_v25 = vpack.c.bf16 %v2113_v3, %v2112_v1  ;;  %v1404_v3 = vadd.f32 %v4457_v8, %v4329_v61 }
 0x1a5   :  { %v1901_v7 = vpop.f32.mrb[12].mxu0 }
 0x1a6   :  { %2935 = vst [vmem:[%s4653_s3 + $0x10] sm:$0xff] %v2802_v25   ;;  %v3170_v29 = vadd.f32 %v1901_v7, %v1372_v6  ;;  %v3023_v11 = vpop.f32.mrb[13].mxu0  ;;  %v1407_v25 = vadd.f32 %v4457_v8, %v4337_v2 }
 0x1a7   :  { %v1904_v14 = vpop.f32.mrb[14].mxu0 }
 0x1a8   :  { %v3172_v15 = vadd.f32 %v1904_v14, %v1375_v10  ;;  %v3024_v16 = vpop.f32.mrb[15].mxu0  ;;  %v2114_v19 = vmax.f32 %v3170_v29, 0.0 }
 0x1a9   :  { %v1412_v16 = vadd.f32 %v4457_v8, %v4345_v5 }
 0x1aa   :  { %v2115_v20 = vmax.f32 %v3172_v15, 0.0 }
 0x1ac   :  { %v2807_v32 = vpack.c.bf16 %v2115_v20, %v2114_v19  ;;  %v1415_v20 = vadd.f32 %v4457_v8, %v4353_v9 }
 0x1ad   :  { %v1909_v24 = vpop.f32.mrb[16].mxu0 }
 0x1ae   :  { %2936 = vst [vmem:[%s4653_s3 + $0x18] sm:$0xff] %v2807_v32   ;;  %v3174_v36 = vadd.f32 %v1909_v24, %v1380_v23  ;;  %v3027_v28 = vpop.f32.mrb[17].mxu0 }
 0x1af   :  { %v1912_v12 = vpop.f32.mrb[18].mxu0 }
 0x1b0   :  { %v3176_v0 = vadd.f32 %v1912_v12, %v1383_v26  ;;  %v3028_v30 = vpop.f32.mrb[19].mxu0  ;;  %v2116_v33 = vmax.f32 %v3174_v36, 0.0  ;;  %v1420_v12 = vadd.f32 %v4457_v8, %v4361_v13 }
 0x1b1   :  { %v1423_v30 = vadd.f32 %v4457_v8, %v4369_v17 }
 0x1b2   :  { %v2117_v34 = vmax.f32 %v3176_v0, 0.0 }
 0x1b4   :  { %v2812_v40 = vpack.c.bf16 %v2117_v34, %v2116_v33 }
 0x1b5   :  { %v1917_v38 = vpop.f32.mrb[20].mxu0 }
 0x1b6   :  { %2937 = vst [vmem:[%s4653_s3 + $0x20] sm:$0xff] %v2812_v40   ;;  %v3178_v44 = vadd.f32 %v1917_v38, %v1388_v35  ;;  %v3031_v43 = vpop.f32.mrb[21].mxu0 }
 0x1b7   :  { %v1920_v39 = vpop.f32.mrb[22].mxu0 }
 0x1b8   :  { %v3180_v45 = vadd.f32 %v1920_v39, %v1391_v41  ;;  %v3032_v46 = vpop.f32.mrb[23].mxu0  ;;  %v2118_v18 = vmax.f32 %v3178_v44, 0.0  ;;  %v1428_v44 = vadd.f32 %v4457_v8, %v4377_v21  ;;  %v1431_v39 = vadd.f32 %v4457_v8, %v4385_v27 }
 0x1ba   :  { %v2119_v22 = vmax.f32 %v3180_v45, 0.0 }
 0x1bc   :  { %v2817_v47 = vpack.c.bf16 %v2119_v22, %v2118_v18 }
 0x1bd   :  { %v1925_v50 = vpop.f32.mrb[24].mxu0 }
 0x1be   :  { %2938 = vst [vmem:[%s4653_s3 + $0x28] sm:$0xff] %v2817_v47   ;;  %v3182_v51 = vadd.f32 %v1925_v50, %v1396_v49  ;;  %v3035_v55 = vpop.f32.mrb[25].mxu0  ;;  %v1436_v50 = vadd.f32 %v4457_v8, %v4393_v31 }
 0x1bf   :  { %v1928_v56 = vpop.f32.mrb[26].mxu0 }
 0x1c0   :  { %v3184_v59 = vadd.f32 %v1928_v56, %v1399_v53  ;;  %v3036_v60 = vpop.f32.mrb[27].mxu0  ;;  %v2120_v63 = vmax.f32 %v3182_v51, 0.0  ;;  %v1439_v51 = vadd.f32 %v4457_v8, %v4401_v37 }
 0x1c2   :  { %v2121_v1 = vmax.f32 %v3184_v59, 0.0 }
 0x1c4   :  { %v2822_v54 = vpack.c.bf16 %v2121_v1, %v2120_v63 }
 0x1c5   :  { %v1933_v6 = vpop.f32.mrb[28].mxu0 }
 0x1c6   :  { %2939 = vst [vmem:[%s4653_s3 + $0x30] sm:$0xff] %v2822_v54   ;;  %v3186_v58 = vadd.f32 %v1933_v6, %v1404_v3  ;;  %v3039_v7 = vpop.f32.mrb[29].mxu0  ;;  %v1444_v3 = vadd.f32 %v4457_v8, %v4409_v42  ;;  %v1447_v6 = vadd.f32 %v4457_v8, %v4417_v48 }
 0x1c7   :  { %v1936_v10 = vpop.f32.mrb[30].mxu0 }
 0x1c8   :  { %v3188_v29 = vadd.f32 %v1936_v10, %v1407_v25  ;;  %v3040_v11 = vpop.f32.mrb[31].mxu0  ;;  %v2122_v14 = vmax.f32 %v3186_v58, 0.0 }
 0x1ca   :  { %v2123_v15 = vmax.f32 %v3188_v29, 0.0 }
 0x1cc   :  { %v2827_v61 = vpack.c.bf16 %v2123_v15, %v2122_v14  ;;  %v1452_v14 = vadd.f32 %v4457_v8, %v4425_v52 }
 0x1cd   :  { %v1941_v19 = vpop.f32.mrb[32].mxu0 }
 0x1ce   :  { %2940 = vst [vmem:[%s4653_s3 + $0x38] sm:$0xff] %v2827_v61   ;;  %v3190_v2 = vadd.f32 %v1941_v19, %v1412_v16  ;;  %v3043_v23 = vpop.f32.mrb[33].mxu0  ;;  %v1455_v16 = vadd.f32 %v4457_v8, %v4433_v57  ;;  %v1463_v57 = vadd.f32 %v4457_v8, %v4449_v4 }
 0x1cf   :  { %v1944_v32 = vpop.f32.mrb[34].mxu0 }
 0x1d0   :  { %v3192_v24 = vadd.f32 %v1944_v32, %v1415_v20  ;;  %v3044_v26 = vpop.f32.mrb[35].mxu0  ;;  %v2124_v36 = vmax.f32 %v3190_v2, 0.0 }
 0x1d2   :  { %v2125_v28 = vmax.f32 %v3192_v24, 0.0  ;;  %v1460_v24 = vadd.f32 %v4457_v8, %v4441_v62 }
 0x1d4   :  { %v2832_v5 = vpack.c.bf16 %v2125_v28, %v2124_v36 }
 0x1d5   :  { %v1949_v0 = vpop.f32.mrb[36].mxu0 }
 0x1d6   :  { %2941 = vst [vmem:[%s4653_s3 + $0x40] sm:$0xff] %v2832_v5   ;;  %v3194_v9 = vadd.f32 %v1949_v0, %v1420_v12  ;;  %v3047_v33 = vpop.f32.mrb[37].mxu0 }
 0x1d7   :  { %v1952_v34 = vpop.f32.mrb[38].mxu0 }
 0x1d8   :  { %v3196_v35 = vadd.f32 %v1952_v34, %v1423_v30  ;;  %v3048_v40 = vpop.f32.mrb[39].mxu0  ;;  %v2126_v38 = vmax.f32 %v3194_v9, 0.0 }
 0x1da   :  { %v2127_v41 = vmax.f32 %v3196_v35, 0.0 }
 0x1dc   :  { %v2837_v13 = vpack.c.bf16 %v2127_v41, %v2126_v38 }
 0x1dd   :  { %v1957_v43 = vpop.f32.mrb[40].mxu0 }
 0x1de   :  { %2942 = vst [vmem:[%s4653_s3 + $0x48] sm:$0xff] %v2837_v13   ;;  %v3198_v17 = vadd.f32 %v1957_v43, %v1428_v44  ;;  %v3051_v45 = vpop.f32.mrb[41].mxu0 }
 0x1df   :  { %v1960_v46 = vpop.f32.mrb[42].mxu0 }
 0x1e0   :  { %v3200_v18 = vadd.f32 %v1960_v46, %v1431_v39  ;;  %v3052_v22 = vpop.f32.mrb[43].mxu0  ;;  %v2128_v49 = vmax.f32 %v3198_v17, 0.0 }
 0x1e2   :  { %v2129_v47 = vmax.f32 %v3200_v18, 0.0 }
 0x1e4   :  { %v2842_v21 = vpack.c.bf16 %v2129_v47, %v2128_v49 }
 0x1e5   :  { %v1965_v53 = vpop.f32.mrb[44].mxu0 }
 0x1e6   :  { %2943 = vst [vmem:[%s4653_s3 + $0x50] sm:$0xff] %v2842_v21   ;;  %v3202_v27 = vadd.f32 %v1965_v53, %v1436_v50  ;;  %v3055_v55 = vpop.f32.mrb[45].mxu0 }
 0x1e7   :  { %v1968_v56 = vpop.f32.mrb[46].mxu0 }
 0x1e8   :  { %v3204_v59 = vadd.f32 %v1968_v56, %v1439_v51  ;;  %v3056_v60 = vpop.f32.mrb[47].mxu0  ;;  %v2130_v63 = vmax.f32 %v3202_v27, 0.0 }
 0x1ea   :  { %v2131_v1 = vmax.f32 %v3204_v59, 0.0 }
 0x1ec   :  { %v2847_v31 = vpack.c.bf16 %v2131_v1, %v2130_v63 }
 0x1ed   :  { %v1973_v54 = vpop.f32.mrb[48].mxu0 }
 0x1ee   :  { %2944 = vst [vmem:[%s4653_s3 + $0x58] sm:$0xff] %v2847_v31   ;;  %v3206_v37 = vadd.f32 %v1973_v54, %v1444_v3  ;;  %v3059_v25 = vpop.f32.mrb[49].mxu0 }
 0x1ef   :  { %v1976_v58 = vpop.f32.mrb[50].mxu0 }
 0x1f0   :  { %v3208_v7 = vadd.f32 %v1976_v58, %v1447_v6  ;;  %v3060_v10 = vpop.f32.mrb[51].mxu0  ;;  %v2132_v29 = vmax.f32 %v3206_v37, 0.0 }
 0x1f2   :  { %v2133_v11 = vmax.f32 %v3208_v7, 0.0 }
 0x1f4   :  { %v2852_v42 = vpack.c.bf16 %v2133_v11, %v2132_v29 }
 0x1f5   :  { %v1981_v15 = vpop.f32.mrb[52].mxu0 }
 0x1f6   :  { %2945 = vst [vmem:[%s4653_s3 + $0x60] sm:$0xff] %v2852_v42   ;;  %v3210_v48 = vadd.f32 %v1981_v15, %v1452_v14  ;;  %v3063_v61 = vpop.f32.mrb[53].mxu0 }
 0x1f7   :  { %v1984_v19 = vpop.f32.mrb[54].mxu0 }
 0x1f8   :  { %v3212_v20 = vadd.f32 %v1984_v19, %v1455_v16  ;;  %v3064_v2 = vpop.f32.mrb[55].mxu0  ;;  %v2134_v23 = vmax.f32 %v3210_v48, 0.0 }
 0x1fa   :  { %v2135_v32 = vmax.f32 %v3212_v20, 0.0 }
 0x1fc   :  { %v2857_v52 = vpack.c.bf16 %v2135_v32, %v2134_v23  ;;  %v1732_v26 = vpop.f32.mrb[60].mxu1 }
 0x1fd   :  { %v1989_v36 = vpop.f32.mrb[56].mxu0  ;;  %v1734_v28 = vpop.f32.mrb[61].mxu1  ;;  %v3217_v40 = vadd.f32 %v4457_v8, %v1732_v26 }
 0x1fe   :  { %2946 = vst [vmem:[%s4653_s3 + $0x68] sm:$0xff] %v2857_v52   ;;  %v3214_v12 = vadd.f32 %v1989_v36, %v1460_v24  ;;  %v3067_v5 = vpop.f32.mrb[57].mxu0  ;;  %v1735_v0 = vpop.f32.mrb[62].mxu1 }
 0x1ff   :  { %v1992_v30 = vpop.f32.mrb[58].mxu0  ;;  %v1737_v9 = vpop.f32.mrb[63].mxu1  ;;  %v3219_v4 = vadd.f32 %v4457_v8, %v1735_v0 }
 0x200   :  { %v3216_v33 = vadd.f32 %v1992_v30, %v1463_v57  ;;  %v3068_v34 = vpop.f32.mrb[59].mxu0  ;;  %v2136_v35 = vmax.f32 %v3214_v12, 0.0 }
 0x202   :  { %v2137_v62 = vmax.f32 %v3216_v33, 0.0 }
 0x204   :  { %v2862_v38 = vpack.c.bf16 %v2137_v62, %v2136_v35  ;;  %v1740_v41 = vpop.f32.mrb[64].mxu1 }
 0x205   :  { %v1997_v44 = vpop.f32.mrb[60].mxu0  ;;  %v1742_v13 = vpop.f32.mrb[65].mxu1  ;;  %v3221_v50 = vadd.f32 %v4457_v8, %v1740_v41 }
 0x206   :  { %2947 = vst [vmem:[%s4653_s3 + $0x70] sm:$0xff] %v2862_v38   ;;  %v3218_v43 = vadd.f32 %v3217_v40, %v1997_v44  ;;  %v3071_v39 = vpop.f32.mrb[61].mxu0  ;;  %v1743_v17 = vpop.f32.mrb[66].mxu1 }
 0x207   :  { %v2000_v45 = vpop.f32.mrb[62].mxu0  ;;  %v1745_v46 = vpop.f32.mrb[67].mxu1  ;;  %v3223_v55 = vadd.f32 %v4457_v8, %v1743_v17 }
 0x208   :  { %v3220_v18 = vadd.f32 %v3219_v4, %v2000_v45  ;;  %v3072_v22 = vpop.f32.mrb[63].mxu0  ;;  %v2138_v49 = vmax.f32 %v3218_v43, 0.0 }
 0x20a   :  { %v2139_v47 = vmax.f32 %v3220_v18, 0.0 }
 0x20c   :  { %v2867_v21 = vpack.c.bf16 %v2139_v47, %v2138_v49  ;;  %v1748_v53 = vpop.f32.mrb[68].mxu1 }
 0x20d   :  { %v2005_v51 = vpop.f32.mrb[64].mxu0  ;;  %v1750_v27 = vpop.f32.mrb[69].mxu1  ;;  %v3225_v37 = vadd.f32 %v4457_v8, %v1748_v53 }
 0x20e   :  { %2948 = vst [vmem:[%s4653_s3 + $0x78] sm:$0xff] %v2867_v21   ;;  %v3222_v56 = vadd.f32 %v3221_v50, %v2005_v51  ;;  %v3075_v59 = vpop.f32.mrb[65].mxu0  ;;  %v1751_v60 = vpop.f32.mrb[70].mxu1 }
 0x20f   :  { %v2008_v63 = vpop.f32.mrb[66].mxu0  ;;  %v1753_v1 = vpop.f32.mrb[71].mxu1  ;;  %v3227_v29 = vadd.f32 %v4457_v8, %v1751_v60 }
 0x210   :  { %v3224_v3 = vadd.f32 %v3223_v55, %v2008_v63  ;;  %v3076_v31 = vpop.f32.mrb[67].mxu0  ;;  %v2140_v54 = vmax.f32 %v3222_v56, 0.0 }
 0x212   :  { %v2141_v6 = vmax.f32 %v3224_v3, 0.0 }
 0x214   :  { %v2872_v25 = vpack.c.bf16 %v2141_v6, %v2140_v54  ;;  %v1756_v58 = vpop.f32.mrb[72].mxu1 }
 0x215   :  { %v2013_v7 = vpop.f32.mrb[68].mxu0  ;;  %v1758_v10 = vpop.f32.mrb[73].mxu1  ;;  %v3229_v2 = vadd.f32 %v4457_v8, %v1756_v58 }
 0x216   :  { %2949 = vst [vmem:[%s4653_s3 + $0x80] sm:$0xff] %v2872_v25   ;;  %v3226_v11 = vadd.f32 %v3225_v37, %v2013_v7  ;;  %v3079_v14 = vpop.f32.mrb[69].mxu0  ;;  %v1759_v42 = vpop.f32.mrb[74].mxu1 }
 0x217   :  { %v2016_v15 = vpop.f32.mrb[70].mxu0  ;;  %v1761_v16 = vpop.f32.mrb[75].mxu1  ;;  %v3231_v26 = vadd.f32 %v4457_v8, %v1759_v42 }
 0x218   :  { %v3228_v48 = vadd.f32 %v3227_v29, %v2016_v15  ;;  %v3080_v61 = vpop.f32.mrb[71].mxu0  ;;  %v2142_v19 = vmax.f32 %v3226_v11, 0.0 }
 0x21a   :  { %v2143_v20 = vmax.f32 %v3228_v48, 0.0 }
 0x21c   :  { %v2877_v23 = vpack.c.bf16 %v2143_v20, %v2142_v19  ;;  %v1764_v32 = vpop.f32.mrb[76].mxu1 }
 0x21d   :  { %v2021_v24 = vpop.f32.mrb[72].mxu0  ;;  %v1766_v52 = vpop.f32.mrb[77].mxu1  ;;  %v3233_v34 = vadd.f32 %v4457_v8, %v1764_v32 }
 0x21e   :  { %2950 = vst [vmem:[%s4653_s3 + $0x88] sm:$0xff] %v2877_v23   ;;  %v3230_v36 = vadd.f32 %v3229_v2, %v2021_v24  ;;  %v3083_v28 = vpop.f32.mrb[73].mxu0  ;;  %v1767_v57 = vpop.f32.mrb[78].mxu1 }
 0x21f   :  { %v2024_v12 = vpop.f32.mrb[74].mxu0  ;;  %v1769_v5 = vpop.f32.mrb[79].mxu1  ;;  %v3235_v41 = vadd.f32 %v4457_v8, %v1767_v57 }
 0x220   :  { %v3232_v0 = vadd.f32 %v3231_v26, %v2024_v12  ;;  %v3084_v30 = vpop.f32.mrb[75].mxu0  ;;  %v2144_v9 = vmax.f32 %v3230_v36, 0.0 }
 0x222   :  { %v2145_v33 = vmax.f32 %v3232_v0, 0.0 }
 0x224   :  { %v2882_v35 = vpack.c.bf16 %v2145_v33, %v2144_v9  ;;  %v1772_v62 = vpop.f32.mrb[80].mxu1 }
 0x225   :  { %v2029_v40 = vpop.f32.mrb[76].mxu0  ;;  %v1774_v38 = vpop.f32.mrb[81].mxu1  ;;  %v3237_v22 = vadd.f32 %v4457_v8, %v1772_v62 }
 0x226   :  { %2951 = vst [vmem:[%s4653_s3 + $0x90] sm:$0xff] %v2882_v35   ;;  %v3234_v44 = vadd.f32 %v3233_v34, %v2029_v40  ;;  %v3087_v13 = vpop.f32.mrb[77].mxu0  ;;  %v1775_v4 = vpop.f32.mrb[82].mxu1 }
 0x227   :  { %v2032_v43 = vpop.f32.mrb[78].mxu0  ;;  %v1777_v39 = vpop.f32.mrb[83].mxu1  ;;  %v3239_v53 = vadd.f32 %v4457_v8, %v1775_v4 }
 0x228   :  { %v3236_v17 = vadd.f32 %v3235_v41, %v2032_v43  ;;  %v3088_v45 = vpop.f32.mrb[79].mxu0  ;;  %v2146_v46 = vmax.f32 %v3234_v44, 0.0 }
 0x22a   :  { %v2147_v18 = vmax.f32 %v3236_v17, 0.0 }
 0x22c   :  { %v2887_v49 = vpack.c.bf16 %v2147_v18, %v2146_v46  ;;  %v1780_v47 = vpop.f32.mrb[84].mxu1 }
 0x22d   :  { %v2037_v50 = vpop.f32.mrb[80].mxu0  ;;  %v1782_v21 = vpop.f32.mrb[85].mxu1  ;;  %v3241_v31 = vadd.f32 %v4457_v8, %v1780_v47 }
 0x22e   :  { %2952 = vst [vmem:[%s4653_s3 + $0x98] sm:$0xff] %v2887_v49   ;;  %v3238_v51 = vadd.f32 %v3237_v22, %v2037_v50  ;;  %v3091_v27 = vpop.f32.mrb[81].mxu0  ;;  %v1783_v55 = vpop.f32.mrb[86].mxu1 }
 0x22f   :  { %v2040_v56 = vpop.f32.mrb[82].mxu0  ;;  %v1785_v59 = vpop.f32.mrb[87].mxu1  ;;  %v3243_v58 = vadd.f32 %v4457_v8, %v1783_v55 }
 0x230   :  { %v3240_v60 = vadd.f32 %v3239_v53, %v2040_v56  ;;  %v3092_v63 = vpop.f32.mrb[83].mxu0  ;;  %v2148_v1 = vmax.f32 %v3238_v51, 0.0 }
 0x232   :  { %v2149_v3 = vmax.f32 %v3240_v60, 0.0 }
 0x234   :  { %v2892_v54 = vpack.c.bf16 %v2149_v3, %v2148_v1  ;;  %v1788_v6 = vpop.f32.mrb[88].mxu1 }
 0x235   :  { %v2045_v37 = vpop.f32.mrb[84].mxu0  ;;  %v1790_v25 = vpop.f32.mrb[89].mxu1  ;;  %v3245_v61 = vadd.f32 %v4457_v8, %v1788_v6 }
 0x236   :  { %2953 = vst [vmem:[%s4653_s3 + $0xa0] sm:$0xff] %v2892_v54   ;;  %v3242_v7 = vadd.f32 %v3241_v31, %v2045_v37  ;;  %v3095_v10 = vpop.f32.mrb[85].mxu0  ;;  %v1791_v29 = vpop.f32.mrb[90].mxu1 }
 0x237   :  { %v2048_v11 = vpop.f32.mrb[86].mxu0  ;;  %v1793_v14 = vpop.f32.mrb[91].mxu1  ;;  %v3247_v32 = vadd.f32 %v4457_v8, %v1791_v29 }
 0x238   :  { %v3244_v42 = vadd.f32 %v3243_v58, %v2048_v11  ;;  %v3096_v15 = vpop.f32.mrb[87].mxu0  ;;  %v2150_v16 = vmax.f32 %v3242_v7, 0.0 }
 0x23a   :  { %v2151_v48 = vmax.f32 %v3244_v42, 0.0 }
 0x23c   :  { %v2897_v19 = vpack.c.bf16 %v2151_v48, %v2150_v16  ;;  %v1796_v20 = vpop.f32.mrb[92].mxu1 }
 0x23d   :  { %v2053_v2 = vpop.f32.mrb[88].mxu0  ;;  %v1798_v23 = vpop.f32.mrb[93].mxu1  ;;  %v3249_v30 = vadd.f32 %v4457_v8, %v1796_v20 }
 0x23e   :  { %2954 = vst [vmem:[%s4653_s3 + $0xa8] sm:$0xff] %v2897_v19   ;;  %v3246_v24 = vadd.f32 %v3245_v61, %v2053_v2  ;;  %v3099_v52 = vpop.f32.mrb[89].mxu0  ;;  %v1799_v26 = vpop.f32.mrb[94].mxu1 }
 0x23f   :  { %v2056_v36 = vpop.f32.mrb[90].mxu0  ;;  %v1801_v28 = vpop.f32.mrb[95].mxu1  ;;  %v3251_v62 = vadd.f32 %v4457_v8, %v1799_v26 }
 0x240   :  { %v3248_v57 = vadd.f32 %v3247_v32, %v2056_v36  ;;  %v3100_v12 = vpop.f32.mrb[91].mxu0  ;;  %v2152_v5 = vmax.f32 %v3246_v24, 0.0 }
 0x242   :  { %v2153_v0 = vmax.f32 %v3248_v57, 0.0 }
 0x244   :  { %v2902_v9 = vpack.c.bf16 %v2153_v0, %v2152_v5  ;;  %v1804_v33 = vpop.f32.mrb[96].mxu1 }
 0x245   :  { %v2061_v34 = vpop.f32.mrb[92].mxu0  ;;  %v1806_v35 = vpop.f32.mrb[97].mxu1  ;;  %v3253_v45 = vadd.f32 %v4457_v8, %v1804_v33 }
 0x246   :  { %2955 = vst [vmem:[%s4653_s3 + $0xb0] sm:$0xff] %v2902_v9   ;;  %v3250_v40 = vadd.f32 %v3249_v30, %v2061_v34  ;;  %v3103_v38 = vpop.f32.mrb[93].mxu0  ;;  %v1807_v41 = vpop.f32.mrb[98].mxu1 }
 0x247   :  { %v2064_v44 = vpop.f32.mrb[94].mxu0  ;;  %v1809_v13 = vpop.f32.mrb[99].mxu1  ;;  %v3255_v47 = vadd.f32 %v4457_v8, %v1807_v41 }
 0x248   :  { %v3252_v4 = vadd.f32 %v3251_v62, %v2064_v44  ;;  %v3104_v43 = vpop.f32.mrb[95].mxu0  ;;  %v2154_v39 = vmax.f32 %v3250_v40, 0.0 }
 0x24a   :  { %v2155_v17 = vmax.f32 %v3252_v4, 0.0 }
 0x24c   :  { %v2907_v46 = vpack.c.bf16 %v2155_v17, %v2154_v39  ;;  %v1812_v18 = vpop.f32.mrb[100].mxu1 }
 0x24d   :  { %v2069_v22 = vpop.f32.mrb[96].mxu0  ;;  %v1814_v49 = vpop.f32.mrb[101].mxu1  ;;  %v3257_v63 = vadd.f32 %v4457_v8, %v1812_v18 }
 0x24e   :  { %2956 = vst [vmem:[%s4653_s3 + $0xb8] sm:$0xff] %v2907_v46   ;;  %v3254_v50 = vadd.f32 %v3253_v45, %v2069_v22  ;;  %v3107_v21 = vpop.f32.mrb[97].mxu0  ;;  %v1815_v53 = vpop.f32.mrb[102].mxu1 }
 0x24f   :  { %v2072_v51 = vpop.f32.mrb[98].mxu0  ;;  %v1817_v27 = vpop.f32.mrb[103].mxu1  ;;  %v3259_v6 = vadd.f32 %v4457_v8, %v1815_v53 }
 0x250   :  { %v3256_v55 = vadd.f32 %v3255_v47, %v2072_v51  ;;  %v3108_v56 = vpop.f32.mrb[99].mxu0  ;;  %v2156_v59 = vmax.f32 %v3254_v50, 0.0 }
 0x252   :  { %v2157_v60 = vmax.f32 %v3256_v55, 0.0 }
 0x254   :  { %v2912_v1 = vpack.c.bf16 %v2157_v60, %v2156_v59  ;;  %v1820_v3 = vpop.f32.mrb[104].mxu1 }
 0x255   :  { %v2077_v31 = vpop.f32.mrb[100].mxu0  ;;  %v1822_v54 = vpop.f32.mrb[105].mxu1  ;;  %v3261_v15 = vadd.f32 %v4457_v8, %v1820_v3 }
 0x256   :  { %2957 = vst [vmem:[%s4653_s3 + $0xc0] sm:$0xff] %v2912_v1   ;;  %v3258_v37 = vadd.f32 %v3257_v63, %v2077_v31  ;;  %v3111_v25 = vpop.f32.mrb[101].mxu0  ;;  %v1823_v58 = vpop.f32.mrb[106].mxu1 }
 0x257   :  { %v2080_v7 = vpop.f32.mrb[102].mxu0  ;;  %v1825_v10 = vpop.f32.mrb[107].mxu1  ;;  %v3263_v20 = vadd.f32 %v4457_v8, %v1823_v58 }
 0x258   :  { %v3260_v29 = vadd.f32 %v3259_v6, %v2080_v7  ;;  %v3112_v11 = vpop.f32.mrb[103].mxu0  ;;  %v2158_v14 = vmax.f32 %v3258_v37, 0.0 }
 0x25a   :  { %v2159_v42 = vmax.f32 %v3260_v29, 0.0 }
 0x25c   :  { %v2917_v16 = vpack.c.bf16 %v2159_v42, %v2158_v14  ;;  %v1828_v48 = vpop.f32.mrb[108].mxu1 }
 0x25d   :  { %v2085_v61 = vpop.f32.mrb[104].mxu0  ;;  %v1830_v19 = vpop.f32.mrb[109].mxu1  ;;  %v3265_v12 = vadd.f32 %v4457_v8, %v1828_v48 }
 0x25e   :  { %2958 = vst [vmem:[%s4653_s3 + $0xc8] sm:$0xff] %v2917_v16   ;;  %v3262_v2 = vadd.f32 %v3261_v15, %v2085_v61  ;;  %v3115_v23 = vpop.f32.mrb[105].mxu0  ;;  %v1831_v32 = vpop.f32.mrb[110].mxu1 }
 0x25f   :  { %v2088_v24 = vpop.f32.mrb[106].mxu0  ;;  %v1833_v52 = vpop.f32.mrb[111].mxu1  ;;  %v3267_v33 = vadd.f32 %v4457_v8, %v1831_v32 }
 0x260   :  { %v3264_v26 = vadd.f32 %v3263_v20, %v2088_v24  ;;  %v3116_v36 = vpop.f32.mrb[107].mxu0  ;;  %v2160_v28 = vmax.f32 %v3262_v2, 0.0 }
 0x262   :  { %v2161_v57 = vmax.f32 %v3264_v26, 0.0 }
 0x264   :  { %v2922_v5 = vpack.c.bf16 %v2161_v57, %v2160_v28  ;;  %v1836_v0 = vpop.f32.mrb[112].mxu1 }
 0x265   :  { %v2093_v30 = vpop.f32.mrb[108].mxu0  ;;  %v1838_v9 = vpop.f32.mrb[113].mxu1  ;;  %v3269_v43 = vadd.f32 %v4457_v8, %v1836_v0 }
 0x266   :  { %2959 = vst [vmem:[%s4653_s3 + $0xd0] sm:$0xff] %v2922_v5   ;;  %v3266_v34 = vadd.f32 %v3265_v12, %v2093_v30  ;;  %v3119_v35 = vpop.f32.mrb[109].mxu0  ;;  %v1839_v62 = vpop.f32.mrb[114].mxu1 }
 0x267   :  { %v2096_v40 = vpop.f32.mrb[110].mxu0  ;;  %v1841_v38 = vpop.f32.mrb[115].mxu1  ;;  %v3271_v45 = vadd.f32 %v4457_v8, %v1839_v62 }
 0x268   :  { %v3268_v41 = vadd.f32 %v3267_v33, %v2096_v40  ;;  %v3120_v44 = vpop.f32.mrb[111].mxu0  ;;  %v2162_v13 = vmax.f32 %v3266_v34, 0.0 }
 0x26a   :  { %v2163_v4 = vmax.f32 %v3268_v41, 0.0 }
 0x26c   :  { %v2927_v39 = vpack.c.bf16 %v2163_v4, %v2162_v13 }
 0x26d   :  { %v2101_v17 = vpop.f32.mrb[112].mxu0 }
 0x26e   :  { %2960 = vst [vmem:[%s4653_s3 + $0xd8] sm:$0xff] %v2927_v39   ;;  %v3270_v46 = vadd.f32 %v3269_v43, %v2101_v17  ;;  %v3123_v18 = vpop.f32.mrb[113].mxu0 }
 0x26f   :  { %v2104_v22 = vpop.f32.mrb[114].mxu0 }
 0x270   :  { %v3272_v49 = vadd.f32 %v3271_v45, %v2104_v22  ;;  %v3124_v47 = vpop.f32.mrb[115].mxu0  ;;  %v2164_v50 = vmax.f32 %v3270_v46, 0.0 }
 0x272   :  { %v2165_v21 = vmax.f32 %v3272_v49, 0.0 }
 0x274   :  { %v2932_v53 = vpack.c.bf16 %v2165_v21, %v2164_v50 }
 0x276   :  { %2961 = vst [vmem:[%s4653_s3 + $0xe0] sm:$0xff] %v2932_v53  }

// kernel: dave_forward.8
= control target key start
LH: loop header
LB: loop body
LE: loop exit
PB: predicated region body
PF: predicated region fallthrough
CT: control target
= control target key end

     0   :  { %v1433_v43 = vmov 0   ;;  %vm725_vm0 = vcmask 1041408   ;;  %vm709_vm1 = vcmask 31744   ;;  %s1819_s1 = inlined_call_operand.vmem [shape: bf16[900,128], index: 1, kind: input, shape index: {}]   ;;  %s1820_s0 = inlined_call_operand.vmem [shape: bf16[80,900], index: 0, kind: input, shape index: {}]   ;;  %s1821_s2 = inlined_call_operand.vmem [shape: f32[1,128], index: 2, kind: input, shape index: {}]   ;;  %s1822_s3 = inlined_call_operand.vmem [shape: bf16[80,128], index: 3, kind: output, shape index: {}]  }
   0x1   :  { %v1376_v0 = vld [vmem:[%s1819_s1 + $0x40] sm:$0xff]   ;;  %v1380_v4 = vld [vmem:[%s1819_s1 + $0x48] sm:$0xff]   ;;  %v1384_v8 = vld [vmem:[%s1819_s1 + $0x50] sm:$0xff]  }
   0x2   :  { %v1377_v1 = vld [vmem:[%s1819_s1] sm:$0xff]   ;;  %1237 = vmatprep.subr.bf16.mxu0 %v1376_v0  ;;  %v1381_v5 = vld [vmem:[%s1819_s1 + $0x8] sm:$0xff]   ;;  %v1385_v9 = vld [vmem:[%s1819_s1 + $0x10] sm:$0xff]  }
   0x3   :  { %v1378_v2 = vld [vmem:[%s1819_s1 + $0xc0] sm:$0xff]   ;;  %1238 = vmatpush3.bf16.msra.mxu0 %v1377_v1  ;;  %v1382_v6 = vld [vmem:[%s1819_s1 + $0xc8] sm:$0xff]   ;;  %v1386_v10 = vld [vmem:[%s1819_s1 + $0xd0] sm:$0xff]  }
   0x4   :  { %v1379_v3 = vld [vmem:[%s1819_s1 + $0x80] sm:$0xff]   ;;  %1283 = vmatprep.subr.bf16.mxu1 %v1378_v2  ;;  %1239 = vmatprep.subr.bf16.mxu0 %v1380_v4  ;;  %v1383_v7 = vld [vmem:[%s1819_s1 + $0x88] sm:$0xff]   ;;  %v1387_v11 = vld [vmem:[%s1819_s1 + $0x90] sm:$0xff]  }
   0x5   :  { %1284 = vmatpush3.bf16.msra.mxu1 %v1379_v3  ;;  %v1388_v12 = vld [vmem:[%s1819_s1 + $0x58] sm:$0xff]   ;;  %v1392_v16 = vld [vmem:[%s1819_s1 + $0x60] sm:$0xff]   ;;  %v1396_v20 = vld [vmem:[%s1819_s1 + $0x68] sm:$0xff]  }
   0x6   :  { %1285 = vmatprep.subr.bf16.mxu1 %v1382_v6  ;;  %v1389_v13 = vld [vmem:[%s1819_s1 + $0x18] sm:$0xff]   ;;  %v1393_v17 = vld [vmem:[%s1819_s1 + $0x20] sm:$0xff]   ;;  %v1397_v21 = vld [vmem:[%s1819_s1 + $0x28] sm:$0xff]  }
   0x7   :  { %1240 = vmatpush3.bf16.msra.mxu0 %v1381_v5  ;;  %v1390_v14 = vld [vmem:[%s1819_s1 + $0xd8] sm:$0xff]   ;;  %v1394_v18 = vld [vmem:[%s1819_s1 + $0xe0] sm:$0xff]   ;;  %v1398_v22 = vld [vmem:[%s1819_s1 + $0xe8] sm:$0xff]  }
   0x8   :  { %1241 = vmatprep.subr.bf16.mxu0 %v1384_v8  ;;  %v1391_v15 = vld [vmem:[%s1819_s1 + $0x98] sm:$0xff]   ;;  %v1395_v19 = vld [vmem:[%s1819_s1 + $0xa0] sm:$0xff]   ;;  %v1399_v23 = vld [vmem:[%s1819_s1 + $0xa8] sm:$0xff]  }
   0x9   :  { %1286 = vmatpush3.bf16.msra.mxu1 %v1383_v7  ;;  %v1400_v24 = vld [vmem:[%s1819_s1 + $0x70] sm:$0xff]   ;;  %v1404_v28 = vld [vmem:[%s1819_s1 + $0x78] sm:$0xff]   ;;  %v15_v31 = vld [vmem:[%s1820_s0] sm:$0xff] }
   0xa   :  { %1287 = vmatprep.subr.bf16.mxu1 %v1386_v10  ;;  %v1401_v25 = vld [vmem:[%s1819_s1 + $0x30] sm:$0xff]   ;;  %v1405_v29 = vld [vmem:[%s1819_s1 + $0x38] sm:$0xff]   ;;  %v19_v32 = vld [vmem:[%s1820_s0 + $0x20] sm:$0xff] }
   0xb   :  { %1242 = vmatpush3.bf16.msra.mxu0 %v1385_v9  ;;  %v1402_v26 = vld [vmem:[%s1819_s1 + $0xf0] sm:$0xff]   ;;  %v1406_v30 = vld [vmem:[%s1819_s1 + $0xf8] sm:$0xff]   ;;  %v1086_v33 = vcombine.low %v15_v31, %v19_v32  ;;  %v1087_v34 = vcombine.high %v15_v31, %v19_v32  ;;  %v1408_v36 = vld [vmem:[%s1819_s1 + $0x140] sm:$0xff]  }
   0xc   :  { %1243 = vmatprep.subr.bf16.mxu0 %v1388_v12  ;;  %v1403_v27 = vld [vmem:[%s1819_s1 + $0xb0] sm:$0xff]   ;;  %v1407_v35 = vld [vmem:[%s1819_s1 + $0xb8] sm:$0xff]   ;;  %v16_v37 = vld [vmem:[%s1820_s0 + $0x8] sm:$0xff] }
   0xd   :  { %1288 = vmatpush3.bf16.msra.mxu1 %v1387_v11  ;;  %761 = vmatprep.mubr.bf16.mxu0 %v1087_v34  ;;  %v20_v38 = vld [vmem:[%s1820_s0 + $0x28] sm:$0xff]  ;;  %v1409_v41 = vld [vmem:[%s1819_s1 + $0x100] sm:$0xff]   ;;  %v1413_v53 = vld [vmem:[%s1819_s1 + $0x150] sm:$0xff]  }
   0xe   :  { %1289 = vmatprep.subr.bf16.mxu1 %v1390_v14  ;;  %v1088_v39 = vcombine.low %v16_v37, %v20_v38  ;;  %v1089_v40 = vcombine.high %v16_v37, %v20_v38  ;;  %v1410_v42 = vld [vmem:[%s1819_s1 + $0x148] sm:$0xff]   ;;  %v1412_v45 = vld [vmem:[%s1819_s1 + $0x180] sm:$0xff]   ;;  %v1414_v54 = vld [vmem:[%s1819_s1 + $0x110] sm:$0xff]  }
   0xf   :  { %1244 = vmatpush3.bf16.msra.mxu0 %v1389_v13  ;;  %v1411_v44 = vld [vmem:[%s1819_s1 + $0x108] sm:$0xff]   ;;  %v23_v46 = vld [vmem:[%s1820_s0 + $0x40] sm:$0xff]  ;;  %v1416_v60 = vld [vmem:[%s1819_s1 + $0x158] sm:$0xff]  }
  0x10   :  { %1245 = vmatprep.subr.bf16.mxu0 %v1392_v16  ;;  %834 = vmatprep.mubr.bf16.mxu1 %v1089_v40  ;;  %v27_v47 = vld [vmem:[%s1820_s0 + $0x60] sm:$0xff]  ;;  %v24_v50 = vld [vmem:[%s1820_s0 + $0x48] sm:$0xff]  ;;  %v1417_v61 = vld [vmem:[%s1819_s1 + $0x190] sm:$0xff]  }
  0x11   :  { %1290 = vmatpush3.bf16.msra.mxu1 %v1391_v15  ;;  %v1095_v48 = vcombine.high %v23_v46, %v27_v47  ;;  %v1094_v49 = vcombine.low %v23_v46, %v27_v47  ;;  %v28_v51 = vld [vmem:[%s1820_s0 + $0x68] sm:$0xff]  ;;  %v31_v57 = vld [vmem:[%s1820_s0 + $0x80] sm:$0xff]  ;;  %v1418_v62 = vld [vmem:[%s1819_s1 + $0x118] sm:$0xff]  }
  0x12   :  { %1291 = vmatprep.subr.bf16.mxu1 %v1394_v18  ;;  %v1097_v52 = vcombine.high %v24_v50, %v28_v51  ;;  %v1096_v55 = vcombine.low %v24_v50, %v28_v51  ;;  %v1415_v56 = vld [vmem:[%s1819_s1 + $0x188] sm:$0xff]   ;;  %v35_v58 = vld [vmem:[%s1820_s0 + $0xa0] sm:$0xff]  ;;  %v1420_v4 = vld [vmem:[%s1819_s1 + $0x198] sm:$0xff]  }
  0x13   :  { %1246 = vmatpush3.bf16.msra.mxu0 %v1393_v17  ;;  %v1103_v59 = vcombine.high %v31_v57, %v35_v58  ;;  %v32_v63 = vld [vmem:[%s1820_s0 + $0x88] sm:$0xff]  ;;  %v1102_v1 = vcombine.low %v31_v57, %v35_v58  ;;  %v1419_v3 = vld [vmem:[%s1819_s1 + $0x160] sm:$0xff]   ;;  %v1426_v18 = vld [vmem:[%s1819_s1 + $0x170] sm:$0xff]  }
  0x14   :  { %1247 = vmatprep.subr.bf16.mxu0 %v1396_v20  ;;  %v36_v0 = vld [vmem:[%s1820_s0 + $0xa8] sm:$0xff]  ;;  %v1421_v5 = vld [vmem:[%s1819_s1 + $0x120] sm:$0xff]   ;;  %v21_v32 = vld [vmem:[%s1820_s0 + $0x30] sm:$0xff] }
  0x15   :  { %1292 = vmatpush3.bf16.msra.mxu1 %v1395_v19  ;;  %v1105_v2 = vcombine.high %v32_v63, %v36_v0  ;;  %v1104_v6 = vcombine.low %v32_v63, %v36_v0  ;;  %v39_v7 = vld [vmem:[%s1820_s0 + $0xc0] sm:$0xff]  ;;  %v40_v11 = vld [vmem:[%s1820_s0 + $0xc8] sm:$0xff]  ;;  %v26_v46 = vld [vmem:[%s1820_s0 + $0x58] sm:$0xff] }
  0x16   :  { %1293 = vmatprep.subr.bf16.mxu1 %v1398_v22  ;;  %v43_v8 = vld [vmem:[%s1820_s0 + $0xe0] sm:$0xff]  ;;  %v44_v12 = vld [vmem:[%s1820_s0 + $0xe8] sm:$0xff]  ;;  %v1427_v22 = vld [vmem:[%s1819_s1 + $0x130] sm:$0xff]  }
  0x17   :  { %1248 = vmatpush3.bf16.msra.mxu0 %v1397_v21  ;;  %v1111_v9 = vcombine.high %v39_v7, %v43_v8  ;;  %v1422_v10 = vld [vmem:[%s1819_s1 + $0x1a0] sm:$0xff]   ;;  %v1113_v13 = vcombine.high %v40_v11, %v44_v12  ;;  %v1423_v14 = vld [vmem:[%s1819_s1 + $0x168] sm:$0xff]   ;;  %v1110_v16 = vcombine.low %v39_v7, %v43_v8  ;;  %v37_v50 = vld [vmem:[%s1820_s0 + $0xb0] sm:$0xff] }
  0x18   :  { %1249 = vmatprep.subr.bf16.mxu0 %v1400_v24  ;;  %v1424_v15 = vld [vmem:[%s1819_s1 + $0x128] sm:$0xff]   ;;  %v47_v19 = vld [vmem:[%s1820_s0 + $0x100] sm:$0xff]  ;;  %v1428_v24 = vld [vmem:[%s1819_s1 + $0x1b0] sm:$0xff]  }
  0x19   :  { %1294 = vmatpush3.bf16.msra.mxu1 %v1399_v23  ;;  %v1425_v17 = vld [vmem:[%s1819_s1 + $0x1a8] sm:$0xff]   ;;  %v51_v20 = vld [vmem:[%s1820_s0 + $0x120] sm:$0xff]  ;;  %v1112_v23 = vcombine.low %v40_v11, %v44_v12  ;;  %v41_v57 = vld [vmem:[%s1820_s0 + $0xd0] sm:$0xff] }
  0x1a   :  { %1295 = vmatprep.subr.bf16.mxu1 %v1402_v26  ;;  %v1119_v21 = vcombine.high %v47_v19, %v51_v20  ;;  %v52_v26 = vld [vmem:[%s1820_s0 + $0x128] sm:$0xff]  ;;  %v1118_v31 = vcombine.low %v47_v19, %v51_v20  ;;  %v1432_v37 = vld [vmem:[%s1819_s1 + $0x1c0] ss:$0 sps:$4 sm:$0x33]   ;;  %v45_v58 = vld [vmem:[%s1820_s0 + $0xf0] sm:$0xff] }
  0x1b   :  { %1250 = vmatpush3.bf16.msra.mxu0 %v1401_v25  ;;  %v48_v25 = vld [vmem:[%s1820_s0 + $0x108] sm:$0xff]  ;;  %v727_v40 = vsel %vm725_vm0, %v1432_v37, 0  ;;  %v1762_v12 = vld [vmem:[%s1821_s2] ss:$0 sm:$0xff] }
  0x1c   :  { %1251 = vmatprep.subr.bf16.mxu0 %v1404_v28  ;;  %v1429_v28 = vld [vmem:[%s1819_s1 + $0x178] sm:$0xff]   ;;  %v1120_v38 = vcombine.low %v48_v25, %v52_v26 }
  0x1d   :  { %1296 = vmatpush3.bf16.msra.mxu1 %v1403_v27  ;;  %v1121_v27 = vcombine.high %v48_v25, %v52_v26 }
  0x1e   :  { %1297 = vmatprep.subr.bf16.mxu1 %v1406_v30  ;;  %v17_v30 = vld [vmem:[%s1820_s0 + $0x10] sm:$0xff] }
  0x1f   :  { %1252 = vmatpush3.bf16.msra.mxu0 %v1405_v29  ;;  %v1430_v29 = vld [vmem:[%s1819_s1 + $0x138] sm:$0xff]   ;;  %v1091_v34 = vcombine.high %v17_v30, %v21_v32 }
  0x20   :  { %1329 = vmatprep.subr.bf16.mxu0 %v1408_v36  ;;  %v22_v36 = vld [vmem:[%s1820_s0 + $0x38] sm:$0xff] }
  0x21   :  { %1298 = vmatpush3.bf16.msra.mxu1 %v1407_v35  ;;  %v18_v35 = vld [vmem:[%s1820_s0 + $0x18] sm:$0xff] }
  0x22   :  { %762 = vmatmul.mubr.bf16.vlgmr.msra.gmra.mrb[0].mxu0 %v1086_v33  ;;  %948 = vmatprep.subr.bf16.mxu1 %v1433_v43  ;;  %v1431_v33 = vld [vmem:[%s1819_s1 + $0x1b8] sm:$0xff]   ;;  %v1092_v47 = vcombine.low %v18_v35, %v22_v36 }
  0x23   :  { %1330 = vmatpush3.bf16.msra.mxu0 %v1409_v41  ;;  %769 = vmatprep.mubr.bf16.mxu0 %v1095_v48  ;;  %v25_v41 = vld [vmem:[%s1820_s0 + $0x50] sm:$0xff] }
  0x24   :  { %835 = vmatmul.mubr.bf16.vlgmr.msra.gmra.mrb[0].mxu1 %v1088_v39  ;;  %1331 = vmatprep.subr.bf16.mxu0 %v1410_v42  ;;  %v1093_v39 = vcombine.high %v18_v35, %v22_v36  ;;  %v29_v42 = vld [vmem:[%s1820_s0 + $0x70] sm:$0xff] }
  0x25   :  { %949 = vmatpush1.bf16.msra.mxu1 %v1412_v45  ;;  %842 = vmatprep.mubr.bf16.mxu1 %v1097_v52  ;;  %v1099_v45 = vcombine.high %v25_v41, %v29_v42  ;;  %v1098_v51 = vcombine.low %v25_v41, %v29_v42 }
  0x26   :  { %950 = vmatprep.subr.bf16.mxu1 %v1433_v43 }
  0x27   :  { %1332 = vmatpush3.bf16.msra.mxu0 %v1411_v44  ;;  %v1090_v44 = vcombine.low %v17_v30, %v21_v32 }
  0x28   :  { %1333 = vmatprep.subr.bf16.mxu0 %v1413_v53  ;;  %v34_v53 = vld [vmem:[%s1820_s0 + $0x98] sm:$0xff] }
  0x29   :  { %951 = vmatpush1.bf16.msra.mxu1 %v1415_v56 }
  0x2a   :  { %770 = vmatmul.mubr.bf16.gmra.mrb[4].mxu0 %v1094_v49  ;;  %952 = vmatprep.subr.bf16.mxu1 %v1433_v43  ;;  %v33_v49 = vld [vmem:[%s1820_s0 + $0x90] sm:$0xff] }
  0x2b   :  { %1334 = vmatpush3.bf16.msra.mxu0 %v1414_v54  ;;  %777 = vmatprep.mubr.bf16.mxu0 %v1103_v59  ;;  %v1107_v52 = vcombine.high %v33_v49, %v37_v50  ;;  %v38_v54 = vld [vmem:[%s1820_s0 + $0xb8] sm:$0xff]  ;;  %v1106_v59 = vcombine.low %v33_v49, %v37_v50 }
  0x2c   :  { %843 = vmatmul.mubr.bf16.gmra.mrb[4].mxu1 %v1096_v55  ;;  %1335 = vmatprep.subr.bf16.mxu0 %v1416_v60  ;;  %v1109_v56 = vcombine.high %v34_v53, %v38_v54  ;;  %v1115_v60 = vcombine.high %v41_v57, %v45_v58  ;;  %v1108_v63 = vcombine.low %v34_v53, %v38_v54 }
  0x2d   :  { %953 = vmatpush1.bf16.msra.mxu1 %v1417_v61  ;;  %850 = vmatprep.mubr.bf16.mxu1 %v1105_v2  ;;  %v42_v61 = vld [vmem:[%s1820_s0 + $0xd8] sm:$0xff]  ;;  %v53_v2 = vld [vmem:[%s1820_s0 + $0x130] sm:$0xff] }
  0x2e   :  { %954 = vmatprep.subr.bf16.mxu1 %v1433_v43 }
  0x2f   :  { %1336 = vmatpush3.bf16.msra.mxu0 %v1418_v62  ;;  %v46_v62 = vld [vmem:[%s1820_s0 + $0xf8] sm:$0xff] }
  0x30   :  { %1337 = vmatprep.subr.bf16.mxu0 %v1419_v3  ;;  %v1117_v0 = vcombine.high %v42_v61, %v46_v62  ;;  %v1114_v3 = vcombine.low %v41_v57, %v45_v58  ;;  %v1116_v7 = vcombine.low %v42_v61, %v46_v62 }
  0x31   :  { %955 = vmatpush1.bf16.msra.mxu1 %v1420_v4 }
  0x32   :  { %778 = vmatmul.mubr.bf16.gmra.mrb[8].mxu0 %v1102_v1  ;;  %956 = vmatprep.subr.bf16.mxu1 %v1433_v43  ;;  %v49_v1 = vld [vmem:[%s1820_s0 + $0x110] sm:$0xff] }
  0x33   :  { %1338 = vmatpush3.bf16.msra.mxu0 %v1421_v5  ;;  %785 = vmatprep.mubr.bf16.mxu0 %v1111_v9  ;;  %v1123_v4 = vcombine.high %v49_v1, %v53_v2  ;;  %v50_v5 = vld [vmem:[%s1820_s0 + $0x118] sm:$0xff]  ;;  %v1122_v9 = vcombine.low %v49_v1, %v53_v2 }
  0x34   :  { %851 = vmatmul.mubr.bf16.gmra.mrb[8].mxu1 %v1104_v6  ;;  %1339 = vmatprep.subr.bf16.mxu0 %v1423_v14  ;;  %v54_v6 = vld [vmem:[%s1820_s0 + $0x138] sm:$0xff] }
  0x35   :  { %858 = vmatprep.mubr.bf16.mxu1 %v1113_v13  ;;  %957 = vmatpush1.bf16.msra.mxu1 %v1422_v10  ;;  %v1125_v8 = vcombine.high %v50_v5, %v54_v6  ;;  %v1124_v10 = vcombine.low %v50_v5, %v54_v6 }
  0x36   :  { %958 = vmatprep.subr.bf16.mxu1 %v1433_v43 }
  0x37   :  { %1340 = vmatpush3.bf16.msra.mxu0 %v1424_v15 }
  0x38   :  { %1341 = vmatprep.subr.bf16.mxu0 %v1426_v18 }
  0x39   :  { %959 = vmatpush1.bf16.msra.mxu1 %v1425_v17 }
  0x3a   :  { %786 = vmatmul.mubr.bf16.gmra.mrb[12].mxu0 %v1110_v16  ;;  %960 = vmatprep.subr.bf16.mxu1 %v1433_v43 }
  0x3b   :  { %793 = vmatprep.mubr.bf16.mxu0 %v1119_v21  ;;  %1342 = vmatpush3.bf16.msra.mxu0 %v1427_v22 }
  0x3c   :  { %859 = vmatmul.mubr.bf16.gmra.mrb[12].mxu1 %v1112_v23  ;;  %1343 = vmatprep.subr.bf16.mxu0 %v1429_v28 }
  0x3d   :  { %866 = vmatprep.mubr.bf16.mxu1 %v1121_v27  ;;  %961 = vmatpush1.bf16.msra.mxu1 %v1428_v24 }
  0x3e   :  { %962 = vmatprep.subr.bf16.mxu1 %v1433_v43 }
  0x3f   :  { %1344 = vmatpush3.bf16.msra.mxu0 %v1430_v29 }
  0x41   :  { %963 = vmatpush1.bf16.msra.mxu1 %v1431_v33 }
  0x42   :  { %794 = vmatmul.mubr.bf16.gmra.mrb[16].mxu0 %v1118_v31  ;;  %964 = vmatprep.subr.bf16.mxu1 %v1433_v43  ;;  %v30_v43 = vld [vmem:[%s1820_s0 + $0x78] sm:$0xff] }
  0x43   :  { %907 = vmatprep.mubr.bf16.mxu0 %v1091_v34  ;;  %v1101_v48 = vcombine.high %v26_v46, %v30_v43  ;;  %v1100_v55 = vcombine.low %v26_v46, %v30_v43 }
  0x44   :  { %867 = vmatmul.mubr.bf16.gmra.mrb[16].mxu1 %v1120_v38 }
  0x45   :  { %1183 = vmatprep.mubr.msk.bf16.mxu1 %vm709_vm1, %v1093_v39  ;;  %965 = vmatpush1.bf16.msra.mxu1 %v727_v40 }
  0x4a   :  { %908 = vmatmul.mubr.bf16.vlgmr.msra.gmra.mrb[20].mxu0 %v1090_v44 }
  0x4b   :  { %915 = vmatprep.mubr.bf16.mxu0 %v1099_v45 }
  0x4c   :  { %981 = vmatmul.mubr.bf16.vlgmr.msra.gmra.mrb[20].mxu1 %v1092_v47 }
  0x4d   :  { %1184 = vmatprep.mubr.msk.bf16.mxu1 %vm709_vm1, %v1101_v48 }
  0x52   :  { %916 = vmatmul.mubr.bf16.gmra.mrb[24].mxu0 %v1098_v51 }
  0x53   :  { %923 = vmatprep.mubr.bf16.mxu0 %v1107_v52 }
  0x54   :  { %989 = vmatmul.mubr.bf16.gmra.mrb[24].mxu1 %v1100_v55 }
  0x55   :  { %1185 = vmatprep.mubr.msk.bf16.mxu1 %vm709_vm1, %v1109_v56 }
  0x5a   :  { %924 = vmatmul.mubr.bf16.gmra.mrb[28].mxu0 %v1106_v59 }
  0x5b   :  { %931 = vmatprep.mubr.bf16.mxu0 %v1115_v60 }
  0x5c   :  { %997 = vmatmul.mubr.bf16.gmra.mrb[28].mxu1 %v1108_v63 }
  0x5d   :  { %1186 = vmatprep.mubr.msk.bf16.mxu1 %vm709_vm1, %v1117_v0 }
  0x62   :  { %932 = vmatmul.mubr.bf16.gmra.mrb[32].mxu0 %v1114_v3 }
  0x63   :  { %939 = vmatprep.mubr.bf16.mxu0 %v1123_v4 }
  0x64   :  { %1005 = vmatmul.mubr.bf16.gmra.mrb[32].mxu1 %v1116_v7 }
  0x65   :  { %1187 = vmatprep.mubr.msk.bf16.mxu1 %vm709_vm1, %v1125_v8 }
  0x6a   :  { %940 = vmatmul.mubr.bf16.gmra.mrb[36].mxu0 %v1122_v9 }
  0x6c   :  { %1013 = vmatmul.mubr.bf16.gmra.mrb[36].mxu1 %v1124_v10 }
  0xf5   :  { %v1253_v11 = vpop.f32.mrb[0].mxu0 }
  0xf6   :  { %v1254_v13 = vpop.f32.mrb[1].mxu0 }
  0xf7   :  { %v1255_v14 = vadd.f32 %v1254_v13, %v1253_v11  ;;  %v1256_v15 = vpop.f32.mrb[2].mxu0  ;;  %v1299_v16 = vpop.f32.mrb[0].mxu1 }
  0xf8   :  { %v1257_v17 = vpop.f32.mrb[3].mxu0  ;;  %v1300_v20 = vpop.f32.mrb[1].mxu1 }
  0xf9   :  { %v764_v18 = vadd.f32 %v1255_v14, %v1762_v12  ;;  %v1258_v19 = vadd.f32 %v1257_v17, %v1256_v15  ;;  %v1301_v21 = vadd.f32 %v1300_v20, %v1299_v16  ;;  %v1302_v22 = vpop.f32.mrb[2].mxu1 }
  0xfa   :  { %v1303_v24 = vpop.f32.mrb[3].mxu1 }
  0xfb   :  { %v767_v23 = vadd.f32 %v1258_v19, %v1762_v12  ;;  %v1766_v25 = vadd.f32 %v1301_v21, %v764_v18  ;;  %v1304_v26 = vadd.f32 %v1303_v24, %v1302_v22 }
  0xfd   :  { %v1259_v27 = vpop.f32.mrb[4].mxu0  ;;  %v1768_v28 = vadd.f32 %v1304_v26, %v767_v23 }
  0xfe   :  { %v1260_v29 = vpop.f32.mrb[5].mxu0 }
  0xff   :  { %v1261_v30 = vadd.f32 %v1260_v29, %v1259_v27  ;;  %v1262_v31 = vpop.f32.mrb[6].mxu0  ;;  %v1305_v32 = vpop.f32.mrb[4].mxu1 }
 0x100   :  { %v1263_v33 = vpop.f32.mrb[7].mxu0  ;;  %v1306_v36 = vpop.f32.mrb[5].mxu1 }
 0x101   :  { %v772_v34 = vadd.f32 %v1261_v30, %v1762_v12  ;;  %v1264_v35 = vadd.f32 %v1263_v33, %v1262_v31  ;;  %v1307_v37 = vadd.f32 %v1306_v36, %v1305_v32  ;;  %v1308_v38 = vpop.f32.mrb[6].mxu1 }
 0x102   :  { %v1309_v40 = vpop.f32.mrb[7].mxu1 }
 0x103   :  { %v775_v39 = vadd.f32 %v1264_v35, %v1762_v12  ;;  %v1772_v41 = vadd.f32 %v1307_v37, %v772_v34  ;;  %v1310_v42 = vadd.f32 %v1309_v40, %v1308_v38 }
 0x105   :  { %v1265_v44 = vpop.f32.mrb[8].mxu0  ;;  %v1774_v45 = vadd.f32 %v1310_v42, %v775_v39 }
 0x106   :  { %v1266_v46 = vpop.f32.mrb[9].mxu0 }
 0x107   :  { %v1267_v43 = vadd.f32 %v1266_v46, %v1265_v44  ;;  %v1268_v47 = vpop.f32.mrb[10].mxu0  ;;  %v1311_v48 = vpop.f32.mrb[8].mxu1 }
 0x108   :  { %v1269_v49 = vpop.f32.mrb[11].mxu0  ;;  %v1312_v52 = vpop.f32.mrb[9].mxu1 }
 0x109   :  { %v780_v50 = vadd.f32 %v1267_v43, %v1762_v12  ;;  %v1270_v51 = vadd.f32 %v1269_v49, %v1268_v47  ;;  %v1313_v53 = vadd.f32 %v1312_v52, %v1311_v48  ;;  %v1314_v54 = vpop.f32.mrb[10].mxu1 }
 0x10a   :  { %v1315_v56 = vpop.f32.mrb[11].mxu1 }
 0x10b   :  { %v783_v55 = vadd.f32 %v1270_v51, %v1762_v12  ;;  %v1778_v57 = vadd.f32 %v1313_v53, %v780_v50  ;;  %v1316_v58 = vadd.f32 %v1315_v56, %v1314_v54 }
 0x10d   :  { %v1271_v59 = vpop.f32.mrb[12].mxu0  ;;  %v1780_v60 = vadd.f32 %v1316_v58, %v783_v55 }
 0x10e   :  { %v1272_v61 = vpop.f32.mrb[13].mxu0 }
 0x10f   :  { %v1273_v62 = vadd.f32 %v1272_v61, %v1271_v59  ;;  %v1274_v63 = vpop.f32.mrb[14].mxu0  ;;  %v1317_v0 = vpop.f32.mrb[12].mxu1 }
 0x110   :  { %v1275_v1 = vpop.f32.mrb[15].mxu0  ;;  %v1318_v4 = vpop.f32.mrb[13].mxu1 }
 0x111   :  { %v788_v2 = vadd.f32 %v1273_v62, %v1762_v12  ;;  %v1276_v3 = vadd.f32 %v1275_v1, %v1274_v63  ;;  %v1319_v5 = vadd.f32 %v1318_v4, %v1317_v0  ;;  %v1320_v6 = vpop.f32.mrb[14].mxu1 }
 0x112   :  { %v1321_v8 = vpop.f32.mrb[15].mxu1 }
 0x113   :  { %v791_v7 = vadd.f32 %v1276_v3, %v1762_v12  ;;  %v1784_v9 = vadd.f32 %v1319_v5, %v788_v2  ;;  %v1322_v10 = vadd.f32 %v1321_v8, %v1320_v6 }
 0x115   :  { %v1277_v11 = vpop.f32.mrb[16].mxu0  ;;  %v1786_v13 = vadd.f32 %v1322_v10, %v791_v7 }
 0x116   :  { %v1278_v14 = vpop.f32.mrb[17].mxu0 }
 0x117   :  { %v1279_v15 = vadd.f32 %v1278_v14, %v1277_v11  ;;  %v1280_v16 = vpop.f32.mrb[18].mxu0  ;;  %v1323_v17 = vpop.f32.mrb[16].mxu1 }
 0x118   :  { %v1281_v18 = vpop.f32.mrb[19].mxu0  ;;  %v1324_v21 = vpop.f32.mrb[17].mxu1 }
 0x119   :  { %v796_v19 = vadd.f32 %v1279_v15, %v1762_v12  ;;  %v1282_v20 = vadd.f32 %v1281_v18, %v1280_v16  ;;  %v1325_v22 = vadd.f32 %v1324_v21, %v1323_v17  ;;  %v1326_v23 = vpop.f32.mrb[18].mxu1 }
 0x11a   :  { %v1327_v26 = vpop.f32.mrb[19].mxu1 }
 0x11b   :  { %v799_v24 = vadd.f32 %v1282_v20, %v1762_v12  ;;  %v1790_v27 = vadd.f32 %v1325_v22, %v796_v19  ;;  %v1328_v29 = vadd.f32 %v1327_v26, %v1326_v23 }
 0x11d   :  { %v1345_v30 = vpop.f32.mrb[20].mxu0  ;;  %v1792_v31 = vadd.f32 %v1328_v29, %v799_v24 }
 0x11e   :  { %v1346_v32 = vpop.f32.mrb[21].mxu0 }
 0x11f   :  { %v1347_v33 = vadd.f32 %v1346_v32, %v1345_v30  ;;  %v1348_v34 = vpop.f32.mrb[22].mxu0  ;;  %v982_v36 = vpop.f32.mrb[20].mxu1 }
 0x120   :  { %v1349_v35 = vpop.f32.mrb[23].mxu0  ;;  %v984_v39 = vpop.f32.mrb[21].mxu1 }
 0x121   :  { %v1350_v37 = vadd.f32 %v1349_v35, %v1348_v34  ;;  %v910_v38 = vadd.f32 %v1347_v33, %v1766_v25  ;;  %v985_v40 = vpop.f32.mrb[22].mxu1 }
 0x122   :  { %v987_v44 = vpop.f32.mrb[23].mxu1 }
 0x123   :  { %v983_v42 = vadd.f32 %v982_v36, %v910_v38  ;;  %v913_v12 = vadd.f32 %v1350_v37, %v1768_v28 }
 0x125   :  { %v986_v46 = vadd.f32 %v985_v40, %v913_v12  ;;  %v1351_v43 = vpop.f32.mrb[24].mxu0  ;;  %v1021_v48 = vmax.f32 %v983_v42, 0.0 }
 0x126   :  { %v1352_v47 = vpop.f32.mrb[25].mxu0 }
 0x127   :  { %v1022_v49 = vmax.f32 %v986_v46, 0.0  ;;  %v1353_v50 = vadd.f32 %v1352_v47, %v1351_v43  ;;  %v1354_v51 = vpop.f32.mrb[26].mxu0  ;;  %v990_v53 = vpop.f32.mrb[24].mxu1 }
 0x128   :  { %v1355_v52 = vpop.f32.mrb[27].mxu0  ;;  %v992_v25 = vpop.f32.mrb[25].mxu1 }
 0x129   :  { %v1211_v54 = vpack.c.bf16 %v1022_v49, %v1021_v48  ;;  %v1356_v55 = vadd.f32 %v1355_v52, %v1354_v51  ;;  %v918_v56 = vadd.f32 %v1353_v50, %v1772_v41  ;;  %v993_v58 = vpop.f32.mrb[26].mxu1 }
 0x12a   :  { %v995_v61 = vpop.f32.mrb[27].mxu1 }
 0x12b   :  { %1212 = vst [vmem:[%s1822_s3] sm:$0xff] %v1211_v54   ;;  %v991_v28 = vadd.f32 %v990_v53, %v918_v56  ;;  %v921_v59 = vadd.f32 %v1356_v55, %v1774_v45 }
 0x12d   :  { %v994_v62 = vadd.f32 %v993_v58, %v921_v59  ;;  %v1357_v63 = vpop.f32.mrb[28].mxu0  ;;  %v1023_v1 = vmax.f32 %v991_v28, 0.0 }
 0x12e   :  { %v1358_v0 = vpop.f32.mrb[29].mxu0 }
 0x12f   :  { %v1024_v2 = vmax.f32 %v994_v62, 0.0  ;;  %v1359_v3 = vadd.f32 %v1358_v0, %v1357_v63  ;;  %v1360_v4 = vpop.f32.mrb[30].mxu0  ;;  %v998_v6 = vpop.f32.mrb[28].mxu1 }
 0x130   :  { %v1361_v5 = vpop.f32.mrb[31].mxu0  ;;  %v1000_v10 = vpop.f32.mrb[29].mxu1 }
 0x131   :  { %v1216_v41 = vpack.c.bf16 %v1024_v2, %v1023_v1  ;;  %v1362_v7 = vadd.f32 %v1361_v5, %v1360_v4  ;;  %v926_v8 = vadd.f32 %v1359_v3, %v1778_v57  ;;  %v1001_v11 = vpop.f32.mrb[30].mxu1 }
 0x132   :  { %v1003_v15 = vpop.f32.mrb[31].mxu1 }
 0x133   :  { %1233 = vst [vmem:[%s1822_s3 + $0x8] sm:$0xff] %v1216_v41   ;;  %v999_v45 = vadd.f32 %v998_v6, %v926_v8  ;;  %v929_v14 = vadd.f32 %v1362_v7, %v1780_v60 }
 0x135   :  { %v1002_v16 = vadd.f32 %v1001_v11, %v929_v14  ;;  %v1363_v17 = vpop.f32.mrb[32].mxu0  ;;  %v1025_v19 = vmax.f32 %v999_v45, 0.0 }
 0x136   :  { %v1364_v18 = vpop.f32.mrb[33].mxu0 }
 0x137   :  { %v1026_v20 = vmax.f32 %v1002_v16, 0.0  ;;  %v1365_v21 = vadd.f32 %v1364_v18, %v1363_v17  ;;  %v1366_v22 = vpop.f32.mrb[34].mxu0  ;;  %v1006_v24 = vpop.f32.mrb[32].mxu1 }
 0x138   :  { %v1367_v23 = vpop.f32.mrb[35].mxu0  ;;  %v1008_v30 = vpop.f32.mrb[33].mxu1 }
 0x139   :  { %v1221_v57 = vpack.c.bf16 %v1026_v20, %v1025_v19  ;;  %v1368_v26 = vadd.f32 %v1367_v23, %v1366_v22  ;;  %v934_v29 = vadd.f32 %v1365_v21, %v1784_v9  ;;  %v1009_v32 = vpop.f32.mrb[34].mxu1 }
 0x13a   :  { %v1011_v34 = vpop.f32.mrb[35].mxu1 }
 0x13b   :  { %1234 = vst [vmem:[%s1822_s3 + $0x10] sm:$0xff] %v1221_v57   ;;  %v1007_v60 = vadd.f32 %v1006_v24, %v934_v29  ;;  %v937_v33 = vadd.f32 %v1368_v26, %v1786_v13 }
 0x13d   :  { %v1010_v35 = vadd.f32 %v1009_v32, %v937_v33  ;;  %v1369_v36 = vpop.f32.mrb[36].mxu0  ;;  %v1027_v38 = vmax.f32 %v1007_v60, 0.0 }
 0x13e   :  { %v1370_v37 = vpop.f32.mrb[37].mxu0 }
 0x13f   :  { %v1028_v39 = vmax.f32 %v1010_v35, 0.0  ;;  %v1371_v40 = vadd.f32 %v1370_v37, %v1369_v36  ;;  %v1372_v42 = vpop.f32.mrb[38].mxu0  ;;  %v1014_v44 = vpop.f32.mrb[36].mxu1 }
 0x140   :  { %v1373_v12 = vpop.f32.mrb[39].mxu0  ;;  %v1016_v47 = vpop.f32.mrb[37].mxu1 }
 0x141   :  { %v1226_v9 = vpack.c.bf16 %v1028_v39, %v1027_v38  ;;  %v1374_v46 = vadd.f32 %v1373_v12, %v1372_v42  ;;  %v942_v43 = vadd.f32 %v1371_v40, %v1790_v27  ;;  %v1017_v48 = vpop.f32.mrb[38].mxu1 }
 0x142   :  { %v1019_v50 = vpop.f32.mrb[39].mxu1 }
 0x143   :  { %1235 = vst [vmem:[%s1822_s3 + $0x18] sm:$0xff] %v1226_v9   ;;  %v1015_v13 = vadd.f32 %v1014_v44, %v942_v43  ;;  %v945_v49 = vadd.f32 %v1374_v46, %v1792_v31 }
 0x145   :  { %v1018_v51 = vadd.f32 %v1017_v48, %v945_v49  ;;  %v1029_v52 = vmax.f32 %v1015_v13, 0.0 }
 0x147   :  { %v1030_v53 = vmax.f32 %v1018_v51, 0.0 }
 0x149   :  { %v1231_v54 = vpack.c.bf16 %v1030_v53, %v1029_v52 }
 0x14b   :  { %1236 = vst [vmem:[%s1822_s3 + $0x20] sm:$0xff] %v1231_v54  }

// kernel: dave_forward.9
= control target key start
LH: loop header
LB: loop body
LE: loop exit
PB: predicated region body
PF: predicated region fallthrough
CT: control target
= control target key end

     0   :  { %v542_v0 = vmov 0   ;;  %vm284_vm0 = vcmask 392192   ;;  %s690_s1 = inlined_call_operand.vmem [shape: bf16[432,128], index: 1, kind: input, shape index: {}]   ;;  %s691_s0 = inlined_call_operand.vmem [shape: bf16[32,432], index: 0, kind: input, shape index: {}]   ;;  %s692_s2 = inlined_call_operand.vmem [shape: f32[1,128], index: 2, kind: input, shape index: {}]   ;;  %s693_s3 = inlined_call_operand.vmem [shape: bf16[32,128], index: 3, kind: output, shape index: {}]  }
   0x1   :  { %340 = vmatprep.subr.bf16.mxu1 %v542_v0  ;;  %v503_v1 = vld [vmem:[%s690_s1 + $0x80] sm:$0xff]   ;;  %v506_v4 = vld [vmem:[%s690_s1 + $0x88] sm:$0xff]   ;;  %v509_v7 = vld [vmem:[%s690_s1 + $0x90] sm:$0xff]  }
   0x2   :  { %v504_v2 = vld [vmem:[%s690_s1 + $0x40] sm:$0xff]   ;;  %341 = vmatpush1.bf16.msra.mxu1 %v503_v1  ;;  %v507_v5 = vld [vmem:[%s690_s1 + $0x48] sm:$0xff]   ;;  %v510_v8 = vld [vmem:[%s690_s1 + $0x50] sm:$0xff]  }
   0x3   :  { %v505_v3 = vld [vmem:[%s690_s1] sm:$0xff]   ;;  %474 = vmatprep.subr.bf16.mxu0 %v504_v2  ;;  %342 = vmatprep.subr.bf16.mxu1 %v542_v0  ;;  %v508_v6 = vld [vmem:[%s690_s1 + $0x8] sm:$0xff]   ;;  %v511_v9 = vld [vmem:[%s690_s1 + $0x10] sm:$0xff]  }
   0x4   :  { %475 = vmatpush3.bf16.msra.mxu0 %v505_v3  ;;  %v512_v10 = vld [vmem:[%s690_s1 + $0x98] sm:$0xff]   ;;  %v516_v13 = vld [vmem:[%s690_s1 + $0x60] sm:$0xff]   ;;  %v519_v16 = vld [vmem:[%s690_s1 + $0x68] sm:$0xff]  }
   0x5   :  { %476 = vmatprep.subr.bf16.mxu0 %v507_v5  ;;  %v513_v11 = vld [vmem:[%s690_s1 + $0x58] sm:$0xff]   ;;  %v515_v14 = vld [vmem:[%s690_s1 + $0xa0] sm:$0xff]   ;;  %v518_v17 = vld [vmem:[%s690_s1 + $0xa8] sm:$0xff]  }
   0x6   :  { %343 = vmatpush1.bf16.msra.mxu1 %v506_v4  ;;  %v514_v12 = vld [vmem:[%s690_s1 + $0x18] sm:$0xff]   ;;  %v517_v15 = vld [vmem:[%s690_s1 + $0x20] sm:$0xff]   ;;  %v520_v18 = vld [vmem:[%s690_s1 + $0x28] sm:$0xff]  }
   0x7   :  { %344 = vmatprep.subr.bf16.mxu1 %v542_v0  ;;  %v522_v19 = vld [vmem:[%s690_s1 + $0x70] sm:$0xff]   ;;  %v524_v22 = vld [vmem:[%s690_s1 + $0xb8] sm:$0xff]   ;;  %v527_v26 = vld [vmem:[%s690_s1 + $0xc0] sm:$0xff]  }
   0x8   :  { %477 = vmatpush3.bf16.msra.mxu0 %v508_v6  ;;  %v521_v20 = vld [vmem:[%s690_s1 + $0xb0] sm:$0xff]   ;;  %v525_v23 = vld [vmem:[%s690_s1 + $0x78] sm:$0xff]   ;;  %v531_v30 = vld [vmem:[%s690_s1 + $0xc8] sm:$0xff]  }
   0x9   :  { %478 = vmatprep.subr.bf16.mxu0 %v510_v8  ;;  %v523_v21 = vld [vmem:[%s690_s1 + $0x30] sm:$0xff]   ;;  %v526_v25 = vld [vmem:[%s690_s1 + $0x38] sm:$0xff]   ;;  %v417_v42 = vld [vmem:[%s692_s2] ss:$0 sm:$0xff] }
   0xa   :  { %345 = vmatpush1.bf16.msra.mxu1 %v509_v7  ;;  %v530_v24 = vld [vmem:[%s691_s0 + $0x4] ss:$16 sps:$4 sm:$0xff]   ;;  %v537_v27 = vld [vmem:[%s691_s0 + $0xc] ss:$16 sps:$4 sm:$0xff]   ;;  %v528_v28 = vld [vmem:[%s691_s0] ss:$16 sps:$4 sm:$0xff]  }
   0xb   :  { %346 = vmatprep.subr.bf16.mxu1 %v542_v0  ;;  %323 = vmatprep.mubr.bf16.mxu0 %v530_v24  ;;  %v533_v29 = vld [vmem:[%s691_s0 + $0x24] ss:$16 sps:$4 sm:$0xff]   ;;  %v538_v32 = vld [vmem:[%s691_s0 + $0x20] ss:$16 sps:$4 sm:$0xff]   ;;  %v535_v33 = vld [vmem:[%s691_s0 + $0x8] ss:$16 sps:$4 sm:$0xff]  }
   0xc   :  { %479 = vmatpush3.bf16.msra.mxu0 %v511_v9  ;;  %453 = vmatprep.mubr.msk.bf16.mxu1 %vm284_vm0, %v537_v27  ;;  %v532_v31 = vld [vmem:[%s690_s1 + $0xd0] sm:$0xff]   ;;  %v539_v34 = vld [vmem:[%s691_s0 + $0x2c] ss:$16 sps:$4 sm:$0xff]   ;;  %v541_v35 = vld [vmem:[%s691_s0 + $0x28] ss:$16 sps:$4 sm:$0xff]  }
   0xd   :  { %480 = vmatprep.subr.bf16.mxu0 %v513_v11 }
   0xe   :  { %347 = vmatpush1.bf16.msra.mxu1 %v512_v10 }
   0xf   :  { %348 = vmatprep.subr.bf16.mxu1 %v542_v0 }
  0x10   :  { %481 = vmatpush3.bf16.msra.mxu0 %v514_v12 }
  0x11   :  { %482 = vmatprep.subr.bf16.mxu0 %v516_v13 }
  0x12   :  { %349 = vmatpush1.bf16.msra.mxu1 %v515_v14 }
  0x13   :  { %350 = vmatprep.subr.bf16.mxu1 %v542_v0 }
  0x14   :  { %483 = vmatpush3.bf16.msra.mxu0 %v517_v15 }
  0x15   :  { %484 = vmatprep.subr.bf16.mxu0 %v519_v16 }
  0x16   :  { %351 = vmatpush1.bf16.msra.mxu1 %v518_v17 }
  0x17   :  { %352 = vmatprep.subr.bf16.mxu1 %v542_v0 }
  0x18   :  { %485 = vmatpush3.bf16.msra.mxu0 %v520_v18 }
  0x19   :  { %486 = vmatprep.subr.bf16.mxu0 %v522_v19 }
  0x1a   :  { %353 = vmatpush1.bf16.msra.mxu1 %v521_v20 }
  0x1b   :  { %354 = vmatprep.subr.bf16.mxu1 %v542_v0 }
  0x1c   :  { %487 = vmatpush3.bf16.msra.mxu0 %v523_v21 }
  0x1d   :  { %488 = vmatprep.subr.bf16.mxu0 %v525_v23 }
  0x1e   :  { %355 = vmatpush1.bf16.msra.mxu1 %v524_v22 }
  0x1f   :  { %356 = vmatprep.subr.bf16.mxu1 %v542_v0 }
  0x20   :  { %489 = vmatpush3.bf16.msra.mxu0 %v526_v25 }
  0x22   :  { %357 = vmatpush1.bf16.msra.mxu1 %v527_v26 }
  0x23   :  { %324 = vmatmul.mubr.bf16.vlgmr.msra.gmra.mrb[0].mxu0 %v528_v28  ;;  %358 = vmatprep.subr.bf16.mxu1 %v542_v0 }
  0x24   :  { %331 = vmatprep.mubr.bf16.mxu0 %v533_v29 }
  0x26   :  { %359 = vmatpush1.bf16.msra.mxu1 %v531_v30 }
  0x27   :  { %360 = vmatprep.subr.bf16.mxu1 %v542_v0 }
  0x2a   :  { %361 = vmatpush1.bf16.msra.mxu1 %v532_v31 }
  0x2b   :  { %332 = vmatmul.mubr.bf16.gmra.mrb[4].mxu0 %v538_v32 }
  0x2d   :  { %373 = vmatmul.mubr.bf16.vlgmr.msra.gmra.mrb[0].mxu1 %v535_v33 }
  0x2e   :  { %454 = vmatprep.mubr.msk.bf16.mxu1 %vm284_vm0, %v539_v34 }
  0x35   :  { %381 = vmatmul.mubr.bf16.gmra.mrb[4].mxu1 %v541_v35 }
  0xf6   :  { %v490_v36 = vpop.f32.mrb[0].mxu0 }
  0xf7   :  { %v491_v37 = vpop.f32.mrb[1].mxu0 }
  0xf8   :  { %v492_v38 = vadd.f32 %v491_v37, %v490_v36  ;;  %v493_v39 = vpop.f32.mrb[2].mxu0 }
  0xf9   :  { %v494_v40 = vpop.f32.mrb[3].mxu0 }
  0xfa   :  { %v495_v41 = vadd.f32 %v494_v40, %v493_v39  ;;  %v326_v43 = vadd.f32 %v492_v38, %v417_v42 }
  0xfc   :  { %v329_v51 = vadd.f32 %v495_v41, %v417_v42 }
  0xfe   :  { %v496_v44 = vpop.f32.mrb[4].mxu0 }
  0xff   :  { %v497_v45 = vpop.f32.mrb[5].mxu0 }
 0x100   :  { %v374_v46 = vpop.f32.mrb[0].mxu1  ;;  %v498_v47 = vadd.f32 %v497_v45, %v496_v44  ;;  %v499_v48 = vpop.f32.mrb[6].mxu0 }
 0x101   :  { %v375_v49 = vadd.f32 %v374_v46, %v326_v43  ;;  %v376_v50 = vpop.f32.mrb[1].mxu1  ;;  %v500_v52 = vpop.f32.mrb[7].mxu0 }
 0x102   :  { %v377_v53 = vpop.f32.mrb[2].mxu1  ;;  %v501_v54 = vadd.f32 %v500_v52, %v499_v48  ;;  %v334_v59 = vadd.f32 %v498_v47, %v417_v42 }
 0x103   :  { %v378_v55 = vadd.f32 %v377_v53, %v329_v51  ;;  %v379_v56 = vpop.f32.mrb[3].mxu1  ;;  %v389_v57 = vmax.f32 %v375_v49, 0.0 }
 0x104   :  { %v337_v0 = vadd.f32 %v501_v54, %v417_v42 }
 0x105   :  { %v390_v58 = vmax.f32 %v378_v55, 0.0 }
 0x107   :  { %v466_v60 = vpack.c.bf16 %v390_v58, %v389_v57 }
 0x108   :  { %v382_v61 = vpop.f32.mrb[4].mxu1 }
 0x109   :  { %467 = vst [vmem:[%s693_s3] sm:$0xff] %v466_v60   ;;  %v383_v62 = vadd.f32 %v382_v61, %v334_v59  ;;  %v384_v63 = vpop.f32.mrb[5].mxu1 }
 0x10a   :  { %v385_v1 = vpop.f32.mrb[6].mxu1 }
 0x10b   :  { %v386_v2 = vadd.f32 %v385_v1, %v337_v0  ;;  %v387_v3 = vpop.f32.mrb[7].mxu1  ;;  %v391_v4 = vmax.f32 %v383_v62, 0.0 }
 0x10d   :  { %v392_v5 = vmax.f32 %v386_v2, 0.0 }
 0x10f   :  { %v471_v6 = vpack.c.bf16 %v392_v5, %v391_v4 }
 0x111   :  { %473 = vst [vmem:[%s693_s3 + $0x8] sm:$0xff] %v471_v6  }

// kernel: dave_forward.10
= control target key start
LH: loop header
LB: loop body
LE: loop exit
PB: predicated region body
PF: predicated region fallthrough
CT: control target
= control target key end

     0   :  { %v642_v33 = vmov 0.0   ;;  %vm643_vm0 = vmmov 0   ;;  %vm341_vm1 = vcmask 523264   ;;  %s793_s1 = inlined_call_operand.vmem [shape: bf16[576,128], index: 1, kind: input, shape index: {}]   ;;  %s794_s0 = inlined_call_operand.vmem [shape: bf16[16,576], index: 0, kind: input, shape index: {}]   ;;  %s795_s2 = inlined_call_operand.vmem [shape: f32[1,128], index: 2, kind: input, shape index: {}]   ;;  %s796_s3 = inlined_call_operand.vmem [shape: bf16[16,128], index: 3, kind: output, shape index: {}]  }
   0x1   :  { %v599_v0 = vld [vmem:[%s793_s1 + $0x40] sm:$0xff]   ;;  %v603_v4 = vld [vmem:[%s793_s1 + $0x48] sm:$0xff]   ;;  %v607_v8 = vld [vmem:[%s793_s1 + $0x50] sm:$0xff]  }
   0x2   :  { %v600_v1 = vld [vmem:[%s793_s1] sm:$0xff]   ;;  %536 = vmatprep.subr.bf16.mxu0 %v599_v0  ;;  %v604_v5 = vld [vmem:[%s793_s1 + $0x8] sm:$0xff]   ;;  %v608_v9 = vld [vmem:[%s793_s1 + $0x10] sm:$0xff]  }
   0x3   :  { %v601_v2 = vld [vmem:[%s793_s1 + $0xc0] sm:$0xff]   ;;  %537 = vmatpush3.bf16.msra.mxu0 %v600_v1  ;;  %v605_v6 = vld [vmem:[%s793_s1 + $0xc8] sm:$0xff]   ;;  %v609_v10 = vld [vmem:[%s793_s1 + $0xd0] sm:$0xff]  }
   0x4   :  { %v602_v3 = vld [vmem:[%s793_s1 + $0x80] sm:$0xff]   ;;  %558 = vmatprep.subr.bf16.mxu1 %v601_v2  ;;  %538 = vmatprep.subr.bf16.mxu0 %v603_v4  ;;  %v606_v7 = vld [vmem:[%s793_s1 + $0x88] sm:$0xff]   ;;  %v610_v11 = vld [vmem:[%s793_s1 + $0x90] sm:$0xff]  }
   0x5   :  { %559 = vmatpush3.bf16.msra.mxu1 %v602_v3  ;;  %v611_v12 = vld [vmem:[%s793_s1 + $0x58] sm:$0xff]   ;;  %v615_v16 = vld [vmem:[%s793_s1 + $0x60] sm:$0xff]   ;;  %v619_v20 = vld [vmem:[%s793_s1 + $0x68] sm:$0xff]  }
   0x6   :  { %560 = vmatprep.subr.bf16.mxu1 %v605_v6  ;;  %v612_v13 = vld [vmem:[%s793_s1 + $0x18] sm:$0xff]   ;;  %v616_v17 = vld [vmem:[%s793_s1 + $0x20] sm:$0xff]   ;;  %v620_v21 = vld [vmem:[%s793_s1 + $0x28] sm:$0xff]  }
   0x7   :  { %539 = vmatpush3.bf16.msra.mxu0 %v604_v5  ;;  %v613_v14 = vld [vmem:[%s793_s1 + $0xd8] sm:$0xff]   ;;  %v617_v18 = vld [vmem:[%s793_s1 + $0xe0] sm:$0xff]   ;;  %v621_v22 = vld [vmem:[%s793_s1 + $0xe8] sm:$0xff]  }
   0x8   :  { %540 = vmatprep.subr.bf16.mxu0 %v607_v8  ;;  %v614_v15 = vld [vmem:[%s793_s1 + $0x98] sm:$0xff]   ;;  %v618_v19 = vld [vmem:[%s793_s1 + $0xa0] sm:$0xff]   ;;  %v622_v23 = vld [vmem:[%s793_s1 + $0xa8] sm:$0xff]  }
   0x9   :  { %561 = vmatpush3.bf16.msra.mxu1 %v606_v7  ;;  %v623_v24 = vld [vmem:[%s793_s1 + $0x70] sm:$0xff]   ;;  %v627_v28 = vld [vmem:[%s793_s1 + $0x78] sm:$0xff]   ;;  %v636_v36 = vld [vmem:[%s794_s0 + $0xc] ss:$20 sps:$4 sm:$0xff]  }
   0xa   :  { %562 = vmatprep.subr.bf16.mxu1 %v609_v10  ;;  %v624_v25 = vld [vmem:[%s793_s1 + $0x30] sm:$0xff]   ;;  %v628_v29 = vld [vmem:[%s793_s1 + $0x38] sm:$0xff]   ;;  %v637_v37 = vld [vmem:[%s793_s1 + $0x100] sm:$0xff]   ;;  %418 = vmatprep.mubr.bf16.mxu1 %v636_v36 }
   0xb   :  { %541 = vmatpush3.bf16.msra.mxu0 %v608_v9  ;;  %v625_v26 = vld [vmem:[%s793_s1 + $0xf0] sm:$0xff]   ;;  %v629_v30 = vld [vmem:[%s793_s1 + $0xf8] sm:$0xff]   ;;  %v638_v38 = vld [vmem:[%s793_s1 + $0x108] sm:$0xff]  }
   0xc   :  { %542 = vmatprep.subr.bf16.mxu0 %v611_v12  ;;  %v626_v27 = vld [vmem:[%s793_s1 + $0xb0] sm:$0xff]   ;;  %v632_v32 = vld [vmem:[%s794_s0 + $0x4] ss:$20 sps:$4 sm:$0xff]   ;;  %v634_v35 = vld [vmem:[%s794_s0 + $0x8] ss:$20 sps:$4 sm:$0xff]  }
   0xd   :  { %563 = vmatpush3.bf16.msra.mxu1 %v610_v11  ;;  %v630_v31 = vld [vmem:[%s794_s0] ss:$20 sps:$4 sm:$0xff]   ;;  %v633_v34 = vld [vmem:[%s793_s1 + $0xb8] sm:$0xff]   ;;  %377 = vmatprep.mubr.bf16.mxu0 %v632_v32  ;;  %v641_v41 = vld [vmem:[%s794_s0 + $0x10] ss:$20 sps:$4 sm:$0xff]  }
   0xe   :  { %564 = vmatprep.subr.bf16.mxu1 %v613_v14  ;;  %v639_v39 = vld [vmem:[%s793_s1 + $0x110] sm:$0xff]   ;;  %v640_v40 = vld [vmem:[%s793_s1 + $0x118] sm:$0xff]   ;;  %v484_v43 = vld [vmem:[%s795_s2] ss:$0 sm:$0xff] }
   0xf   :  { %543 = vmatpush3.bf16.msra.mxu0 %v612_v13 }
  0x10   :  { %544 = vmatprep.subr.bf16.mxu0 %v615_v16 }
  0x11   :  { %565 = vmatpush3.bf16.msra.mxu1 %v614_v15 }
  0x12   :  { %566 = vmatprep.subr.bf16.mxu1 %v617_v18 }
  0x13   :  { %545 = vmatpush3.bf16.msra.mxu0 %v616_v17 }
  0x14   :  { %546 = vmatprep.subr.bf16.mxu0 %v619_v20 }
  0x15   :  { %567 = vmatpush3.bf16.msra.mxu1 %v618_v19 }
  0x16   :  { %568 = vmatprep.subr.bf16.mxu1 %v621_v22 }
  0x17   :  { %547 = vmatpush3.bf16.msra.mxu0 %v620_v21 }
  0x18   :  { %548 = vmatprep.subr.bf16.mxu0 %v623_v24 }
  0x19   :  { %569 = vmatpush3.bf16.msra.mxu1 %v622_v23 }
  0x1a   :  { %570 = vmatprep.subr.bf16.mxu1 %v625_v26 }
  0x1b   :  { %549 = vmatpush3.bf16.msra.mxu0 %v624_v25 }
  0x1c   :  { %550 = vmatprep.subr.bf16.mxu0 %v627_v28 }
  0x1d   :  { %571 = vmatpush3.bf16.msra.mxu1 %v626_v27 }
  0x1e   :  { %572 = vmatprep.subr.bf16.mxu1 %v629_v30 }
  0x1f   :  { %551 = vmatpush3.bf16.msra.mxu0 %v628_v29 }
  0x20   :  { %585 = vmatprep.subr.bf16.mxu0 %v642_v33 }
  0x21   :  { %573 = vmatpush3.bf16.msra.mxu1 %v633_v34 }
  0x22   :  { %378 = vmatmul.mubr.bf16.vlgmr.msra.gmra.mrb[0].mxu0 %v630_v31 }
  0x23   :  { %593 = vmatprep.mubr.msk.bf16.mxu0 %vm643_vm0, %v642_v33  ;;  %586 = vmatpush3.bf16.msra.mxu0 %v637_v37 }
  0x24   :  { %419 = vmatmul.mubr.bf16.vlgmr.msra.gmra.mrb[0].mxu1 %v634_v35  ;;  %587 = vmatprep.subr.bf16.mxu0 %v642_v33 }
  0x27   :  { %588 = vmatpush3.bf16.msra.mxu0 %v638_v38 }
  0x28   :  { %589 = vmatprep.subr.bf16.mxu0 %v642_v33 }
  0x2b   :  { %590 = vmatpush3.bf16.msra.mxu0 %v639_v39 }
  0x2c   :  { %591 = vmatprep.subr.bf16.mxu0 %v642_v33 }
  0x2f   :  { %592 = vmatpush3.bf16.msra.mxu0 %v640_v40 }
  0x32   :  { %594 = vmatmul.mubr.msk.bf16.vlgmr.msra.gmra.mrb[4].mxu0 %vm341_vm1, %v641_v41 }
  0xf5   :  { %v552_v42 = vpop.f32.mrb[0].mxu0 }
  0xf6   :  { %v553_v44 = vpop.f32.mrb[1].mxu0 }
  0xf7   :  { %v554_v45 = vadd.f32 %v553_v44, %v552_v42  ;;  %v555_v46 = vpop.f32.mrb[2].mxu0  ;;  %v574_v47 = vpop.f32.mrb[0].mxu1 }
  0xf8   :  { %v556_v48 = vpop.f32.mrb[3].mxu0  ;;  %v575_v51 = vpop.f32.mrb[1].mxu1 }
  0xf9   :  { %v380_v49 = vadd.f32 %v554_v45, %v484_v43  ;;  %v557_v50 = vadd.f32 %v556_v48, %v555_v46  ;;  %v576_v52 = vadd.f32 %v575_v51, %v574_v47  ;;  %v577_v53 = vpop.f32.mrb[2].mxu1 }
  0xfa   :  { %v578_v55 = vpop.f32.mrb[3].mxu1 }
  0xfb   :  { %v383_v54 = vadd.f32 %v557_v50, %v484_v43  ;;  %v579_v56 = vadd.f32 %v578_v55, %v577_v53  ;;  %v421_v57 = vadd.f32 %v576_v52, %v380_v49 }
  0xfd   :  { %v424_v58 = vadd.f32 %v579_v56, %v383_v54 }
 0x105   :  { %v461_v59 = vpop.f32.mrb[4].mxu0 }
 0x106   :  { %v462_v60 = vadd.f32 %v461_v59, %v421_v57  ;;  %v595_v61 = vpop.f32.mrb[5].mxu0 }
 0x107   :  { %v464_v62 = vpop.f32.mrb[6].mxu0 }
 0x108   :  { %v465_v63 = vadd.f32 %v464_v62, %v424_v58  ;;  %v596_v0 = vpop.f32.mrb[7].mxu0  ;;  %v468_v1 = vmax.f32 %v462_v60, 0.0 }
 0x10a   :  { %v469_v2 = vmax.f32 %v465_v63, 0.0 }
 0x10c   :  { %v534_v3 = vpack.c.bf16 %v469_v2, %v468_v1 }
 0x10e   :  { %535 = vst [vmem:[%s796_s3] sm:$0xff] %v534_v3  }

// kernel: dave_forward.11
= control target key start
LH: loop header
LB: loop body
LE: loop exit
PB: predicated region body
PF: predicated region fallthrough
CT: control target
= control target key end

     0   :  { %vm3330_vm0 = vmmov 0   ;;  %s4285_s1 = inlined_call_operand.vmem [shape: bf16[256,1280], index: 1, kind: input, shape index: {}]   ;;  %s4286_s0 = inlined_call_operand.vmem [shape: bf16[16,256], index: 0, kind: input, shape index: {}]   ;;  %s4287_s3 = inlined_call_operand.vmem [shape: bf16[1280,128], index: 3, kind: input, shape index: {}]   ;;  %s4288_s2 = inlined_call_operand.vmem [shape: f32[1,1280], index: 2, kind: input, shape index: {}]   ;;  %s4289_s5 = inlined_call_operand.vmem [shape: bf16[128,128], index: 5, kind: input, shape index: {}]   ;;  %s4290_s7 = inlined_call_operand.vmem [shape: bf16[128,128], index: 7, kind: input, shape index: {}]   ;;  %s4291_s4 = inlined_call_operand.vmem [shape: f32[1,128], index: 4, kind: input, shape index: {}]   ;;  %s4292_s9 = inlined_call_operand.vmem [shape: bf16[128,128], index: 9, kind: input, shape index: {}]   ;;  %s4293_s6 = inlined_call_operand.vmem [shape: f32[1,128], index: 6, kind: input, shape index: {}]   ;;  %s4294_s8 = inlined_call_operand.vmem [shape: f32[1,128], index: 8, kind: input, shape index: {}]   ;;  %s4295_s10 = inlined_call_operand.vmem [shape: f32[1,128], index: 10, kind: input, shape index: {}]   ;;  %s4296_s11 = inlined_call_operand.vmem [shape: f32[16,128], index: 11, kind: output, shape index: {}]  }
   0x1   :  { %v2982_v0 = vld [vmem:[%s4285_s1 + $0x4] ss:$40 sps:$4 sm:$0xff]   ;;  %v2984_v1 = vld [vmem:[%s4285_s1] ss:$40 sps:$4 sm:$0xff]   ;;  %v2988_v4 = vld [vmem:[%s4285_s1 + $0x54] ss:$40 sps:$4 sm:$0xff]  }
   0x2   :  { %1065 = vmatprep.subr.bf16.mxu0 %v2982_v0  ;;  %v2985_v2 = vld [vmem:[%s4285_s1 + $0xc] ss:$40 sps:$4 sm:$0xff]   ;;  %v2987_v3 = vld [vmem:[%s4285_s1 + $0x8] ss:$40 sps:$4 sm:$0xff]   ;;  %v2991_v6 = vld [vmem:[%s4285_s1 + $0x5c] ss:$40 sps:$4 sm:$0xff]  }
   0x3   :  { %1066 = vmatpush1.bf16.msra.mxu0 %v2984_v1  ;;  %v2990_v5 = vld [vmem:[%s4285_s1 + $0x50] ss:$40 sps:$4 sm:$0xff]   ;;  %1108 = vmatprep.subr.bf16.mxu1 %v2985_v2  ;;  %v2994_v8 = vld [vmem:[%s4285_s1 + $0xa4] ss:$40 sps:$4 sm:$0xff]   ;;  %v2996_v9 = vld [vmem:[%s4285_s1 + $0xa0] ss:$40 sps:$4 sm:$0xff]  }
   0x4   :  { %1109 = vmatpush1.bf16.msra.mxu1 %v2987_v3  ;;  %1067 = vmatprep.subr.bf16.mxu0 %v2988_v4  ;;  %v2993_v7 = vld [vmem:[%s4285_s1 + $0x58] ss:$40 sps:$4 sm:$0xff]   ;;  %v2997_v10 = vld [vmem:[%s4285_s1 + $0xac] ss:$40 sps:$4 sm:$0xff]   ;;  %v2999_v12 = vld [vmem:[%s4285_s1 + $0xa8] ss:$40 sps:$4 sm:$0xff]  }
   0x5   :  { %1110 = vmatprep.subr.bf16.mxu1 %v2991_v6  ;;  %v3000_v11 = vld [vmem:[%s4285_s1 + $0xf4] ss:$40 sps:$4 sm:$0xff]   ;;  %v3002_v14 = vld [vmem:[%s4285_s1 + $0xf0] ss:$40 sps:$4 sm:$0xff]   ;;  %v3006_v15 = vld [vmem:[%s4285_s1 + $0x144] ss:$40 sps:$4 sm:$0xff]  }
   0x6   :  { %v3003_v13 = vld [vmem:[%s4285_s1 + $0xfc] ss:$40 sps:$4 sm:$0xff]   ;;  %v3005_v16 = vld [vmem:[%s4285_s1 + $0xf8] ss:$40 sps:$4 sm:$0xff]   ;;  %v3009_v17 = vld [vmem:[%s4285_s1 + $0x14c] ss:$40 sps:$4 sm:$0xff]  }
   0x7   :  { %1068 = vmatpush1.bf16.msra.mxu0 %v2990_v5  ;;  %v3008_v18 = vld [vmem:[%s4285_s1 + $0x140] ss:$40 sps:$4 sm:$0xff]   ;;  %v3012_v19 = vld [vmem:[%s4285_s1 + $0x194] ss:$40 sps:$4 sm:$0xff]   ;;  %v3014_v22 = vld [vmem:[%s4285_s1 + $0x190] ss:$40 sps:$4 sm:$0xff]  }
   0x8   :  { %1069 = vmatprep.subr.bf16.mxu0 %v2994_v8  ;;  %1111 = vmatpush1.bf16.msra.mxu1 %v2993_v7  ;;  %v3011_v20 = vld [vmem:[%s4285_s1 + $0x148] ss:$40 sps:$4 sm:$0xff]   ;;  %v3015_v21 = vld [vmem:[%s4285_s1 + $0x19c] ss:$40 sps:$4 sm:$0xff]   ;;  %v3017_v24 = vld [vmem:[%s4285_s1 + $0x198] ss:$40 sps:$4 sm:$0xff]  }
   0x9   :  { %1112 = vmatprep.subr.bf16.mxu1 %v2997_v10  ;;  %v3018_v23 = vld [vmem:[%s4285_s1 + $0x1e4] ss:$40 sps:$4 sm:$0xff]   ;;  %v3020_v26 = vld [vmem:[%s4285_s1 + $0x1e0] ss:$40 sps:$4 sm:$0xff]   ;;  %v3024_v27 = vld [vmem:[%s4285_s1 + $0x234] ss:$40 sps:$4 sm:$0xff]  }
   0xa   :  { %v3021_v25 = vld [vmem:[%s4285_s1 + $0x1ec] ss:$40 sps:$4 sm:$0xff]   ;;  %v3023_v28 = vld [vmem:[%s4285_s1 + $0x1e8] ss:$40 sps:$4 sm:$0xff]   ;;  %v3027_v29 = vld [vmem:[%s4285_s1 + $0x23c] ss:$40 sps:$4 sm:$0xff]  }
   0xb   :  { %1070 = vmatpush1.bf16.msra.mxu0 %v2996_v9  ;;  %v3026_v30 = vld [vmem:[%s4285_s1 + $0x230] ss:$40 sps:$4 sm:$0xff]   ;;  %v3030_v31 = vld [vmem:[%s4285_s1 + $0x284] ss:$40 sps:$4 sm:$0xff]   ;;  %v3032_v34 = vld [vmem:[%s4285_s1 + $0x280] ss:$40 sps:$4 sm:$0xff]  }
   0xc   :  { %1071 = vmatprep.subr.bf16.mxu0 %v3000_v11  ;;  %1113 = vmatpush1.bf16.msra.mxu1 %v2999_v12  ;;  %v3029_v32 = vld [vmem:[%s4285_s1 + $0x238] ss:$40 sps:$4 sm:$0xff]   ;;  %v3033_v33 = vld [vmem:[%s4285_s1 + $0x28c] ss:$40 sps:$4 sm:$0xff]   ;;  %v3035_v36 = vld [vmem:[%s4285_s1 + $0x288] ss:$40 sps:$4 sm:$0xff]  }
   0xd   :  { %1114 = vmatprep.subr.bf16.mxu1 %v3003_v13  ;;  %v3036_v35 = vld [vmem:[%s4285_s1 + $0x2d4] ss:$40 sps:$4 sm:$0xff]   ;;  %v3038_v38 = vld [vmem:[%s4285_s1 + $0x2d0] ss:$40 sps:$4 sm:$0xff]   ;;  %v3042_v39 = vld [vmem:[%s4285_s1 + $0x324] ss:$40 sps:$4 sm:$0xff]  }
   0xe   :  { %v3039_v37 = vld [vmem:[%s4285_s1 + $0x2dc] ss:$40 sps:$4 sm:$0xff]   ;;  %v3041_v40 = vld [vmem:[%s4285_s1 + $0x2d8] ss:$40 sps:$4 sm:$0xff]   ;;  %v3045_v41 = vld [vmem:[%s4285_s1 + $0x32c] ss:$40 sps:$4 sm:$0xff]  }
   0xf   :  { %1072 = vmatpush1.bf16.msra.mxu0 %v3002_v14  ;;  %v3044_v42 = vld [vmem:[%s4285_s1 + $0x320] ss:$40 sps:$4 sm:$0xff]   ;;  %v3048_v43 = vld [vmem:[%s4285_s1 + $0x374] ss:$40 sps:$4 sm:$0xff]   ;;  %v3050_v46 = vld [vmem:[%s4285_s1 + $0x370] ss:$40 sps:$4 sm:$0xff]  }
  0x10   :  { %1073 = vmatprep.subr.bf16.mxu0 %v3006_v15  ;;  %1115 = vmatpush1.bf16.msra.mxu1 %v3005_v16  ;;  %v3047_v44 = vld [vmem:[%s4285_s1 + $0x328] ss:$40 sps:$4 sm:$0xff]   ;;  %v3051_v45 = vld [vmem:[%s4285_s1 + $0x37c] ss:$40 sps:$4 sm:$0xff]   ;;  %v3053_v49 = vld [vmem:[%s4285_s1 + $0x378] ss:$40 sps:$4 sm:$0xff]  }
  0x11   :  { %1116 = vmatprep.subr.bf16.mxu1 %v3009_v17  ;;  %v3535_v47 = vld [vmem:[%s4286_s0 + $0x4] ss:$8 sps:$4 sm:$0xff]   ;;  %v3056_v51 = vld [vmem:[%s4285_s1 + $0x3c0] ss:$40 sps:$4 sm:$0xff]   ;;  %v3060_v52 = vld [vmem:[%s4285_s1 + $0x414] ss:$40 sps:$4 sm:$0xff]  }
  0x12   :  { %v3054_v48 = vld [vmem:[%s4285_s1 + $0x3c4] ss:$40 sps:$4 sm:$0xff]   ;;  %1097 = vmatprep.mubr.bf16.mxu0 %v3535_v47  ;;  %1140 = vmatprep.mubr.bf16.mxu1 %v3535_v47  ;;  %v3059_v53 = vld [vmem:[%s4285_s1 + $0x3c8] ss:$40 sps:$4 sm:$0xff]   ;;  %v3065_v57 = vld [vmem:[%s4285_s1 + $0x418] ss:$40 sps:$4 sm:$0xff]  }
  0x13   :  { %1074 = vmatpush1.bf16.msra.mxu0 %v3008_v18  ;;  %v3057_v50 = vld [vmem:[%s4285_s1 + $0x3cc] ss:$40 sps:$4 sm:$0xff]   ;;  %v3063_v54 = vld [vmem:[%s4285_s1 + $0x41c] ss:$40 sps:$4 sm:$0xff]   ;;  %v3062_v55 = vld [vmem:[%s4285_s1 + $0x410] ss:$40 sps:$4 sm:$0xff]  }
  0x14   :  { %1075 = vmatprep.subr.bf16.mxu0 %v3012_v19  ;;  %1117 = vmatpush1.bf16.msra.mxu1 %v3011_v20  ;;  %v3066_v56 = vld [vmem:[%s4285_s1 + $0x464] ss:$40 sps:$4 sm:$0xff]   ;;  %v3068_v59 = vld [vmem:[%s4285_s1 + $0x460] ss:$40 sps:$4 sm:$0xff]   ;;  %v3072_v60 = vld [vmem:[%s4285_s1 + $0x4b4] ss:$40 sps:$4 sm:$0xff]  }
  0x15   :  { %1118 = vmatprep.subr.bf16.mxu1 %v3015_v21  ;;  %v3069_v58 = vld [vmem:[%s4285_s1 + $0x46c] ss:$40 sps:$4 sm:$0xff]   ;;  %v3071_v61 = vld [vmem:[%s4285_s1 + $0x468] ss:$40 sps:$4 sm:$0xff]   ;;  %v3075_v62 = vld [vmem:[%s4285_s1 + $0x4bc] ss:$40 sps:$4 sm:$0xff]  }
  0x16   :  { %v3074_v63 = vld [vmem:[%s4285_s1 + $0x4b0] ss:$40 sps:$4 sm:$0xff]   ;;  %v3083_v0 = vld [vmem:[%s4285_s1 + $0x14] ss:$40 sps:$4 sm:$0xff]   ;;  %v3596_v2 = vld [vmem:[%s4286_s0] ss:$8 sps:$4 sm:$0xff]  }
  0x17   :  { %1076 = vmatpush1.bf16.msra.mxu0 %v3014_v22  ;;  %v3079_v1 = vld [vmem:[%s4285_s1 + $0x4b8] ss:$40 sps:$4 sm:$0xff]   ;;  %v3086_v3 = vld [vmem:[%s4285_s1 + $0x1c] ss:$40 sps:$4 sm:$0xff]   ;;  %v3092_v7 = vld [vmem:[%s4285_s1 + $0x6c] ss:$40 sps:$4 sm:$0xff]  }
  0x18   :  { %1077 = vmatprep.subr.bf16.mxu0 %v3018_v23  ;;  %1119 = vmatpush1.bf16.msra.mxu1 %v3017_v24  ;;  %v3081_v4 = vld [vmem:[%s4285_s1 + $0x10] ss:$40 sps:$4 sm:$0xff]   ;;  %v3089_v5 = vld [vmem:[%s4285_s1 + $0x64] ss:$40 sps:$4 sm:$0xff]   ;;  %v3087_v8 = vld [vmem:[%s4285_s1 + $0x60] ss:$40 sps:$4 sm:$0xff]  }
  0x19   :  { %1120 = vmatprep.subr.bf16.mxu1 %v3021_v25  ;;  %v3084_v6 = vld [vmem:[%s4285_s1 + $0x18] ss:$40 sps:$4 sm:$0xff]   ;;  %v3095_v9 = vld [vmem:[%s4285_s1 + $0xb4] ss:$40 sps:$4 sm:$0xff]   ;;  %v3090_v10 = vld [vmem:[%s4285_s1 + $0x68] ss:$40 sps:$4 sm:$0xff]  }
  0x1a   :  { %v3098_v11 = vld [vmem:[%s4285_s1 + $0xbc] ss:$40 sps:$4 sm:$0xff]   ;;  %v3093_v12 = vld [vmem:[%s4285_s1 + $0xb0] ss:$40 sps:$4 sm:$0xff]   ;;  %v3104_v15 = vld [vmem:[%s4285_s1 + $0x10c] ss:$40 sps:$4 sm:$0xff]  }
  0x1b   :  { %1078 = vmatpush1.bf16.msra.mxu0 %v3020_v26  ;;  %v3101_v13 = vld [vmem:[%s4285_s1 + $0x104] ss:$40 sps:$4 sm:$0xff]   ;;  %v3096_v14 = vld [vmem:[%s4285_s1 + $0xb8] ss:$40 sps:$4 sm:$0xff]   ;;  %v3107_v17 = vld [vmem:[%s4285_s1 + $0x154] ss:$40 sps:$4 sm:$0xff]  }
  0x1c   :  { %1079 = vmatprep.subr.bf16.mxu0 %v3024_v27  ;;  %1121 = vmatpush1.bf16.msra.mxu1 %v3023_v28  ;;  %v3099_v16 = vld [vmem:[%s4285_s1 + $0x100] ss:$40 sps:$4 sm:$0xff]   ;;  %v3110_v19 = vld [vmem:[%s4285_s1 + $0x15c] ss:$40 sps:$4 sm:$0xff]   ;;  %v3105_v20 = vld [vmem:[%s4285_s1 + $0x150] ss:$40 sps:$4 sm:$0xff]  }
  0x1d   :  { %1122 = vmatprep.subr.bf16.mxu1 %v3027_v29  ;;  %v3102_v18 = vld [vmem:[%s4285_s1 + $0x108] ss:$40 sps:$4 sm:$0xff]   ;;  %v3113_v21 = vld [vmem:[%s4285_s1 + $0x1a4] ss:$40 sps:$4 sm:$0xff]   ;;  %v3108_v22 = vld [vmem:[%s4285_s1 + $0x158] ss:$40 sps:$4 sm:$0xff]  }
  0x1e   :  { %v3116_v23 = vld [vmem:[%s4285_s1 + $0x1ac] ss:$40 sps:$4 sm:$0xff]   ;;  %v3111_v24 = vld [vmem:[%s4285_s1 + $0x1a0] ss:$40 sps:$4 sm:$0xff]   ;;  %v3122_v27 = vld [vmem:[%s4285_s1 + $0x1fc] ss:$40 sps:$4 sm:$0xff]  }
  0x1f   :  { %1080 = vmatpush1.bf16.msra.mxu0 %v3026_v30  ;;  %v3119_v25 = vld [vmem:[%s4285_s1 + $0x1f4] ss:$40 sps:$4 sm:$0xff]   ;;  %v3114_v26 = vld [vmem:[%s4285_s1 + $0x1a8] ss:$40 sps:$4 sm:$0xff]   ;;  %v3125_v29 = vld [vmem:[%s4285_s1 + $0x244] ss:$40 sps:$4 sm:$0xff]  }
  0x20   :  { %1081 = vmatprep.subr.bf16.mxu0 %v3030_v31  ;;  %1123 = vmatpush1.bf16.msra.mxu1 %v3029_v32  ;;  %v3117_v28 = vld [vmem:[%s4285_s1 + $0x1f0] ss:$40 sps:$4 sm:$0xff]   ;;  %v3128_v31 = vld [vmem:[%s4285_s1 + $0x24c] ss:$40 sps:$4 sm:$0xff]   ;;  %v3123_v32 = vld [vmem:[%s4285_s1 + $0x240] ss:$40 sps:$4 sm:$0xff]  }
  0x21   :  { %1124 = vmatprep.subr.bf16.mxu1 %v3033_v33  ;;  %v3120_v30 = vld [vmem:[%s4285_s1 + $0x1f8] ss:$40 sps:$4 sm:$0xff]   ;;  %v3131_v33 = vld [vmem:[%s4285_s1 + $0x294] ss:$40 sps:$4 sm:$0xff]  }
  0x23   :  { %1082 = vmatpush1.bf16.msra.mxu0 %v3032_v34  ;;  %v3126_v34 = vld [vmem:[%s4285_s1 + $0x248] ss:$40 sps:$4 sm:$0xff]  }
  0x24   :  { %1083 = vmatprep.subr.bf16.mxu0 %v3036_v35  ;;  %1125 = vmatpush1.bf16.msra.mxu1 %v3035_v36  ;;  %v3134_v35 = vld [vmem:[%s4285_s1 + $0x29c] ss:$40 sps:$4 sm:$0xff]   ;;  %v3129_v36 = vld [vmem:[%s4285_s1 + $0x290] ss:$40 sps:$4 sm:$0xff]  }
  0x25   :  { %1126 = vmatprep.subr.bf16.mxu1 %v3039_v37  ;;  %v3137_v37 = vld [vmem:[%s4285_s1 + $0x2e4] ss:$40 sps:$4 sm:$0xff]  }
  0x27   :  { %1084 = vmatpush1.bf16.msra.mxu0 %v3038_v38  ;;  %v3132_v38 = vld [vmem:[%s4285_s1 + $0x298] ss:$40 sps:$4 sm:$0xff]  }
  0x28   :  { %1085 = vmatprep.subr.bf16.mxu0 %v3042_v39  ;;  %1127 = vmatpush1.bf16.msra.mxu1 %v3041_v40  ;;  %v3140_v39 = vld [vmem:[%s4285_s1 + $0x2ec] ss:$40 sps:$4 sm:$0xff]   ;;  %v3135_v40 = vld [vmem:[%s4285_s1 + $0x2e0] ss:$40 sps:$4 sm:$0xff]  }
  0x29   :  { %1128 = vmatprep.subr.bf16.mxu1 %v3045_v41  ;;  %v3143_v41 = vld [vmem:[%s4285_s1 + $0x334] ss:$40 sps:$4 sm:$0xff]  }
  0x2b   :  { %1086 = vmatpush1.bf16.msra.mxu0 %v3044_v42  ;;  %v3138_v42 = vld [vmem:[%s4285_s1 + $0x2e8] ss:$40 sps:$4 sm:$0xff]  }
  0x2c   :  { %1087 = vmatprep.subr.bf16.mxu0 %v3048_v43  ;;  %1129 = vmatpush1.bf16.msra.mxu1 %v3047_v44  ;;  %v3146_v43 = vld [vmem:[%s4285_s1 + $0x33c] ss:$40 sps:$4 sm:$0xff]   ;;  %v3141_v44 = vld [vmem:[%s4285_s1 + $0x330] ss:$40 sps:$4 sm:$0xff]  }
  0x2d   :  { %1130 = vmatprep.subr.bf16.mxu1 %v3051_v45  ;;  %v3149_v45 = vld [vmem:[%s4285_s1 + $0x384] ss:$40 sps:$4 sm:$0xff]  }
  0x2f   :  { %1088 = vmatpush1.bf16.msra.mxu0 %v3050_v46  ;;  %v3144_v46 = vld [vmem:[%s4285_s1 + $0x338] ss:$40 sps:$4 sm:$0xff]  }
  0x30   :  { %1089 = vmatprep.subr.bf16.mxu0 %v3054_v48  ;;  %1131 = vmatpush1.bf16.msra.mxu1 %v3053_v49  ;;  %v3152_v48 = vld [vmem:[%s4285_s1 + $0x38c] ss:$40 sps:$4 sm:$0xff]   ;;  %v3147_v49 = vld [vmem:[%s4285_s1 + $0x380] ss:$40 sps:$4 sm:$0xff]  }
  0x31   :  { %1132 = vmatprep.subr.bf16.mxu1 %v3057_v50  ;;  %v3150_v50 = vld [vmem:[%s4285_s1 + $0x388] ss:$40 sps:$4 sm:$0xff]  }
  0x33   :  { %1090 = vmatpush1.bf16.msra.mxu0 %v3056_v51  ;;  %v3155_v51 = vld [vmem:[%s4285_s1 + $0x3d4] ss:$40 sps:$4 sm:$0xff]  }
  0x34   :  { %1091 = vmatprep.subr.bf16.mxu0 %v3060_v52  ;;  %1133 = vmatpush1.bf16.msra.mxu1 %v3059_v53  ;;  %v3153_v52 = vld [vmem:[%s4285_s1 + $0x3d0] ss:$40 sps:$4 sm:$0xff]   ;;  %v3158_v53 = vld [vmem:[%s4285_s1 + $0x3dc] ss:$40 sps:$4 sm:$0xff]  }
  0x35   :  { %1134 = vmatprep.subr.bf16.mxu1 %v3063_v54  ;;  %v3156_v54 = vld [vmem:[%s4285_s1 + $0x3d8] ss:$40 sps:$4 sm:$0xff]  }
  0x37   :  { %1092 = vmatpush1.bf16.msra.mxu0 %v3062_v55  ;;  %v3161_v55 = vld [vmem:[%s4285_s1 + $0x424] ss:$40 sps:$4 sm:$0xff]  }
  0x38   :  { %1093 = vmatprep.subr.bf16.mxu0 %v3066_v56  ;;  %1135 = vmatpush1.bf16.msra.mxu1 %v3065_v57  ;;  %v3159_v56 = vld [vmem:[%s4285_s1 + $0x420] ss:$40 sps:$4 sm:$0xff]   ;;  %v3164_v57 = vld [vmem:[%s4285_s1 + $0x42c] ss:$40 sps:$4 sm:$0xff]  }
  0x39   :  { %1136 = vmatprep.subr.bf16.mxu1 %v3069_v58  ;;  %v3162_v58 = vld [vmem:[%s4285_s1 + $0x428] ss:$40 sps:$4 sm:$0xff]  }
  0x3b   :  { %1094 = vmatpush1.bf16.msra.mxu0 %v3068_v59  ;;  %v3167_v59 = vld [vmem:[%s4285_s1 + $0x474] ss:$40 sps:$4 sm:$0xff]  }
  0x3c   :  { %1095 = vmatprep.subr.bf16.mxu0 %v3072_v60  ;;  %1137 = vmatpush1.bf16.msra.mxu1 %v3071_v61  ;;  %v3165_v60 = vld [vmem:[%s4285_s1 + $0x470] ss:$40 sps:$4 sm:$0xff]   ;;  %v3170_v61 = vld [vmem:[%s4285_s1 + $0x47c] ss:$40 sps:$4 sm:$0xff]  }
  0x3d   :  { %1138 = vmatprep.subr.bf16.mxu1 %v3075_v62  ;;  %v3168_v62 = vld [vmem:[%s4285_s1 + $0x478] ss:$40 sps:$4 sm:$0xff]  }
  0x3f   :  { %1096 = vmatpush1.bf16.msra.mxu0 %v3074_v63  ;;  %v3173_v63 = vld [vmem:[%s4285_s1 + $0x4c4] ss:$40 sps:$4 sm:$0xff]  }
  0x40   :  { %1151 = vmatprep.subr.bf16.mxu0 %v3083_v0  ;;  %1139 = vmatpush1.bf16.msra.mxu1 %v3079_v1  ;;  %v3176_v0 = vld [vmem:[%s4285_s1 + $0x4cc] ss:$40 sps:$4 sm:$0xff]   ;;  %v3171_v1 = vld [vmem:[%s4285_s1 + $0x4c0] ss:$40 sps:$4 sm:$0xff]  }
  0x41   :  { %1194 = vmatprep.subr.bf16.mxu1 %v3086_v3  ;;  %v3179_v3 = vld [vmem:[%s4285_s1 + $0x24] ss:$40 sps:$4 sm:$0xff]  }
  0x42   :  { %1098 = vmatmul.mubr.bf16.vlgmr.msra.gmra.mrb[0].mxu0 %v3596_v2 }
  0x43   :  { %1152 = vmatpush1.bf16.msra.mxu0 %v3081_v4  ;;  %1183 = vmatprep.mubr.bf16.mxu0 %v3535_v47  ;;  %v3174_v4 = vld [vmem:[%s4285_s1 + $0x4c8] ss:$40 sps:$4 sm:$0xff]  }
  0x44   :  { %1141 = vmatmul.mubr.bf16.vlgmr.msra.gmra.mrb[0].mxu1 %v3596_v2  ;;  %1153 = vmatprep.subr.bf16.mxu0 %v3089_v5  ;;  %v3225_v5 = vld [vmem:[%s4287_s3 + $0x40] sm:$0xff]  }
  0x45   :  { %1195 = vmatpush1.bf16.msra.mxu1 %v3084_v6  ;;  %1226 = vmatprep.mubr.bf16.mxu1 %v3535_v47  ;;  %v3177_v6 = vld [vmem:[%s4285_s1 + $0x20] ss:$40 sps:$4 sm:$0xff]  }
  0x46   :  { %1196 = vmatprep.subr.bf16.mxu1 %v3092_v7  ;;  %v3182_v7 = vld [vmem:[%s4285_s1 + $0x74] ss:$40 sps:$4 sm:$0xff]  }
  0x47   :  { %1154 = vmatpush1.bf16.msra.mxu0 %v3087_v8  ;;  %v3226_v8 = vld [vmem:[%s4287_s3] sm:$0xff]  }
  0x48   :  { %1155 = vmatprep.subr.bf16.mxu0 %v3095_v9  ;;  %v3227_v9 = vld [vmem:[%s4287_s3 + $0x48] sm:$0xff]  }
  0x49   :  { %1197 = vmatpush1.bf16.msra.mxu1 %v3090_v10  ;;  %v3180_v10 = vld [vmem:[%s4285_s1 + $0x70] ss:$40 sps:$4 sm:$0xff]  }
  0x4a   :  { %1198 = vmatprep.subr.bf16.mxu1 %v3098_v11  ;;  %v3185_v11 = vld [vmem:[%s4285_s1 + $0xc4] ss:$40 sps:$4 sm:$0xff]  }
  0x4b   :  { %1156 = vmatpush1.bf16.msra.mxu0 %v3093_v12  ;;  %v3228_v12 = vld [vmem:[%s4287_s3 + $0x8] sm:$0xff]  }
  0x4c   :  { %1157 = vmatprep.subr.bf16.mxu0 %v3101_v13  ;;  %v3229_v13 = vld [vmem:[%s4287_s3 + $0x50] sm:$0xff]  }
  0x4d   :  { %1199 = vmatpush1.bf16.msra.mxu1 %v3096_v14  ;;  %v3183_v14 = vld [vmem:[%s4285_s1 + $0xc0] ss:$40 sps:$4 sm:$0xff]  }
  0x4e   :  { %1200 = vmatprep.subr.bf16.mxu1 %v3104_v15  ;;  %v3230_v15 = vld [vmem:[%s4287_s3 + $0x10] sm:$0xff]  }
  0x4f   :  { %1158 = vmatpush1.bf16.msra.mxu0 %v3099_v16  ;;  %v3231_v16 = vld [vmem:[%s4287_s3 + $0x58] sm:$0xff]  }
  0x50   :  { %1159 = vmatprep.subr.bf16.mxu0 %v3107_v17  ;;  %v3186_v17 = vld [vmem:[%s4285_s1 + $0x110] ss:$40 sps:$4 sm:$0xff]  }
  0x51   :  { %1201 = vmatpush1.bf16.msra.mxu1 %v3102_v18  ;;  %v3191_v18 = vld [vmem:[%s4285_s1 + $0x164] ss:$40 sps:$4 sm:$0xff]  }
  0x52   :  { %1202 = vmatprep.subr.bf16.mxu1 %v3110_v19  ;;  %v3232_v19 = vld [vmem:[%s4287_s3 + $0x18] sm:$0xff]  }
  0x53   :  { %1160 = vmatpush1.bf16.msra.mxu0 %v3105_v20  ;;  %v3233_v20 = vld [vmem:[%s4287_s3 + $0x60] sm:$0xff]  }
  0x54   :  { %1161 = vmatprep.subr.bf16.mxu0 %v3113_v21  ;;  %v3189_v21 = vld [vmem:[%s4285_s1 + $0x160] ss:$40 sps:$4 sm:$0xff]  }
  0x55   :  { %1203 = vmatpush1.bf16.msra.mxu1 %v3108_v22  ;;  %v3194_v22 = vld [vmem:[%s4285_s1 + $0x1b4] ss:$40 sps:$4 sm:$0xff]  }
  0x56   :  { %1204 = vmatprep.subr.bf16.mxu1 %v3116_v23  ;;  %v3234_v23 = vld [vmem:[%s4287_s3 + $0x20] sm:$0xff]  }
  0x57   :  { %1162 = vmatpush1.bf16.msra.mxu0 %v3111_v24  ;;  %v3235_v24 = vld [vmem:[%s4287_s3 + $0x68] sm:$0xff]  }
  0x58   :  { %1163 = vmatprep.subr.bf16.mxu0 %v3119_v25  ;;  %v3192_v25 = vld [vmem:[%s4285_s1 + $0x1b0] ss:$40 sps:$4 sm:$0xff]  }
  0x59   :  { %1205 = vmatpush1.bf16.msra.mxu1 %v3114_v26  ;;  %v3197_v26 = vld [vmem:[%s4285_s1 + $0x204] ss:$40 sps:$4 sm:$0xff]  }
  0x5a   :  { %1206 = vmatprep.subr.bf16.mxu1 %v3122_v27  ;;  %v3195_v27 = vld [vmem:[%s4285_s1 + $0x200] ss:$40 sps:$4 sm:$0xff]  }
  0x5b   :  { %1164 = vmatpush1.bf16.msra.mxu0 %v3117_v28  ;;  %v3236_v28 = vld [vmem:[%s4287_s3 + $0x28] sm:$0xff]  }
  0x5c   :  { %1165 = vmatprep.subr.bf16.mxu0 %v3125_v29  ;;  %v3200_v29 = vld [vmem:[%s4285_s1 + $0x254] ss:$40 sps:$4 sm:$0xff]  }
  0x5d   :  { %1207 = vmatpush1.bf16.msra.mxu1 %v3120_v30  ;;  %v3237_v30 = vld [vmem:[%s4287_s3 + $0x70] sm:$0xff]  }
  0x5e   :  { %1208 = vmatprep.subr.bf16.mxu1 %v3128_v31  ;;  %v3198_v31 = vld [vmem:[%s4285_s1 + $0x250] ss:$40 sps:$4 sm:$0xff]  }
  0x5f   :  { %1166 = vmatpush1.bf16.msra.mxu0 %v3123_v32  ;;  %v3238_v32 = vld [vmem:[%s4287_s3 + $0x30] sm:$0xff]  }
  0x60   :  { %1167 = vmatprep.subr.bf16.mxu0 %v3131_v33  ;;  %v3203_v33 = vld [vmem:[%s4285_s1 + $0x2a4] ss:$40 sps:$4 sm:$0xff]  }
  0x61   :  { %1209 = vmatpush1.bf16.msra.mxu1 %v3126_v34  ;;  %v3239_v34 = vld [vmem:[%s4287_s3 + $0x78] sm:$0xff]  }
  0x62   :  { %1210 = vmatprep.subr.bf16.mxu1 %v3134_v35  ;;  %v3201_v35 = vld [vmem:[%s4285_s1 + $0x2a0] ss:$40 sps:$4 sm:$0xff]  }
  0x63   :  { %1168 = vmatpush1.bf16.msra.mxu0 %v3129_v36  ;;  %v3240_v36 = vld [vmem:[%s4287_s3 + $0x38] sm:$0xff]  }
  0x64   :  { %1169 = vmatprep.subr.bf16.mxu0 %v3137_v37  ;;  %v3206_v37 = vld [vmem:[%s4285_s1 + $0x2f4] ss:$40 sps:$4 sm:$0xff]  }
  0x65   :  { %1211 = vmatpush1.bf16.msra.mxu1 %v3132_v38  ;;  %v3241_v38 = vld [vmem:[%s4287_s3 + $0xc0] sm:$0xff]  }
  0x66   :  { %1212 = vmatprep.subr.bf16.mxu1 %v3140_v39  ;;  %v3204_v39 = vld [vmem:[%s4285_s1 + $0x2f0] ss:$40 sps:$4 sm:$0xff]  }
  0x67   :  { %1170 = vmatpush1.bf16.msra.mxu0 %v3135_v40  ;;  %v3209_v40 = vld [vmem:[%s4285_s1 + $0x344] ss:$40 sps:$4 sm:$0xff]  }
  0x68   :  { %1171 = vmatprep.subr.bf16.mxu0 %v3143_v41  ;;  %v3207_v41 = vld [vmem:[%s4285_s1 + $0x340] ss:$40 sps:$4 sm:$0xff]  }
  0x69   :  { %1213 = vmatpush1.bf16.msra.mxu1 %v3138_v42  ;;  %v3212_v42 = vld [vmem:[%s4285_s1 + $0x394] ss:$40 sps:$4 sm:$0xff]  }
  0x6a   :  { %1214 = vmatprep.subr.bf16.mxu1 %v3146_v43  ;;  %v3210_v43 = vld [vmem:[%s4285_s1 + $0x390] ss:$40 sps:$4 sm:$0xff]  }
  0x6b   :  { %1172 = vmatpush1.bf16.msra.mxu0 %v3141_v44  ;;  %v3215_v44 = vld [vmem:[%s4285_s1 + $0x3e4] ss:$40 sps:$4 sm:$0xff]  }
  0x6c   :  { %1173 = vmatprep.subr.bf16.mxu0 %v3149_v45  ;;  %v3213_v45 = vld [vmem:[%s4285_s1 + $0x3e0] ss:$40 sps:$4 sm:$0xff]  }
  0x6d   :  { %1215 = vmatpush1.bf16.msra.mxu1 %v3144_v46  ;;  %v3218_v46 = vld [vmem:[%s4285_s1 + $0x434] ss:$40 sps:$4 sm:$0xff]  }
  0x6e   :  { %1216 = vmatprep.subr.bf16.mxu1 %v3152_v48  ;;  %v3216_v48 = vld [vmem:[%s4285_s1 + $0x430] ss:$40 sps:$4 sm:$0xff]  }
  0x6f   :  { %1174 = vmatpush1.bf16.msra.mxu0 %v3147_v49  ;;  %v3221_v49 = vld [vmem:[%s4285_s1 + $0x484] ss:$40 sps:$4 sm:$0xff]  }
  0x70   :  { %1175 = vmatprep.subr.bf16.mxu0 %v3155_v51  ;;  %v3224_v51 = vld [vmem:[%s4285_s1 + $0x4d4] ss:$40 sps:$4 sm:$0xff]  }
  0x71   :  { %1217 = vmatpush1.bf16.msra.mxu1 %v3150_v50  ;;  %v3219_v50 = vld [vmem:[%s4285_s1 + $0x480] ss:$40 sps:$4 sm:$0xff]  }
  0x72   :  { %1218 = vmatprep.subr.bf16.mxu1 %v3158_v53  ;;  %v3257_v53 = vld [vmem:[%s4287_s3 + $0x140] sm:$0xff]  }
  0x73   :  { %1176 = vmatpush1.bf16.msra.mxu0 %v3153_v52  ;;  %v3222_v52 = vld [vmem:[%s4285_s1 + $0x4d0] ss:$40 sps:$4 sm:$0xff]  }
  0x74   :  { %1177 = vmatprep.subr.bf16.mxu0 %v3161_v55  ;;  %v3261_v55 = vld [vmem:[%s4287_s3 + $0x148] sm:$0xff]  }
  0x75   :  { %1219 = vmatpush1.bf16.msra.mxu1 %v3156_v54  ;;  %v3258_v54 = vld [vmem:[%s4287_s3 + $0x100] sm:$0xff]  }
  0x76   :  { %1220 = vmatprep.subr.bf16.mxu1 %v3164_v57  ;;  %v3265_v57 = vld [vmem:[%s4287_s3 + $0x150] sm:$0xff]  }
  0x77   :  { %1178 = vmatpush1.bf16.msra.mxu0 %v3159_v56  ;;  %v3262_v56 = vld [vmem:[%s4287_s3 + $0x108] sm:$0xff]  }
  0x78   :  { %1179 = vmatprep.subr.bf16.mxu0 %v3167_v59  ;;  %v3270_v59 = vld [vmem:[%s4287_s3 + $0x118] sm:$0xff]  }
  0x79   :  { %1221 = vmatpush1.bf16.msra.mxu1 %v3162_v58  ;;  %v3266_v58 = vld [vmem:[%s4287_s3 + $0x110] sm:$0xff]  }
  0x7a   :  { %1222 = vmatprep.subr.bf16.mxu1 %v3170_v61  ;;  %v3274_v61 = vld [vmem:[%s4287_s3 + $0x120] sm:$0xff]  }
  0x7b   :  { %1180 = vmatpush1.bf16.msra.mxu0 %v3165_v60  ;;  %v3273_v60 = vld [vmem:[%s4287_s3 + $0x160] sm:$0xff]  }
  0x7c   :  { %1181 = vmatprep.subr.bf16.mxu0 %v3173_v63  ;;  %v3278_v63 = vld [vmem:[%s4287_s3 + $0x128] sm:$0xff]  }
  0x7d   :  { %1223 = vmatpush1.bf16.msra.mxu1 %v3168_v62  ;;  %v3277_v62 = vld [vmem:[%s4287_s3 + $0x168] sm:$0xff]  }
  0x7e   :  { %1224 = vmatprep.subr.bf16.mxu1 %v3176_v0  ;;  %v3281_v0 = vld [vmem:[%s4287_s3 + $0x170] sm:$0xff]  }
  0x7f   :  { %1182 = vmatpush1.bf16.msra.mxu0 %v3171_v1  ;;  %v3282_v1 = vld [vmem:[%s4287_s3 + $0x130] sm:$0xff]  }
  0x80   :  { %1237 = vmatprep.subr.bf16.mxu0 %v3179_v3  ;;  %v3285_v3 = vld [vmem:[%s4287_s3 + $0x178] sm:$0xff]  }
  0x81   :  { %1225 = vmatpush1.bf16.msra.mxu1 %v3174_v4  ;;  %v3286_v4 = vld [vmem:[%s4287_s3 + $0x138] sm:$0xff]  }
  0x82   :  { %1184 = vmatmul.mubr.bf16.vlgmr.msra.gmra.mrb[4].mxu0 %v3596_v2  ;;  %2783 = vmatprep.subr.bf16.mxu1 %v3225_v5  ;;  %v3289_v5 = vld [vmem:[%s4287_s3 + $0x240] sm:$0xff]  }
  0x83   :  { %1238 = vmatpush1.bf16.msra.mxu0 %v3177_v6  ;;  %1269 = vmatprep.mubr.bf16.mxu0 %v3535_v47  ;;  %v3188_v47 = vld [vmem:[%s4285_s1 + $0x114] ss:$40 sps:$4 sm:$0xff]   ;;  %v205_v6 = vlaneseq }
  0x84   :  { %1227 = vmatmul.mubr.bf16.vlgmr.msra.gmra.mrb[4].mxu1 %v3596_v2  ;;  %1239 = vmatprep.subr.bf16.mxu0 %v3182_v7 }
  0x85   :  { %2784 = vmatpush3.bf16.msra.mxu1 %v3226_v8  ;;  %v3993_v7 = vshrl.u32 %v205_v6, 7 }
  0x86   :  { %2785 = vmatprep.subr.bf16.mxu1 %v3227_v9  ;;  %v3999_v9 = vld [vmem:[%s4288_s2] sm:$0xff] }
  0x87   :  { %1240 = vmatpush1.bf16.msra.mxu0 %v3180_v10  ;;  %v207_v8 = vsub.s32 0, %v3993_v7  ;;  %v211_v10 = vsub.s32 1, %v3993_v7  ;;  %v223_v6 = vsub.s32 4, %v3993_v7 }
  0x88   :  { %1241 = vmatprep.subr.bf16.mxu0 %v3185_v11  ;;  %v215_v11 = vsub.s32 2, %v3993_v7 }
  0x89   :  { %2786 = vmatpush3.bf16.msra.mxu1 %v3228_v12  ;;  %v219_v12 = vsub.s32 3, %v3993_v7 }
  0x8a   :  { %2787 = vmatprep.subr.bf16.mxu1 %v3229_v13  ;;  %v208_v13 = vrot.slane %v3999_v9, %v207_v8 }
  0x8b   :  { %1242 = vmatpush1.bf16.msra.mxu0 %v3183_v14  ;;  %v212_v14 = vrot.slane %v3999_v9, %v211_v10 }
  0x8c   :  { %1243 = vmatprep.subr.bf16.mxu0 %v3188_v47  ;;  %v216_v47 = vrot.slane %v3999_v9, %v215_v11  ;;  %v3279_v11 = vld [vmem:[%s4287_s3 + $0x1e8] sm:$0xff]  }
  0x8d   :  { %2788 = vmatpush3.bf16.msra.mxu1 %v3230_v15 }
  0x8e   :  { %2789 = vmatprep.subr.bf16.mxu1 %v3231_v16  ;;  %v220_v16 = vrot.slane %v3999_v9, %v219_v12  ;;  %v227_v12 = vsub.s32 5, %v3993_v7 }
  0x8f   :  { %1244 = vmatpush1.bf16.msra.mxu0 %v3186_v17 }
  0x90   :  { %1245 = vmatprep.subr.bf16.mxu0 %v3191_v18 }
  0x91   :  { %2790 = vmatpush3.bf16.msra.mxu1 %v3232_v19 }
  0x92   :  { %2791 = vmatprep.subr.bf16.mxu1 %v3233_v20 }
  0x93   :  { %1246 = vmatpush1.bf16.msra.mxu0 %v3189_v21 }
  0x94   :  { %1247 = vmatprep.subr.bf16.mxu0 %v3194_v22 }
  0x95   :  { %2792 = vmatpush3.bf16.msra.mxu1 %v3234_v23 }
  0x96   :  { %2793 = vmatprep.subr.bf16.mxu1 %v3235_v24 }
  0x97   :  { %1248 = vmatpush1.bf16.msra.mxu0 %v3192_v25 }
  0x98   :  { %1249 = vmatprep.subr.bf16.mxu0 %v3197_v26 }
  0x99   :  { %2794 = vmatpush3.bf16.msra.mxu1 %v3236_v28 }
  0x9a   :  { %2795 = vmatprep.subr.bf16.mxu1 %v3237_v30 }
  0x9b   :  { %1250 = vmatpush1.bf16.msra.mxu0 %v3195_v27 }
  0x9c   :  { %1251 = vmatprep.subr.bf16.mxu0 %v3200_v29 }
  0x9d   :  { %2796 = vmatpush3.bf16.msra.mxu1 %v3238_v32 }
  0x9e   :  { %2797 = vmatprep.subr.bf16.mxu1 %v3239_v34 }
  0x9f   :  { %1252 = vmatpush1.bf16.msra.mxu0 %v3198_v31 }
  0xa0   :  { %1253 = vmatprep.subr.bf16.mxu0 %v3203_v33 }
  0xa1   :  { %2798 = vmatpush3.bf16.msra.mxu1 %v3240_v36 }
  0xa2   :  { %2805 = vmatprep.subr.bf16.mxu1 %v3241_v38 }
  0xa3   :  { %1254 = vmatpush1.bf16.msra.mxu0 %v3201_v35 }
  0xa4   :  { %1255 = vmatprep.subr.bf16.mxu0 %v3206_v37 }
  0xa7   :  { %1256 = vmatpush1.bf16.msra.mxu0 %v3204_v39 }
  0xa8   :  { %1257 = vmatprep.subr.bf16.mxu0 %v3209_v40 }
  0xab   :  { %1258 = vmatpush1.bf16.msra.mxu0 %v3207_v41  ;;  %v3242_v41 = vld [vmem:[%s4287_s3 + $0x80] sm:$0xff]  }
  0xac   :  { %1259 = vmatprep.subr.bf16.mxu0 %v3212_v42 }
  0xaf   :  { %1260 = vmatpush1.bf16.msra.mxu0 %v3210_v43  ;;  %v3243_v43 = vld [vmem:[%s4287_s3 + $0xc8] sm:$0xff]  }
  0xb0   :  { %1261 = vmatprep.subr.bf16.mxu0 %v3215_v44 }
  0xb3   :  { %1262 = vmatpush1.bf16.msra.mxu0 %v3213_v45 }
  0xb4   :  { %1263 = vmatprep.subr.bf16.mxu0 %v3218_v46  ;;  %v3244_v46 = vld [vmem:[%s4287_s3 + $0x88] sm:$0xff]  }
  0xb7   :  { %1264 = vmatpush1.bf16.msra.mxu0 %v3216_v48  ;;  %v3245_v48 = vld [vmem:[%s4287_s3 + $0xd0] sm:$0xff]  }
  0xb8   :  { %1265 = vmatprep.subr.bf16.mxu0 %v3221_v49  ;;  %v3246_v49 = vld [vmem:[%s4287_s3 + $0x90] sm:$0xff]  }
  0xbb   :  { %1266 = vmatpush1.bf16.msra.mxu0 %v3219_v50  ;;  %v3247_v50 = vld [vmem:[%s4287_s3 + $0xd8] sm:$0xff]  }
  0xbc   :  { %1267 = vmatprep.subr.bf16.mxu0 %v3224_v51  ;;  %v3248_v51 = vld [vmem:[%s4287_s3 + $0x98] sm:$0xff]  }
  0xbf   :  { %1268 = vmatpush1.bf16.msra.mxu0 %v3222_v52  ;;  %v3249_v52 = vld [vmem:[%s4287_s3 + $0xe0] sm:$0xff]  }
  0xc0   :  { %2827 = vmatprep.subr.bf16.mxu0 %v3257_v53  ;;  %v3250_v53 = vld [vmem:[%s4287_s3 + $0xa0] sm:$0xff]  }
  0xc2   :  { %1270 = vmatmul.mubr.bf16.vlgmr.msra.gmra.mrb[8].mxu0 %v3596_v2  ;;  %v3269_v2 = vld [vmem:[%s4287_s3 + $0x158] sm:$0xff]  }
  0xc3   :  { %2828 = vmatpush3.bf16.msra.mxu0 %v3258_v54  ;;  %v3251_v54 = vld [vmem:[%s4287_s3 + $0xe8] sm:$0xff]  }
  0xc4   :  { %2829 = vmatprep.subr.bf16.mxu0 %v3261_v55  ;;  %v3252_v55 = vld [vmem:[%s4287_s3 + $0xa8] sm:$0xff]  }
  0xc7   :  { %2830 = vmatpush3.bf16.msra.mxu0 %v3262_v56  ;;  %v3253_v56 = vld [vmem:[%s4287_s3 + $0xf0] sm:$0xff]  }
  0xc8   :  { %2831 = vmatprep.subr.bf16.mxu0 %v3265_v57  ;;  %v3254_v57 = vld [vmem:[%s4287_s3 + $0xb0] sm:$0xff]  }
  0xcb   :  { %2832 = vmatpush3.bf16.msra.mxu0 %v3266_v58  ;;  %v3255_v58 = vld [vmem:[%s4287_s3 + $0xf8] sm:$0xff]  }
  0xcc   :  { %2833 = vmatprep.subr.bf16.mxu0 %v3269_v2  ;;  %v3256_v2 = vld [vmem:[%s4287_s3 + $0xb8] sm:$0xff]  }
  0xcf   :  { %2834 = vmatpush3.bf16.msra.mxu0 %v3270_v59  ;;  %v3259_v59 = vld [vmem:[%s4287_s3 + $0x1c0] sm:$0xff]  }
  0xd0   :  { %2835 = vmatprep.subr.bf16.mxu0 %v3273_v60  ;;  %v3260_v60 = vld [vmem:[%s4287_s3 + $0x180] sm:$0xff]  }
  0xd3   :  { %2836 = vmatpush3.bf16.msra.mxu0 %v3274_v61  ;;  %v3263_v61 = vld [vmem:[%s4287_s3 + $0x1c8] sm:$0xff]  }
  0xd4   :  { %2837 = vmatprep.subr.bf16.mxu0 %v3277_v62  ;;  %v3264_v62 = vld [vmem:[%s4287_s3 + $0x188] sm:$0xff]  }
  0xd7   :  { %2838 = vmatpush3.bf16.msra.mxu0 %v3278_v63  ;;  %v3267_v63 = vld [vmem:[%s4287_s3 + $0x1d0] sm:$0xff]  }
  0xd8   :  { %2839 = vmatprep.subr.bf16.mxu0 %v3281_v0  ;;  %v3268_v0 = vld [vmem:[%s4287_s3 + $0x190] sm:$0xff]  }
  0xdb   :  { %2840 = vmatpush3.bf16.msra.mxu0 %v3282_v1  ;;  %v3271_v1 = vld [vmem:[%s4287_s3 + $0x1d8] sm:$0xff]  }
  0xdc   :  { %2841 = vmatprep.subr.bf16.mxu0 %v3285_v3  ;;  %v3272_v3 = vld [vmem:[%s4287_s3 + $0x198] sm:$0xff]  }
  0xdf   :  { %2842 = vmatpush3.bf16.msra.mxu0 %v3286_v4  ;;  %v3275_v4 = vld [vmem:[%s4287_s3 + $0x1e0] sm:$0xff]  }
  0xe0   :  { %2871 = vmatprep.subr.bf16.mxu0 %v3289_v5  ;;  %v3276_v5 = vld [vmem:[%s4287_s3 + $0x1a0] sm:$0xff]  }
 0x115   :  { %v1099_v15 = vpop.f32.mrb[0].mxu0 }
 0x116   :  { %v1100_v17 = vadd.f32 %v1099_v15, %v208_v13  ;;  %v1101_v18 = vpop.f32.mrb[1].mxu0  ;;  %v224_v15 = vrot.slane %v3999_v9, %v223_v6 }
 0x117   :  { %v1102_v19 = vadd.f32 %v1101_v18, %v212_v14  ;;  %v1103_v20 = vpop.f32.mrb[2].mxu0  ;;  %v1142_v21 = vpop.f32.mrb[0].mxu1 }
 0x118   :  { %v1280_v22 = vmax.f32 %v1100_v17, 0.0  ;;  %v1104_v23 = vadd.f32 %v1103_v20, %v208_v13  ;;  %v1105_v24 = vpop.f32.mrb[3].mxu0  ;;  %v1143_v25 = vadd.f32 %v1142_v21, %v216_v47  ;;  %v1144_v26 = vpop.f32.mrb[1].mxu1  ;;  %v231_v13 = vsub.s32 6, %v3993_v7  ;;  %v3284_v21 = vld [vmem:[%s4287_s3 + $0x1b0] sm:$0xff]  }
 0x119   :  { %v1106_v27 = vadd.f32 %v1105_v24, %v212_v14  ;;  %v1145_v28 = vadd.f32 %v1144_v26, %v220_v16  ;;  %v1146_v29 = vpop.f32.mrb[2].mxu1  ;;  %v1281_v34 = vmax.f32 %v1102_v19, 0.0  ;;  %v3280_v14 = vld [vmem:[%s4287_s3 + $0x1a8] sm:$0xff]   ;;  %v228_v17 = vrot.slane %v3999_v9, %v227_v12  ;;  %v3287_v24 = vld [vmem:[%s4287_s3 + $0x1f8] sm:$0xff]  }
 0x11a   :  { %v1290_v30 = vmax.f32 %v1104_v23, 0.0  ;;  %v1282_v31 = vmax.f32 %v1143_v25, 0.0  ;;  %v1147_v32 = vadd.f32 %v1146_v29, %v216_v47  ;;  %v1148_v33 = vpop.f32.mrb[3].mxu1  ;;  %v235_v47 = vsub.s32 7, %v3993_v7  ;;  %v3305_v7 = vld [vmem:[%s4289_s5] sm:$0xff]  }
 0x11b   :  { %v1291_v35 = vmax.f32 %v1106_v27, 0.0  ;;  %v1283_v36 = vmax.f32 %v1145_v28, 0.0  ;;  %v1149_v37 = vadd.f32 %v1148_v33, %v220_v16  ;;  %v3283_v16 = vld [vmem:[%s4287_s3 + $0x1f0] sm:$0xff]   ;;  %v232_v18 = vrot.slane %v3999_v9, %v231_v13 }
 0x11c   :  { %v1300_v38 = vpack.c.bf16 %v1290_v30, %v1280_v22  ;;  %v1292_v39 = vmax.f32 %v1147_v32, 0.0  ;;  %v236_v20 = vrot.slane %v3999_v9, %v235_v47 }
 0x11d   :  { %v1301_v40 = vpack.c.bf16 %v1291_v35, %v1281_v34  ;;  %v1293_v42 = vmax.f32 %v1149_v37, 0.0  ;;  %v3288_v35 = vld [vmem:[%s4287_s3 + $0x1b8] sm:$0xff]  }
 0x11e   :  { %v1302_v44 = vpack.c.bf16 %v1292_v39, %v1282_v31 }
 0x11f   :  { %1989 = vmatprep.mubr.bf16.mxu1 %v1301_v40  ;;  %v1303_v45 = vpack.c.bf16 %v1293_v42, %v1283_v36 }
 0x120   :  { %1990 = vmatmul.mubr.bf16.vlgmr.msra.gmra.mrb[8].mxu1 %v1300_v38 }
 0x121   :  { %2806 = vmatpush3.bf16.msra.mxu1 %v3242_v41  ;;  %2030 = vmatprep.mubr.bf16.mxu1 %v1303_v45 }
 0x122   :  { %2807 = vmatprep.subr.bf16.mxu1 %v3243_v43 }
 0x125   :  { %2808 = vmatpush3.bf16.msra.mxu1 %v3244_v46 }
 0x126   :  { %2809 = vmatprep.subr.bf16.mxu1 %v3245_v48 }
 0x129   :  { %2810 = vmatpush3.bf16.msra.mxu1 %v3246_v49  ;;  %v3290_v49 = vld [vmem:[%s4287_s3 + $0x200] sm:$0xff]  }
 0x12a   :  { %2811 = vmatprep.subr.bf16.mxu1 %v3247_v50 }
 0x12d   :  { %2812 = vmatpush3.bf16.msra.mxu1 %v3248_v51  ;;  %v3291_v51 = vld [vmem:[%s4287_s3 + $0x248] sm:$0xff]  }
 0x12e   :  { %2813 = vmatprep.subr.bf16.mxu1 %v3249_v52 }
 0x131   :  { %2814 = vmatpush3.bf16.msra.mxu1 %v3250_v53  ;;  %v3292_v53 = vld [vmem:[%s4287_s3 + $0x208] sm:$0xff]  }
 0x132   :  { %2815 = vmatprep.subr.bf16.mxu1 %v3251_v54  ;;  %v3293_v54 = vld [vmem:[%s4287_s3 + $0x250] sm:$0xff]  }
 0x135   :  { %2816 = vmatpush3.bf16.msra.mxu1 %v3252_v55  ;;  %v3294_v55 = vld [vmem:[%s4287_s3 + $0x210] sm:$0xff]  }
 0x136   :  { %2817 = vmatprep.subr.bf16.mxu1 %v3253_v56  ;;  %v3295_v56 = vld [vmem:[%s4287_s3 + $0x258] sm:$0xff]  }
 0x139   :  { %2818 = vmatpush3.bf16.msra.mxu1 %v3254_v57  ;;  %v3296_v57 = vld [vmem:[%s4287_s3 + $0x218] sm:$0xff]  }
 0x13a   :  { %2819 = vmatprep.subr.bf16.mxu1 %v3255_v58  ;;  %v3297_v58 = vld [vmem:[%s4287_s3 + $0x260] sm:$0xff]  }
 0x13d   :  { %2820 = vmatpush3.bf16.msra.mxu1 %v3256_v2  ;;  %v3298_v2 = vld [vmem:[%s4287_s3 + $0x220] sm:$0xff]  }
 0x13e   :  { %2849 = vmatprep.subr.bf16.mxu1 %v3259_v59  ;;  %v3299_v59 = vld [vmem:[%s4287_s3 + $0x268] sm:$0xff]  }
 0x140   :  { %2031 = vmatmul.mubr.bf16.vlgmr.msra.gmra.mrb[12].mxu1 %v1302_v44 }
 0x141   :  { %2850 = vmatpush3.bf16.msra.mxu1 %v3260_v60  ;;  %v3300_v60 = vld [vmem:[%s4287_s3 + $0x228] sm:$0xff]  }
 0x142   :  { %2851 = vmatprep.subr.bf16.mxu1 %v3263_v61  ;;  %v3301_v61 = vld [vmem:[%s4287_s3 + $0x270] sm:$0xff]  }
 0x145   :  { %2852 = vmatpush3.bf16.msra.mxu1 %v3264_v62  ;;  %v3302_v62 = vld [vmem:[%s4287_s3 + $0x230] sm:$0xff]  }
 0x146   :  { %2853 = vmatprep.subr.bf16.mxu1 %v3267_v63  ;;  %v3303_v63 = vld [vmem:[%s4287_s3 + $0x278] sm:$0xff]  }
 0x149   :  { %2854 = vmatpush3.bf16.msra.mxu1 %v3268_v0  ;;  %v3304_v0 = vld [vmem:[%s4287_s3 + $0x238] sm:$0xff]  }
 0x14a   :  { %2855 = vmatprep.subr.bf16.mxu1 %v3271_v1  ;;  %v202_v1 = vld [vmem:[%s4288_s2 + $0x8] sm:$0x3] }
 0x14d   :  { %2856 = vmatpush3.bf16.msra.mxu1 %v3272_v3  ;;  %v240_v3 = vrot.slane %v202_v1, %v207_v8  ;;  %v3329_v8 = vmov 0.0  }
 0x14e   :  { %2857 = vmatprep.subr.bf16.mxu1 %v3275_v4  ;;  %v244_v4 = vrot.slane %v202_v1, %v211_v10  ;;  %v3306_v10 = vld [vmem:[%s4289_s5 + $0x8] sm:$0xff]  }
 0x151   :  { %2858 = vmatpush3.bf16.msra.mxu1 %v3276_v5 }
 0x152   :  { %2859 = vmatprep.subr.bf16.mxu1 %v3279_v11 }
 0x155   :  { %v1185_v19 = vpop.f32.mrb[4].mxu0  ;;  %2860 = vmatpush3.bf16.msra.mxu1 %v3280_v14 }
 0x156   :  { %v1186_v22 = vadd.f32 %v1185_v19, %v224_v15  ;;  %v1187_v23 = vpop.f32.mrb[5].mxu0  ;;  %2861 = vmatprep.subr.bf16.mxu1 %v3283_v16 }
 0x157   :  { %v1188_v25 = vadd.f32 %v1187_v23, %v228_v17  ;;  %v1189_v26 = vpop.f32.mrb[6].mxu0  ;;  %v1228_v27 = vpop.f32.mrb[4].mxu1  ;;  %v3308_v23 = vld [vmem:[%s4289_s5 + $0x18] sm:$0xff]  }
 0x158   :  { %v1284_v28 = vmax.f32 %v1186_v22, 0.0  ;;  %v1190_v29 = vadd.f32 %v1189_v26, %v224_v15  ;;  %v1229_v30 = vadd.f32 %v1228_v27, %v232_v18  ;;  %v1191_v31 = vpop.f32.mrb[7].mxu0  ;;  %v1230_v32 = vpop.f32.mrb[5].mxu1  ;;  %v3307_v22 = vld [vmem:[%s4289_s5 + $0x10] sm:$0xff]   ;;  %v3310_v26 = vld [vmem:[%s4289_s5 + $0x28] sm:$0xff]  }
 0x159   :  { %v1192_v9 = vadd.f32 %v1191_v31, %v228_v17  ;;  %v1231_v33 = vadd.f32 %v1230_v32, %v236_v20  ;;  %v1232_v34 = vpop.f32.mrb[6].mxu1  ;;  %2862 = vmatpush3.bf16.msra.mxu1 %v3284_v21  ;;  %v1285_v40 = vmax.f32 %v1188_v25, 0.0  ;;  %v3311_v32 = vld [vmem:[%s4289_s5 + $0x30] sm:$0xff]  }
 0x15a   :  { %v1294_v36 = vmax.f32 %v1190_v29, 0.0  ;;  %v1286_v37 = vmax.f32 %v1229_v30, 0.0  ;;  %v1233_v38 = vadd.f32 %v1232_v34, %v232_v18  ;;  %v1234_v39 = vpop.f32.mrb[7].mxu1  ;;  %2863 = vmatprep.subr.bf16.mxu1 %v3287_v24  ;;  %v3309_v24 = vld [vmem:[%s4289_s5 + $0x20] sm:$0xff]   ;;  %v3314_v34 = vld [vmem:[%s4290_s7 + $0x8] sm:$0xff]  }
 0x15b   :  { %v1295_v41 = vmax.f32 %v1192_v9, 0.0  ;;  %v1287_v42 = vmax.f32 %v1231_v33, 0.0  ;;  %v1235_v43 = vadd.f32 %v1234_v39, %v236_v20  ;;  %v3312_v9 = vld [vmem:[%s4289_s5 + $0x38] sm:$0xff]   ;;  %v3313_v33 = vld [vmem:[%s4290_s7] sm:$0xff]   ;;  %v3318_v39 = vld [vmem:[%s4290_s7 + $0x28] sm:$0xff]  }
 0x15c   :  { %v1304_v44 = vpack.c.bf16 %v1294_v36, %v1284_v28  ;;  %v1296_v45 = vmax.f32 %v1233_v38, 0.0  ;;  %v3316_v36 = vld [vmem:[%s4290_s7 + $0x18] sm:$0xff]   ;;  %v2675_v38 = vld [vmem:[%s4291_s4] ss:$0 sm:$0xff] }
 0x15d   :  { %v1305_v46 = vpack.c.bf16 %v1295_v41, %v1285_v40  ;;  %v1297_v48 = vmax.f32 %v1235_v43, 0.0  ;;  %2864 = vmatpush3.bf16.msra.mxu1 %v3288_v35  ;;  %v3315_v35 = vld [vmem:[%s4290_s7 + $0x10] sm:$0xff]  }
 0x15e   :  { %v1306_v50 = vpack.c.bf16 %v1296_v45, %v1286_v37  ;;  %2920 = vmatprep.subr.bf16.mxu1 %v3329_v8  ;;  %v3317_v37 = vld [vmem:[%s4290_s7 + $0x20] sm:$0xff]  }
 0x15f   :  { %v1307_v52 = vpack.c.bf16 %v1297_v48, %v1287_v42  ;;  %2071 = vmatprep.mubr.bf16.mxu0 %v1305_v46 }
 0x160   :  { %2072 = vmatmul.mubr.bf16.vlgmr.msra.gmra.mrb[12].mxu0 %v1304_v44 }
 0x161   :  { %2112 = vmatprep.mubr.bf16.mxu1 %v1307_v52  ;;  %2872 = vmatpush3.bf16.msra.mxu0 %v3290_v49 }
 0x162   :  { %2113 = vmatmul.mubr.bf16.vlgmr.msra.gmra.mrb[16].mxu1 %v1306_v50  ;;  %2873 = vmatprep.subr.bf16.mxu0 %v3291_v51 }
 0x163   :  { %2921 = vmatpush3.bf16.msra.mxu1 %v3305_v7  ;;  %2936 = vmatprep.mubr.msk.bf16.mxu1 %vm3330_vm0, %v3329_v8  ;;  %v3324_v7 = vld [vmem:[%s4292_s9 + $0x18] sm:$0xff]  }
 0x164   :  { %2922 = vmatprep.subr.bf16.mxu1 %v3329_v8 }
 0x165   :  { %2874 = vmatpush3.bf16.msra.mxu0 %v3292_v53 }
 0x166   :  { %2875 = vmatprep.subr.bf16.mxu0 %v3293_v54 }
 0x167   :  { %2923 = vmatpush3.bf16.msra.mxu1 %v3306_v10  ;;  %v3325_v10 = vld [vmem:[%s4292_s9 + $0x20] sm:$0xff]  }
 0x168   :  { %2924 = vmatprep.subr.bf16.mxu1 %v3329_v8 }
 0x169   :  { %2876 = vmatpush3.bf16.msra.mxu0 %v3294_v55 }
 0x16a   :  { %2877 = vmatprep.subr.bf16.mxu0 %v3295_v56 }
 0x16b   :  { %2925 = vmatpush3.bf16.msra.mxu1 %v3307_v22  ;;  %v3326_v22 = vld [vmem:[%s4292_s9 + $0x28] sm:$0xff]  }
 0x16c   :  { %2926 = vmatprep.subr.bf16.mxu1 %v3329_v8 }
 0x16d   :  { %2878 = vmatpush3.bf16.msra.mxu0 %v3296_v57 }
 0x16e   :  { %2879 = vmatprep.subr.bf16.mxu0 %v3297_v58 }
 0x16f   :  { %2927 = vmatpush3.bf16.msra.mxu1 %v3308_v23  ;;  %v2756_v23 = vld [vmem:[%s4293_s6] ss:$0 sm:$0xff] }
 0x170   :  { %2928 = vmatprep.subr.bf16.mxu1 %v3329_v8 }
 0x171   :  { %2880 = vmatpush3.bf16.msra.mxu0 %v3298_v2 }
 0x172   :  { %2881 = vmatprep.subr.bf16.mxu0 %v3299_v59 }
 0x173   :  { %2929 = vmatpush3.bf16.msra.mxu1 %v3309_v24 }
 0x174   :  { %2930 = vmatprep.subr.bf16.mxu1 %v3329_v8 }
 0x175   :  { %2882 = vmatpush3.bf16.msra.mxu0 %v3300_v60 }
 0x176   :  { %2883 = vmatprep.subr.bf16.mxu0 %v3301_v61 }
 0x177   :  { %2931 = vmatpush3.bf16.msra.mxu1 %v3310_v26 }
 0x178   :  { %2932 = vmatprep.subr.bf16.mxu1 %v3329_v8 }
 0x179   :  { %2884 = vmatpush3.bf16.msra.mxu0 %v3302_v62 }
 0x17a   :  { %2885 = vmatprep.subr.bf16.mxu0 %v3303_v63 }
 0x17b   :  { %2933 = vmatpush3.bf16.msra.mxu1 %v3311_v32 }
 0x17c   :  { %2934 = vmatprep.subr.bf16.mxu1 %v3329_v8 }
 0x17d   :  { %2886 = vmatpush3.bf16.msra.mxu0 %v3304_v0 }
 0x17e   :  { %2940 = vmatprep.subr.bf16.mxu0 %v3329_v8 }
 0x17f   :  { %2935 = vmatpush3.bf16.msra.mxu1 %v3312_v9  ;;  %v3327_v9 = vld [vmem:[%s4292_s9 + $0x30] sm:$0xff]  }
 0x180   :  { %2960 = vmatprep.subr.bf16.mxu1 %v3329_v8 }
 0x195   :  { %v1271_v5 = vpop.f32.mrb[8].mxu0 }
 0x196   :  { %v1272_v6 = vadd.f32 %v1271_v5, %v240_v3  ;;  %v1273_v11 = vpop.f32.mrb[9].mxu0 }
 0x197   :  { %v1274_v12 = vadd.f32 %v1273_v11, %v244_v4  ;;  %v1275_v13 = vpop.f32.mrb[10].mxu0 }
 0x198   :  { %v1276_v14 = vadd.f32 %v1275_v13, %v240_v3  ;;  %v1277_v47 = vpop.f32.mrb[11].mxu0  ;;  %v1288_v16 = vmax.f32 %v1272_v6, 0.0 }
 0x199   :  { %v1278_v15 = vadd.f32 %v1277_v47, %v244_v4  ;;  %v1289_v18 = vmax.f32 %v1274_v12, 0.0 }
 0x19a   :  { %v1298_v17 = vmax.f32 %v1276_v14, 0.0 }
 0x19b   :  { %v1299_v19 = vmax.f32 %v1278_v15, 0.0 }
 0x19c   :  { %v1308_v20 = vpack.c.bf16 %v1298_v17, %v1288_v16  ;;  %v3319_v17 = vld [vmem:[%s4290_s7 + $0x30] sm:$0xff]  }
 0x19d   :  { %v1309_v21 = vpack.c.bf16 %v1299_v19, %v1289_v18  ;;  %v3320_v18 = vld [vmem:[%s4290_s7 + $0x38] sm:$0xff]   ;;  %v3321_v19 = vld [vmem:[%s4292_s9] sm:$0xff]  }
 0x19f   :  { %2153 = vmatprep.mubr.bf16.mxu0 %v1309_v21  ;;  %v3323_v21 = vld [vmem:[%s4292_s9 + $0x10] sm:$0xff]  }
 0x1a0   :  { %2154 = vmatmul.mubr.bf16.vlgmr.msra.gmra.mrb[16].mxu0 %v1308_v20  ;;  %v3322_v20 = vld [vmem:[%s4292_s9 + $0x8] sm:$0xff]  }
 0x1a1   :  { %2956 = vmatprep.mubr.msk.bf16.mxu0 %vm3330_vm0, %v3329_v8  ;;  %2941 = vmatpush3.bf16.msra.mxu0 %v3313_v33  ;;  %v3328_v33 = vld [vmem:[%s4292_s9 + $0x38] sm:$0xff]  }
 0x1a2   :  { %2942 = vmatprep.subr.bf16.mxu0 %v3329_v8 }
 0x1a5   :  { %2943 = vmatpush3.bf16.msra.mxu0 %v3314_v34  ;;  %v2765_v34 = vld [vmem:[%s4294_s8] ss:$0 sm:$0xff] }
 0x1a6   :  { %2944 = vmatprep.subr.bf16.mxu0 %v3329_v8 }
 0x1a9   :  { %2945 = vmatpush3.bf16.msra.mxu0 %v3315_v35 }
 0x1aa   :  { %2946 = vmatprep.subr.bf16.mxu0 %v3329_v8 }
 0x1ad   :  { %2947 = vmatpush3.bf16.msra.mxu0 %v3316_v36 }
 0x1ae   :  { %2948 = vmatprep.subr.bf16.mxu0 %v3329_v8 }
 0x1b1   :  { %2949 = vmatpush3.bf16.msra.mxu0 %v3317_v37 }
 0x1b2   :  { %2950 = vmatprep.subr.bf16.mxu0 %v3329_v8 }
 0x1b5   :  { %2951 = vmatpush3.bf16.msra.mxu0 %v3318_v39 }
 0x1b6   :  { %2952 = vmatprep.subr.bf16.mxu0 %v3329_v8 }
 0x1b9   :  { %2953 = vmatpush3.bf16.msra.mxu0 %v3319_v17 }
 0x1ba   :  { %2954 = vmatprep.subr.bf16.mxu0 %v3329_v8 }
 0x1bd   :  { %2955 = vmatpush3.bf16.msra.mxu0 %v3320_v18 }
 0x1f3   :  { %v2799_v25 = vpop.f32.mrb[8].mxu1 }
 0x1f4   :  { %v2800_v27 = vpop.f32.mrb[9].mxu1 }
 0x1f5   :  { %v2801_v28 = vadd.f32 %v2800_v27, %v2799_v25  ;;  %v2802_v29 = vpop.f32.mrb[10].mxu1 }
 0x1f6   :  { %v2803_v30 = vpop.f32.mrb[11].mxu1 }
 0x1f7   :  { %v2804_v31 = vadd.f32 %v2803_v30, %v2802_v29  ;;  %v1992_v42 = vadd.f32 %v2801_v28, %v2675_v38 }
 0x1f9   :  { %v1995_v46 = vadd.f32 %v2804_v31, %v2675_v38 }
 0x213   :  { %v2821_v40 = vpop.f32.mrb[12].mxu1 }
 0x214   :  { %v2822_v41 = vpop.f32.mrb[13].mxu1 }
 0x215   :  { %v2823_v43 = vadd.f32 %v2822_v41, %v2821_v40  ;;  %v2824_v44 = vpop.f32.mrb[14].mxu1 }
 0x216   :  { %v2825_v45 = vpop.f32.mrb[15].mxu1 }
 0x217   :  { %v2033_v48 = vadd.f32 %v2823_v43, %v1992_v42  ;;  %v2826_v49 = vadd.f32 %v2825_v45, %v2824_v44 }
 0x219   :  { %v2036_v50 = vadd.f32 %v2826_v49, %v1995_v46 }
 0x233   :  { %v2843_v51 = vpop.f32.mrb[12].mxu0 }
 0x234   :  { %v2844_v52 = vpop.f32.mrb[13].mxu0 }
 0x235   :  { %v2845_v53 = vadd.f32 %v2844_v52, %v2843_v51  ;;  %v2846_v54 = vpop.f32.mrb[14].mxu0  ;;  %v2865_v55 = vpop.f32.mrb[16].mxu1 }
 0x236   :  { %v2847_v56 = vpop.f32.mrb[15].mxu0  ;;  %v2866_v57 = vpop.f32.mrb[17].mxu1 }
 0x237   :  { %v2074_v58 = vadd.f32 %v2845_v53, %v2033_v48  ;;  %v2848_v2 = vadd.f32 %v2847_v56, %v2846_v54  ;;  %v2867_v59 = vadd.f32 %v2866_v57, %v2865_v55  ;;  %v2868_v60 = vpop.f32.mrb[18].mxu1 }
 0x238   :  { %v2869_v61 = vpop.f32.mrb[19].mxu1 }
 0x239   :  { %v2077_v62 = vadd.f32 %v2848_v2, %v2036_v50  ;;  %v2115_v63 = vadd.f32 %v2867_v59, %v2074_v58  ;;  %v2870_v0 = vadd.f32 %v2869_v61, %v2868_v60 }
 0x23b   :  { %v2118_v1 = vadd.f32 %v2870_v0, %v2077_v62 }
 0x273   :  { %v2887_v3 = vpop.f32.mrb[16].mxu0 }
 0x274   :  { %v2888_v4 = vpop.f32.mrb[17].mxu0 }
 0x275   :  { %v2889_v5 = vadd.f32 %v2888_v4, %v2887_v3  ;;  %v2890_v6 = vpop.f32.mrb[18].mxu0 }
 0x276   :  { %v2891_v11 = vpop.f32.mrb[19].mxu0 }
 0x277   :  { %v2156_v12 = vadd.f32 %v2889_v5, %v2115_v63  ;;  %v2892_v13 = vadd.f32 %v2891_v11, %v2890_v6 }
 0x279   :  { %v2159_v14 = vadd.f32 %v2892_v13, %v2118_v1  ;;  %v2162_v47 = vmax.f32 %v2156_v12, 0.0 }
 0x27b   :  { %v2163_v15 = vmax.f32 %v2159_v14, 0.0 }
 0x27d   :  { %v2164_v16 = vpack.c.bf16 %v2163_v15, %v2162_v47 }
 0x27f   :  { %2937 = vmatmul.mubr.bf16.vlgmr.msra.gmra.mrb[20].mxu1 %v2164_v16 }
 0x280   :  { %2976 = vmatprep.mubr.msk.bf16.mxu1 %vm3330_vm0, %v3329_v8  ;;  %2961 = vmatpush3.bf16.msra.mxu1 %v3321_v19 }
 0x281   :  { %2962 = vmatprep.subr.bf16.mxu1 %v3329_v8 }
 0x284   :  { %2963 = vmatpush3.bf16.msra.mxu1 %v3322_v20 }
 0x285   :  { %2964 = vmatprep.subr.bf16.mxu1 %v3329_v8 }
 0x288   :  { %2965 = vmatpush3.bf16.msra.mxu1 %v3323_v21 }
 0x289   :  { %2966 = vmatprep.subr.bf16.mxu1 %v3329_v8 }
 0x28c   :  { %2967 = vmatpush3.bf16.msra.mxu1 %v3324_v7 }
 0x28d   :  { %2968 = vmatprep.subr.bf16.mxu1 %v3329_v8 }
 0x290   :  { %2969 = vmatpush3.bf16.msra.mxu1 %v3325_v10 }
 0x291   :  { %2970 = vmatprep.subr.bf16.mxu1 %v3329_v8 }
 0x294   :  { %2971 = vmatpush3.bf16.msra.mxu1 %v3326_v22 }
 0x295   :  { %2972 = vmatprep.subr.bf16.mxu1 %v3329_v8 }
 0x298   :  { %2973 = vmatpush3.bf16.msra.mxu1 %v3327_v9 }
 0x299   :  { %2974 = vmatprep.subr.bf16.mxu1 %v3329_v8  ;;  %v2774_v8 = vld [vmem:[%s4295_s10] ss:$0 sm:$0xff] }
 0x29c   :  { %2975 = vmatpush3.bf16.msra.mxu1 %v3328_v33 }
 0x352   :  { %v2270_v24 = vpop.f32.mrb[20].mxu1 }
 0x353   :  { %v2271_v25 = vadd.f32 %v2756_v23, %v2270_v24  ;;  %v2938_v26 = vpop.f32.mrb[21].mxu1 }
 0x354   :  { %v2273_v27 = vpop.f32.mrb[22].mxu1 }
 0x355   :  { %v2274_v28 = vadd.f32 %v2756_v23, %v2273_v27  ;;  %v2939_v29 = vpop.f32.mrb[23].mxu1  ;;  %v2277_v30 = vmax.f32 %v2271_v25, 0.0 }
 0x357   :  { %v2278_v31 = vmax.f32 %v2274_v28, 0.0 }
 0x359   :  { %v2279_v32 = vpack.c.bf16 %v2278_v31, %v2277_v30 }
 0x35b   :  { %2957 = vmatmul.mubr.bf16.vlgmr.msra.gmra.mrb[20].mxu0 %v2279_v32 }
 0x42e   :  { %v2385_v35 = vpop.f32.mrb[20].mxu0 }
 0x42f   :  { %v2386_v36 = vadd.f32 %v2765_v34, %v2385_v35  ;;  %v2958_v37 = vpop.f32.mrb[21].mxu0 }
 0x430   :  { %v2388_v38 = vpop.f32.mrb[22].mxu0 }
 0x431   :  { %v2389_v39 = vadd.f32 %v2765_v34, %v2388_v38  ;;  %v2959_v40 = vpop.f32.mrb[23].mxu0  ;;  %v2392_v41 = vmax.f32 %v2386_v36, 0.0 }
 0x433   :  { %v2393_v42 = vmax.f32 %v2389_v39, 0.0 }
 0x435   :  { %v2394_v43 = vpack.c.bf16 %v2393_v42, %v2392_v41 }
 0x437   :  { %2977 = vmatmul.mubr.bf16.vlgmr.msra.gmra.mrb[24].mxu1 %v2394_v43 }
 0x50a   :  { %v2500_v44 = vpop.f32.mrb[24].mxu1 }
 0x50b   :  { %v2501_v45 = vadd.f32 %v2774_v8, %v2500_v44  ;;  %v2978_v46 = vpop.f32.mrb[25].mxu1 }
 0x50c   :  { %v2503_v48 = vpop.f32.mrb[26].mxu1 }
 0x50d   :  { %2507 = vst [vmem:[%s4296_s11] sm:$0xff] %v2501_v45  ;;  %v2504_v49 = vadd.f32 %v2774_v8, %v2503_v48  ;;  %v2979_v50 = vpop.f32.mrb[27].mxu1 }
 0x50f   :  { %2508 = vst [vmem:[%s4296_s11 + $0x8] sm:$0xff] %v2504_v49 }

</bundles_post_ra>
